<compile_context>
chip_gen: v7x
topology: tpu7x:2x2x1
jax: 0.10.0
libtpu: 0.0.40
codegen_flags: <defaults>
</compile_context>

<pallas_src>
import jax
import jax.numpy as jnp
from jax import lax
from jax.experimental import pallas as pl
from jax.experimental.pallas import tpu as pltpu

BN_EPS = 1e-5
_BF16 = jnp.bfloat16
_F32 = jnp.float32


# --------------------------------------------------------------------------
# helpers
# --------------------------------------------------------------------------
def _row_tile(rows, target=256):
    """Largest divisor of `rows` that is a multiple of 8 and <= target."""
    if rows % 8 != 0:
        return rows
    best = 8
    t = 8
    while t <= min(rows, target):
        if rows % t == 0:
            best = t
        t += 8
    return best


def _fold_bn(sum_part, sq_part, count, gamma, beta):
    """Fold partial per-tile (sum, sumsq) into per-channel scale/shift."""
    s = jnp.sum(sum_part[:, 0, :], axis=0)          # (C,)
    q = jnp.sum(sq_part[:, 0, :], axis=0)           # (C,)
    mean = s / count
    var = jnp.maximum(q / count - mean * mean, 0.0)  # biased variance (PyTorch train)
    scale = gamma.reshape(-1) * lax.rsqrt(var + BN_EPS)
    shift = beta.reshape(-1) - mean * scale
    return scale.reshape(1, -1).astype(_F32), shift.reshape(1, -1).astype(_F32)


# --------------------------------------------------------------------------
# kernels
# --------------------------------------------------------------------------
def _conv1x1_stats_kernel(x_ref, w_ref, h_ref, s_ref, q_ref):
    # x_ref: (TR, Cin) f32   w_ref: (Cin, C) bf16
    # h_ref: (TR, C) f32 pre-BN conv output; s_ref/q_ref: (1, 1, C) partial stats
    h = jnp.dot(x_ref[...].astype(_BF16), w_ref[...],
                preferred_element_type=jnp.float32)
    h_ref[...] = h
    s_ref[0] = jnp.sum(h, axis=0, keepdims=True)
    q_ref[0] = jnp.sum(h * h, axis=0, keepdims=True)


def _bn_relu_conv3x3_stats_kernel(h1_ref, sc_ref, sh_ref, w_ref,
                                  h2_ref, s_ref, q_ref, hp_scr, pt_scr):
    # h1_ref : (1, H, W, C) pre-BN conv1 output (one image)
    # sc/sh  : (1, C) folded bn1 scale / shift
    # w_ref  : (9*C, C) bf16 conv2 weights in im2col layout
    # h2_ref : (1, H, W, C) conv2 output (pre-BN)
    # s/q    : (1, 1, C) partial stats
    # hp_scr : (H+2, W+2, C) f32 zero-padded activation scratch
    # pt_scr : (H*W, 9*C)  f32 im2col patch matrix scratch
    _, H, W, C = h1_ref.shape
    rows = H * W

    # bn1 (fused scale/shift) + relu
    a = jnp.maximum(h1_ref[0] * sc_ref[...] + sh_ref[...], 0.0)    # (H, W, C)

    # in-kernel spatial zero-padding (padding=1) — no HBM round trip
    hp_scr[...] = jnp.zeros_like(hp_scr)
    hp_scr[1:H + 1, 1:W + 1, :] = a

    # im2col: one (rows, 9C) patch matrix, one K=9C MXU matmul
    for dy in range(3):
        for dx in range(3):
            k = dy * 3 + dx
            pt_scr[:, k * C:(k + 1) * C] = \
                hp_scr[dy:dy + H, dx:dx + W, :].reshape(rows, C)
    h2 = jnp.dot(pt_scr[...].astype(_BF16), w_ref[...],
                 preferred_element_type=jnp.float32)               # (rows, C)

    h2_ref[0] = h2.reshape(H, W, C)
    s_ref[0] = jnp.sum(h2, axis=0, keepdims=True)
    q_ref[0] = jnp.sum(h2 * h2, axis=0, keepdims=True)


def _bn_relu_conv1x1_stats_kernel(h_ref, sc_ref, sh_ref, w_ref,
                                  o_ref, s_ref, q_ref):
    # h_ref: (TR, C) pre-BN conv2 output; w_ref: (C, Cout) bf16
    a = jnp.maximum(h_ref[...] * sc_ref[...] + sh_ref[...], 0.0)
    o = jnp.dot(a.astype(_BF16), w_ref[...], preferred_element_type=jnp.float32)
    o_ref[...] = o
    s_ref[0] = jnp.sum(o, axis=0, keepdims=True)
    q_ref[0] = jnp.sum(o * o, axis=0, keepdims=True)


def _bn_add_proj_relu_kernel(h_ref, sc_ref, sh_ref, x_ref, ws_ref, bs_ref, y_ref):
    # bn3 (scale/shift) + 1x1 projection shortcut + add + relu
    s = jnp.dot(x_ref[...].astype(_BF16), ws_ref[...],
                preferred_element_type=jnp.float32) + bs_ref[...]
    y_ref[...] = jnp.maximum(h_ref[...] * sc_ref[...] + sh_ref[...] + s, 0.0)


def _bn_add_id_relu_kernel(h_ref, sc_ref, sh_ref, x_ref, y_ref):
    # bn3 (scale/shift) + identity shortcut (plain add, no matmul) + relu
    y_ref[...] = jnp.maximum(h_ref[...] * sc_ref[...] + sh_ref[...] + x_ref[...], 0.0)


# --------------------------------------------------------------------------
# wrapper
# --------------------------------------------------------------------------
def block_forward(x_nhwc, params):
    (w1, b1, g1, be1, w2, b2, g2, be2, w3, b3, g3, be3, ws, bs) = params
    # conv biases b1/b2/b3 are algebraically cancelled by training-mode BN mean
    # subtraction, so the kernels never apply them.
    del b1, b2, b3

    N, H, W, Cin = x_nhwc.shape
    C = w1.shape[1]
    Cout = w3.shape[1]
    R = N * H * W
    TR = _row_tile(R)
    nt = R // TR

    x2d = x_nhwc.reshape(R, Cin)
    w1b = w1.astype(_BF16)
    w2b = w2.reshape(9 * C, C).astype(_BF16)   # (kh, kw, Cin, Cout) -> im2col layout
    w3b = w3.astype(_BF16)

    par = pltpu.CompilerParams(dimension_semantics=("parallel",))

    # ---- pass 1: conv1 (1x1) + bn1 partial stats ------------------------
    h1, s1, q1 = pl.pallas_call(
        _conv1x1_stats_kernel,
        out_shape=(jax.ShapeDtypeStruct((R, C), _F32),
                   jax.ShapeDtypeStruct((nt, 1, C), _F32),
                   jax.ShapeDtypeStruct((nt, 1, C), _F32)),
        grid=(nt,),
        in_specs=[pl.BlockSpec((TR, Cin), lambda i: (i, 0)),
                  pl.BlockSpec((Cin, C), lambda i: (0, 0))],
        out_specs=(pl.BlockSpec((TR, C), lambda i: (i, 0)),
                   pl.BlockSpec((1, 1, C), lambda i: (i, 0, 0)),
                   pl.BlockSpec((1, 1, C), lambda i: (i, 0, 0))),
        compiler_params=par,
        cost_estimate=pl.CostEstimate(
            flops=2 * R * Cin * C, transcendentals=0,
            bytes_accessed=4 * R * (Cin + C) + 2 * Cin * C),
    )(x2d, w1b)
    sc1, sh1 = _fold_bn(s1, q1, R, g1, be1)

    # ---- pass 2: bn1+relu, conv2 (3x3 im2col, in-kernel pad) + bn2 stats -
    h1_img = h1.reshape(N, H, W, C)
    h2, s2, q2 = pl.pallas_call(
        _bn_relu_conv3x3_stats_kernel,
        out_shape=(jax.ShapeDtypeStruct((N, H, W, C), _F32),
                   jax.ShapeDtypeStruct((N, 1, C), _F32),
                   jax.ShapeDtypeStruct((N, 1, C), _F32)),
        grid=(N,),
        in_specs=[pl.BlockSpec((1, H, W, C), lambda b: (b, 0, 0, 0)),
                  pl.BlockSpec((1, C), lambda b: (0, 0)),
                  pl.BlockSpec((1, C), lambda b: (0, 0)),
                  pl.BlockSpec((9 * C, C), lambda b: (0, 0))],
        out_specs=(pl.BlockSpec((1, H, W, C), lambda b: (b, 0, 0, 0)),
                   pl.BlockSpec((1, 1, C), lambda b: (b, 0, 0)),
                   pl.BlockSpec((1, 1, C), lambda b: (b, 0, 0))),
        scratch_shapes=[pltpu.VMEM((H + 2, W + 2, C), _F32),
                        pltpu.VMEM((H * W, 9 * C), _F32)],
        compiler_params=par,
        cost_estimate=pl.CostEstimate(
            flops=2 * R * 9 * C * C, transcendentals=0,
            bytes_accessed=8 * R * C + 2 * 9 * C * C),
    )(h1_img, sc1, sh1, w2b)
    sc2, sh2 = _fold_bn(s2, q2, R, g2, be2)

    # ---- pass 3: bn2+relu, conv3 (1x1) + bn3 partial stats ---------------
    h3, s3, q3 = pl.pallas_call(
        _bn_relu_conv1x1_stats_kernel,
        out_shape=(jax.ShapeDtypeStruct((R, Cout), _F32),
                   jax.ShapeDtypeStruct((nt, 1, Cout), _F32),
                   jax.ShapeDtypeStruct((nt, 1, Cout), _F32)),
        grid=(nt,),
        in_specs=[pl.BlockSpec((TR, C), lambda i: (i, 0)),
                  pl.BlockSpec((1, C), lambda i: (0, 0)),
                  pl.BlockSpec((1, C), lambda i: (0, 0)),
                  pl.BlockSpec((C, Cout), lambda i: (0, 0))],
        out_specs=(pl.BlockSpec((TR, Cout), lambda i: (i, 0)),
                   pl.BlockSpec((1, 1, Cout), lambda i: (i, 0, 0)),
                   pl.BlockSpec((1, 1, Cout), lambda i: (i, 0, 0))),
        compiler_params=par,
        cost_estimate=pl.CostEstimate(
            flops=2 * R * C * Cout, transcendentals=0,
            bytes_accessed=4 * R * (C + Cout) + 2 * C * Cout),
    )(h2.reshape(R, C), sc2, sh2, w3b)
    sc3, sh3 = _fold_bn(s3, q3, R, g3, be3)

    # ---- pass 4: bn3 + shortcut + add + relu ------------------------------
    if ws is not None:   # projection shortcut (channel_in != channel_out)
        wsb = ws.astype(_BF16)
        y2d = pl.pallas_call(
            _bn_add_proj_relu_kernel,
            out_shape=jax.ShapeDtypeStruct((R, Cout), _F32),
            grid=(nt,),
            in_specs=[pl.BlockSpec((TR, Cout), lambda i: (i, 0)),
                      pl.BlockSpec((1, Cout), lambda i: (0, 0)),
                      pl.BlockSpec((1, Cout), lambda i: (0, 0)),
                      pl.BlockSpec((TR, Cin), lambda i: (i, 0)),
                      pl.BlockSpec((Cin, Cout), lambda i: (0, 0)),
                      pl.BlockSpec((1, Cout), lambda i: (0, 0))],
            out_specs=pl.BlockSpec((TR, Cout), lambda i: (i, 0)),
            compiler_params=par,
            cost_estimate=pl.CostEstimate(
                flops=2 * R * Cin * Cout, transcendentals=0,
                bytes_accessed=4 * R * (Cin + 2 * Cout) + 2 * Cin * Cout),
        )(h3, sc3, sh3, x2d, wsb, bs)
    else:                # identity shortcut: plain add, no wasted matmul
        y2d = pl.pallas_call(
            _bn_add_id_relu_kernel,
            out_shape=jax.ShapeDtypeStruct((R, Cout), _F32),
            grid=(nt,),
            in_specs=[pl.BlockSpec((TR, Cout), lambda i: (i, 0)),
                      pl.BlockSpec((1, Cout), lambda i: (0, 0)),
                      pl.BlockSpec((1, Cout), lambda i: (0, 0)),
                      pl.BlockSpec((TR, Cout), lambda i: (i, 0))],
            out_specs=pl.BlockSpec((TR, Cout), lambda i: (i, 0)),
            compiler_params=par,
            cost_estimate=pl.CostEstimate(
                flops=2 * R * Cout, transcendentals=0,
                bytes_accessed=12 * R * Cout),
        )(h3, sc3, sh3, x2d)

    return y2d.reshape(N, H, W, Cout)


# --------------------------------------------------------------------------
# parameters & pure-JAX reference
# --------------------------------------------------------------------------
def init_params(key, channel_in, channel_out):
    channel = channel_out // 4
    ks = jax.random.split(key, 8)

    def u(k, shape, fan_in):
        bound = 1.0 / float(fan_in) ** 0.5
        return jax.random.uniform(k, shape, _F32, -bound, bound)

    w1 = u(ks[0], (channel_in, channel), channel_in)
    b1 = u(ks[1], (1, channel), channel_in)
    w2 = u(ks[2], (3, 3, channel, channel), 9 * channel)       # HWIO
    b2 = u(ks[3], (1, channel), 9 * channel)
    w3 = u(ks[4], (channel, channel_out), channel)
    b3 = u(ks[5], (1, channel_out), channel)
    if channel_in != channel_out:
        ws = u(ks[6], (channel_in, channel_out), channel_in)
        bs = u(ks[7], (1, channel_out), channel_in)
    else:
        ws, bs = None, None                                    # identity shortcut
    g1, be1 = jnp.ones((1, channel), _F32), jnp.zeros((1, channel), _F32)
    g2, be2 = jnp.ones((1, channel), _F32), jnp.zeros((1, channel), _F32)
    g3, be3 = jnp.ones((1, channel_out), _F32), jnp.zeros((1, channel_out), _F32)
    return (w1, b1, g1, be1, w2, b2, g2, be2, w3, b3, g3, be3, ws, bs)


def block_reference(x_nhwc, params):
    # Pure-JAX reference (lax.conv) with bf16 conv operands / f32 accumulation,
    # matching PyTorch training-mode forward semantics (incl. conv biases).
    (w1, b1, g1, be1, w2, b2, g2, be2, w3, b3, g3, be3, ws, bs) = params
    dn = ('NHWC', 'HWIO', 'NHWC')
    Cin = x_nhwc.shape[-1]
    C = w1.shape[1]

    def conv(x, w, pad):
        return lax.conv_general_dilated(
            x.astype(_BF16), w.astype(_BF16), (1, 1), pad,
            dimension_numbers=dn, preferred_element_type=jnp.float32)

    def bn(h, g, b):
        mean = jnp.mean(h, axis=(0, 1, 2), keepdims=True)
        var = jnp.mean(jnp.square(h - mean), axis=(0, 1, 2), keepdims=True)
        return (h - mean) * lax.rsqrt(var + BN_EPS) * g.reshape(1, 1, 1, -1) \
            + b.reshape(1, 1, 1, -1)

    h = conv(x_nhwc, w1.reshape(1, 1, Cin, C), 'VALID') + b1.reshape(1, 1, 1, -1)
    h = jax.nn.relu(bn(h, g1, be1))
    h = conv(h, w2, ((1, 1), (1, 1))) + b2.reshape(1, 1, 1, -1)
    h = jax.nn.relu(bn(h, g2, be2))
    h = conv(h, w3.reshape(1, 1, C, -1), 'VALID') + b3.reshape(1, 1, 1, -1)
    h = bn(h, g3, be3)
    if ws is None:
        s = x_nhwc
    else:
        s = conv(x_nhwc, ws.reshape(1, 1, Cin, -1), 'VALID') + bs.reshape(1, 1, 1, -1)
    return jax.nn.relu(h + s)


# --------------------------------------------------------------------------
# test
# --------------------------------------------------------------------------
def _run_case(key, N, Cin, H, W, Cout):
    kx, kp = jax.random.split(key)
    x_nchw = jax.random.normal(kx, (N, Cin, H, W), _F32)    # PyTorch-style NCHW
    x_nhwc = jnp.transpose(x_nchw, (0, 2, 3, 1))
    params = init_params(kp, Cin, Cout)

    y = jax.jit(block_forward)(x_nhwc, params)
    jax.block_until_ready(y)

    y_ref = block_reference(x_nhwc, params)
    assert y.shape == (N, H, W, Cout)
    err = float(jnp.max(jnp.abs(y - y_ref)))
    if not jnp.allclose(y, y_ref, rtol=3e-3, atol=3e-3):
        raise AssertionError(
            f"mismatch (Cin={Cin}, Cout={Cout}): max abs err = {err}")


if __name__ == "__main__":
    key = jax.random.PRNGKey(0)
    k1, k2 = jax.random.split(key)
    _run_case(k1, N=2, Cin=8, H=16, W=16, Cout=32)    # projection shortcut
    _run_case(k2, N=2, Cin=32, H=8, W=8, Cout=32)     # identity shortcut
    print("KERNEL_OK")
</pallas_src>

<mosaic_0001>
module attributes {stable_mosaic.version = 11 : i64} {
  func.func @_conv1x1_stats_kernel(%arg0: i32, %arg1: memref<256x8xf32, #tpu.memory_space<vmem>>, %arg2: memref<8x8xbf16, #tpu.memory_space<vmem>>, %arg3: memref<256x8xf32, #tpu.memory_space<vmem>>, %arg4: memref<1x1x8xf32, #tpu.memory_space<vmem>>, %arg5: memref<1x1x8xf32, #tpu.memory_space<vmem>>) attributes {dimension_semantics = [#tpu.dimension_semantics<parallel>], iteration_bounds = array<i64: 2>, scalar_prefetch = 0 : i64, scratch_operands = 0 : i64, tpu.core_type = #tpu.core_type<tc>, window_params = [{transform_indices = @transform_0, window_bounds = array<i64: 256, 8>}, {pipeline_mode = #tpu.pipeline_mode<synchronous>, transform_indices = @transform_1, window_bounds = array<i64: 8, 8>}, {transform_indices = @transform_2, window_bounds = array<i64: 256, 8>}, {transform_indices = @transform_3, window_bounds = array<i64: 1, 1, 8>}, {transform_indices = @transform_4, window_bounds = array<i64: 1, 1, 8>}]} {
    %c0 = arith.constant 0 : index
    %c0_0 = arith.constant 0 : index
    %0 = vector.load %arg1[%c0, %c0_0] : memref<256x8xf32, #tpu.memory_space<vmem>>, vector<256x8xf32>
    %1 = arith.truncf %0 : vector<256x8xf32> to vector<256x8xbf16>
    %c0_1 = arith.constant 0 : index
    %c0_2 = arith.constant 0 : index
    %2 = vector.load %arg2[%c0_1, %c0_2] : memref<8x8xbf16, #tpu.memory_space<vmem>>, vector<8x8xbf16>
    %cst = arith.constant dense<0.000000e+00> : vector<256x8xf32>
    %3 = tpu.matmul %1, %2, %cst {dimension_numbers = #tpu.dot_dimension_numbers<[1], [0], [0], [1], [0, 0, 1, 1], [], []>} : vector<256x8xbf16>, vector<8x8xbf16>, vector<256x8xf32> -> vector<256x8xf32>
    %c0_3 = arith.constant 0 : index
    %c0_4 = arith.constant 0 : index
    %4 = vector.load %arg3[%c0_3, %c0_4] : memref<256x8xf32, #tpu.memory_space<vmem>>, vector<256x8xf32>
    tpu.vector_store %arg3[%c0_3, %c0_4], %3 {strides = array<i32>} : memref<256x8xf32, #tpu.memory_space<vmem>>, vector<256x8xf32>,
    %cst_5 = arith.constant dense<0.000000e+00> : vector<8xf32>
    %5 = vector.multi_reduction <add>, %3, %cst_5 [0] : vector<256x8xf32> to vector<8xf32>
    %6 = vector.shape_cast %5 : vector<8xf32> to vector<1x8xf32>
    %c0_6 = arith.constant 0 : index
    %c0_7 = arith.constant 0 : index
    %c0_8 = arith.constant 0 : index
    %7 = vector.load %arg4[%c0_6, %c0_7, %c0_8] : memref<1x1x8xf32, #tpu.memory_space<vmem>>, vector<1x1x8xf32>
    %8 = vector.shape_cast %7 : vector<1x1x8xf32> to vector<1x8xf32>
    %9 = vector.shape_cast %6 : vector<1x8xf32> to vector<1x1x8xf32>
    tpu.vector_store %arg4[%c0_6, %c0_7, %c0_8], %9 {strides = array<i32>} : memref<1x1x8xf32, #tpu.memory_space<vmem>>, vector<1x1x8xf32>,
    %10 = arith.mulf %3, %3 : vector<256x8xf32>
    %cst_9 = arith.constant dense<0.000000e+00> : vector<8xf32>
    %11 = vector.multi_reduction <add>, %10, %cst_9 [0] : vector<256x8xf32> to vector<8xf32>
    %12 = vector.shape_cast %11 : vector<8xf32> to vector<1x8xf32>
    %c0_10 = arith.constant 0 : index
    %c0_11 = arith.constant 0 : index
    %c0_12 = arith.constant 0 : index
    %13 = vector.load %arg5[%c0_10, %c0_11, %c0_12] : memref<1x1x8xf32, #tpu.memory_space<vmem>>, vector<1x1x8xf32>
    %14 = vector.shape_cast %13 : vector<1x1x8xf32> to vector<1x8xf32>
    %15 = vector.shape_cast %12 : vector<1x8xf32> to vector<1x1x8xf32>
    tpu.vector_store %arg5[%c0_10, %c0_11, %c0_12], %15 {strides = array<i32>} : memref<1x1x8xf32, #tpu.memory_space<vmem>>, vector<1x1x8xf32>,
    return
  }
  func.func @transform_0(%arg0: i32) -> (i32, i32) {
    %c0_i32 = arith.constant 0 : i32
    %c0_i32_0 = arith.constant 0 : i32
    return %arg0, %c0_i32 : i32, i32
  }
  func.func @transform_1(%arg0: i32) -> (i32, i32) {
    %c0_i32 = arith.constant 0 : i32
    %c0_i32_0 = arith.constant 0 : i32
    %c0_i32_1 = arith.constant 0 : i32
    return %c0_i32, %c0_i32_0 : i32, i32
  }
  func.func @transform_2(%arg0: i32) -> (i32, i32) {
    %c0_i32 = arith.constant 0 : i32
    %c0_i32_0 = arith.constant 0 : i32
    return %arg0, %c0_i32 : i32, i32
  }
  func.func @transform_3(%arg0: i32) -> (i32, i32, i32) {
    %c0_i32 = arith.constant 0 : i32
    %c0_i32_0 = arith.constant 0 : i32
    %c0_i32_1 = arith.constant 0 : i32
    return %arg0, %c0_i32, %c0_i32_0 : i32, i32, i32
  }
  func.func @transform_4(%arg0: i32) -> (i32, i32, i32) {
    %c0_i32 = arith.constant 0 : i32
    %c0_i32_0 = arith.constant 0 : i32
    %c0_i32_1 = arith.constant 0 : i32
    return %arg0, %c0_i32, %c0_i32_0 : i32, i32, i32
  }
}

module attributes {stable_mosaic.version = 11 : i64} {
  func.func @_bn_relu_conv3x3_stats_kernel(%arg0: i32, %arg1: memref<1x16x16x8xf32, #tpu.memory_space<vmem>>, %arg2: memref<1x8xf32, #tpu.memory_space<vmem>>, %arg3: memref<1x8xf32, #tpu.memory_space<vmem>>, %arg4: memref<72x8xbf16, #tpu.memory_space<vmem>>, %arg5: memref<1x16x16x8xf32, #tpu.memory_space<vmem>>, %arg6: memref<1x1x8xf32, #tpu.memory_space<vmem>>, %arg7: memref<1x1x8xf32, #tpu.memory_space<vmem>>, %arg8: memref<18x18x8xf32, #tpu.memory_space<vmem>>, %arg9: memref<256x72xf32, #tpu.memory_space<vmem>>) attributes {dimension_semantics = [#tpu.dimension_semantics<parallel>], iteration_bounds = array<i64: 2>, scalar_prefetch = 0 : i64, scratch_operands = 2 : i64, tpu.core_type = #tpu.core_type<tc>, window_params = [{transform_indices = @transform_0, window_bounds = array<i64: 1, 16, 16, 8>}, {pipeline_mode = #tpu.pipeline_mode<synchronous>, transform_indices = @transform_1, window_bounds = array<i64: 1, 8>}, {pipeline_mode = #tpu.pipeline_mode<synchronous>, transform_indices = @transform_2, window_bounds = array<i64: 1, 8>}, {pipeline_mode = #tpu.pipeline_mode<synchronous>, transform_indices = @transform_3, window_bounds = array<i64: 72, 8>}, {transform_indices = @transform_4, window_bounds = array<i64: 1, 16, 16, 8>}, {transform_indices = @transform_5, window_bounds = array<i64: 1, 1, 8>}, {transform_indices = @transform_6, window_bounds = array<i64: 1, 1, 8>}]} {
    %c0 = arith.constant 0 : index
    %c0_0 = arith.constant 0 : index
    %c0_1 = arith.constant 0 : index
    %c0_2 = arith.constant 0 : index
    %0 = vector.load %arg1[%c0, %c0_0, %c0_1, %c0_2] : memref<1x16x16x8xf32, #tpu.memory_space<vmem>>, vector<1x16x16x8xf32>
    %1 = vector.shape_cast %0 : vector<1x16x16x8xf32> to vector<16x16x8xf32>
    %c0_3 = arith.constant 0 : index
    %c0_4 = arith.constant 0 : index
    %2 = vector.load %arg2[%c0_3, %c0_4] : memref<1x8xf32, #tpu.memory_space<vmem>>, vector<1x8xf32>
    %3 = vector.shape_cast %2 : vector<1x8xf32> to vector<1x1x8xf32>
    %4 = vector.broadcast %3 : vector<1x1x8xf32> to vector<16x16x8xf32>
    %5 = arith.mulf %1, %4 : vector<16x16x8xf32>
    %c0_5 = arith.constant 0 : index
    %c0_6 = arith.constant 0 : index
    %6 = vector.load %arg3[%c0_5, %c0_6] : memref<1x8xf32, #tpu.memory_space<vmem>>, vector<1x8xf32>
    %7 = vector.shape_cast %6 : vector<1x8xf32> to vector<1x1x8xf32>
    %8 = vector.broadcast %7 : vector<1x1x8xf32> to vector<16x16x8xf32>
    %9 = arith.addf %5, %8 : vector<16x16x8xf32>
    %cst = arith.constant 0.000000e+00 : f32
    %10 = vector.broadcast %cst : f32 to vector<16x16x8xf32>
    %11 = arith.maximumf %9, %10 : vector<16x16x8xf32>
    %cst_7 = arith.constant 0.000000e+00 : f32
    %12 = vector.broadcast %cst_7 : f32 to vector<18x18x8xf32>
    %c0_8 = arith.constant 0 : index
    %c0_9 = arith.constant 0 : index
    %c0_10 = arith.constant 0 : index
    %13 = vector.load %arg8[%c0_8, %c0_9, %c0_10] : memref<18x18x8xf32, #tpu.memory_space<vmem>>, vector<18x18x8xf32>
    tpu.vector_store %arg8[%c0_8, %c0_9, %c0_10], %12 {strides = array<i32>} : memref<18x18x8xf32, #tpu.memory_space<vmem>>, vector<18x18x8xf32>,
    %c1 = arith.constant 1 : index
    %c1_11 = arith.constant 1 : index
    %c0_12 = arith.constant 0 : index
    %14 = vector.load %arg8[%c1, %c1_11, %c0_12] : memref<18x18x8xf32, #tpu.memory_space<vmem>>, vector<16x16x8xf32>
    tpu.vector_store %arg8[%c1, %c1_11, %c0_12], %11 {strides = array<i32>} : memref<18x18x8xf32, #tpu.memory_space<vmem>>, vector<16x16x8xf32>,
    %c0_13 = arith.constant 0 : index
    %c0_14 = arith.constant 0 : index
    %c0_15 = arith.constant 0 : index
    %15 = vector.load %arg8[%c0_13, %c0_14, %c0_15] : memref<18x18x8xf32, #tpu.memory_space<vmem>>, vector<16x16x8xf32>
    %16 = vector.shape_cast %15 : vector<16x16x8xf32> to vector<256x8xf32>
    %c0_16 = arith.constant 0 : index
    %c0_17 = arith.constant 0 : index
    %17 = vector.load %arg9[%c0_16, %c0_17] : memref<256x72xf32, #tpu.memory_space<vmem>>, vector<256x8xf32>
    tpu.vector_store %arg9[%c0_16, %c0_17], %16 {strides = array<i32>} : memref<256x72xf32, #tpu.memory_space<vmem>>, vector<256x8xf32>,
    %c0_18 = arith.constant 0 : index
    %c1_19 = arith.constant 1 : index
    %c0_20 = arith.constant 0 : index
    %18 = vector.load %arg8[%c0_18, %c1_19, %c0_20] : memref<18x18x8xf32, #tpu.memory_space<vmem>>, vector<16x16x8xf32>
    %19 = vector.shape_cast %18 : vector<16x16x8xf32> to vector<256x8xf32>
    %c0_21 = arith.constant 0 : index
    %c8 = arith.constant 8 : index
    %20 = vector.load %arg9[%c0_21, %c8] : memref<256x72xf32, #tpu.memory_space<vmem>>, vector<256x8xf32>
    tpu.vector_store %arg9[%c0_21, %c8], %19 {strides = array<i32>} : memref<256x72xf32, #tpu.memory_space<vmem>>, vector<256x8xf32>,
    %c0_22 = arith.constant 0 : index
    %c2 = arith.constant 2 : index
    %c0_23 = arith.constant 0 : index
    %21 = vector.load %arg8[%c0_22, %c2, %c0_23] : memref<18x18x8xf32, #tpu.memory_space<vmem>>, vector<16x16x8xf32>
    %22 = vector.shape_cast %21 : vector<16x16x8xf32> to vector<256x8xf32>
    %c0_24 = arith.constant 0 : index
    %c16 = arith.constant 16 : index
    %23 = vector.load %arg9[%c0_24, %c16] : memref<256x72xf32, #tpu.memory_space<vmem>>, vector<256x8xf32>
    tpu.vector_store %arg9[%c0_24, %c16], %22 {strides = array<i32>} : memref<256x72xf32, #tpu.memory_space<vmem>>, vector<256x8xf32>,
    %c1_25 = arith.constant 1 : index
    %c0_26 = arith.constant 0 : index
    %c0_27 = arith.constant 0 : index
    %24 = vector.load %arg8[%c1_25, %c0_26, %c0_27] : memref<18x18x8xf32, #tpu.memory_space<vmem>>, vector<16x16x8xf32>
    %25 = vector.shape_cast %24 : vector<16x16x8xf32> to vector<256x8xf32>
    %c0_28 = arith.constant 0 : index
    %c24 = arith.constant 24 : index
    %26 = vector.load %arg9[%c0_28, %c24] : memref<256x72xf32, #tpu.memory_space<vmem>>, vector<256x8xf32>
    tpu.vector_store %arg9[%c0_28, %c24], %25 {strides = array<i32>} : memref<256x72xf32, #tpu.memory_space<vmem>>, vector<256x8xf32>,
    %c1_29 = arith.constant 1 : index
    %c1_30 = arith.constant 1 : index
    %c0_31 = arith.constant 0 : index
    %27 = vector.load %arg8[%c1_29, %c1_30, %c0_31] : memref<18x18x8xf32, #tpu.memory_space<vmem>>, vector<16x16x8xf32>
    %28 = vector.shape_cast %27 : vector<16x16x8xf32> to vector<256x8xf32>
    %c0_32 = arith.constant 0 : index
    %c32 = arith.constant 32 : index
    %29 = vector.load %arg9[%c0_32, %c32] : memref<256x72xf32, #tpu.memory_space<vmem>>, vector<256x8xf32>
    tpu.vector_store %arg9[%c0_32, %c32], %28 {strides = array<i32>} : memref<256x72xf32, #tpu.memory_space<vmem>>, vector<256x8xf32>,
    %c1_33 = arith.constant 1 : index
    %c2_34 = arith.constant 2 : index
    %c0_35 = arith.constant 0 : index
    %30 = vector.load %arg8[%c1_33, %c2_34, %c0_35] : memref<18x18x8xf32, #tpu.memory_space<vmem>>, vector<16x16x8xf32>
    %31 = vector.shape_cast %30 : vector<16x16x8xf32> to vector<256x8xf32>
    %c0_36 = arith.constant 0 : index
    %c40 = arith.constant 40 : index
    %32 = vector.load %arg9[%c0_36, %c40] : memref<256x72xf32, #tpu.memory_space<vmem>>, vector<256x8xf32>
    tpu.vector_store %arg9[%c0_36, %c40], %31 {strides = array<i32>} : memref<256x72xf32, #tpu.memory_space<vmem>>, vector<256x8xf32>,
    %c2_37 = arith.constant 2 : index
    %c0_38 = arith.constant 0 : index
    %c0_39 = arith.constant 0 : index
    %33 = vector.load %arg8[%c2_37, %c0_38, %c0_39] : memref<18x18x8xf32, #tpu.memory_space<vmem>>, vector<16x16x8xf32>
    %34 = vector.shape_cast %33 : vector<16x16x8xf32> to vector<256x8xf32>
    %c0_40 = arith.constant 0 : index
    %c48 = arith.constant 48 : index
    %35 = vector.load %arg9[%c0_40, %c48] : memref<256x72xf32, #tpu.memory_space<vmem>>, vector<256x8xf32>
    tpu.vector_store %arg9[%c0_40, %c48], %34 {strides = array<i32>} : memref<256x72xf32, #tpu.memory_space<vmem>>, vector<256x8xf32>,
    %c2_41 = arith.constant 2 : index
    %c1_42 = arith.constant 1 : index
    %c0_43 = arith.constant 0 : index
    %36 = vector.load %arg8[%c2_41, %c1_42, %c0_43] : memref<18x18x8xf32, #tpu.memory_space<vmem>>, vector<16x16x8xf32>
    %37 = vector.shape_cast %36 : vector<16x16x8xf32> to vector<256x8xf32>
    %c0_44 = arith.constant 0 : index
    %c56 = arith.constant 56 : index
    %38 = vector.load %arg9[%c0_44, %c56] : memref<256x72xf32, #tpu.memory_space<vmem>>, vector<256x8xf32>
    tpu.vector_store %arg9[%c0_44, %c56], %37 {strides = array<i32>} : memref<256x72xf32, #tpu.memory_space<vmem>>, vector<256x8xf32>,
    %c2_45 = arith.constant 2 : index
    %c2_46 = arith.constant 2 : index
    %c0_47 = arith.constant 0 : index
    %39 = vector.load %arg8[%c2_45, %c2_46, %c0_47] : memref<18x18x8xf32, #tpu.memory_space<vmem>>, vector<16x16x8xf32>
    %40 = vector.shape_cast %39 : vector<16x16x8xf32> to vector<256x8xf32>
    %c0_48 = arith.constant 0 : index
    %c64 = arith.constant 64 : index
    %41 = vector.load %arg9[%c0_48, %c64] : memref<256x72xf32, #tpu.memory_space<vmem>>, vector<256x8xf32>
    tpu.vector_store %arg9[%c0_48, %c64], %40 {strides = array<i32>} : memref<256x72xf32, #tpu.memory_space<vmem>>, vector<256x8xf32>,
    %c0_49 = arith.constant 0 : index
    %c0_50 = arith.constant 0 : index
    %42 = vector.load %arg9[%c0_49, %c0_50] : memref<256x72xf32, #tpu.memory_space<vmem>>, vector<256x72xf32>
    %43 = arith.truncf %42 : vector<256x72xf32> to vector<256x72xbf16>
    %c0_51 = arith.constant 0 : index
    %c0_52 = arith.constant 0 : index
    %44 = vector.load %arg4[%c0_51, %c0_52] : memref<72x8xbf16, #tpu.memory_space<vmem>>, vector<72x8xbf16>
    %cst_53 = arith.constant dense<0.000000e+00> : vector<256x8xf32>
    %45 = tpu.matmul %43, %44, %cst_53 {dimension_numbers = #tpu.dot_dimension_numbers<[1], [0], [0], [1], [0, 0, 1, 1], [], []>} : vector<256x72xbf16>, vector<72x8xbf16>, vector<256x8xf32> -> vector<256x8xf32>
    %46 = vector.shape_cast %45 : vector<256x8xf32> to vector<16x16x8xf32>
    %c0_54 = arith.constant 0 : index
    %c0_55 = arith.constant 0 : index
    %c0_56 = arith.constant 0 : index
    %c0_57 = arith.constant 0 : index
    %47 = vector.load %arg5[%c0_54, %c0_55, %c0_56, %c0_57] : memref<1x16x16x8xf32, #tpu.memory_space<vmem>>, vector<1x16x16x8xf32>
    %48 = vector.shape_cast %47 : vector<1x16x16x8xf32> to vector<16x16x8xf32>
    %49 = vector.shape_cast %46 : vector<16x16x8xf32> to vector<1x16x16x8xf32>
    tpu.vector_store %arg5[%c0_54, %c0_55, %c0_56, %c0_57], %49 {strides = array<i32>} : memref<1x16x16x8xf32, #tpu.memory_space<vmem>>, vector<1x16x16x8xf32>,
    %cst_58 = arith.constant dense<0.000000e+00> : vector<8xf32>
    %50 = vector.multi_reduction <add>, %45, %cst_58 [0] : vector<256x8xf32> to vector<8xf32>
    %51 = vector.shape_cast %50 : vector<8xf32> to vector<1x8xf32>
    %c0_59 = arith.constant 0 : index
    %c0_60 = arith.constant 0 : index
    %c0_61 = arith.constant 0 : index
    %52 = vector.load %arg6[%c0_59, %c0_60, %c0_61] : memref<1x1x8xf32, #tpu.memory_space<vmem>>, vector<1x1x8xf32>
    %53 = vector.shape_cast %52 : vector<1x1x8xf32> to vector<1x8xf32>
    %54 = vector.shape_cast %51 : vector<1x8xf32> to vector<1x1x8xf32>
    tpu.vector_store %arg6[%c0_59, %c0_60, %c0_61], %54 {strides = array<i32>} : memref<1x1x8xf32, #tpu.memory_space<vmem>>, vector<1x1x8xf32>,
    %55 = arith.mulf %45, %45 : vector<256x8xf32>
    %cst_62 = arith.constant dense<0.000000e+00> : vector<8xf32>
    %56 = vector.multi_reduction <add>, %55, %cst_62 [0] : vector<256x8xf32> to vector<8xf32>
    %57 = vector.shape_cast %56 : vector<8xf32> to vector<1x8xf32>
    %c0_63 = arith.constant 0 : index
    %c0_64 = arith.constant 0 : index
    %c0_65 = arith.constant 0 : index
    %58 = vector.load %arg7[%c0_63, %c0_64, %c0_65] : memref<1x1x8xf32, #tpu.memory_space<vmem>>, vector<1x1x8xf32>
    %59 = vector.shape_cast %58 : vector<1x1x8xf32> to vector<1x8xf32>
    %60 = vector.shape_cast %57 : vector<1x8xf32> to vector<1x1x8xf32>
    tpu.vector_store %arg7[%c0_63, %c0_64, %c0_65], %60 {strides = array<i32>} : memref<1x1x8xf32, #tpu.memory_space<vmem>>, vector<1x1x8xf32>,
    return
  }
  func.func @transform_0(%arg0: i32) -> (i32, i32, i32, i32) {
    %c0_i32 = arith.constant 0 : i32
    %c0_i32_0 = arith.constant 0 : i32
    %c0_i32_1 = arith.constant 0 : i32
    %c0_i32_2 = arith.constant 0 : i32
    return %arg0, %c0_i32, %c0_i32_0, %c0_i32_1 : i32, i32, i32, i32
  }
  func.func @transform_1(%arg0: i32) -> (i32, i32) {
    %c0_i32 = arith.constant 0 : i32
    %c0_i32_0 = arith.constant 0 : i32
    %c0_i32_1 = arith.constant 0 : i32
    return %c0_i32, %c0_i32_0 : i32, i32
  }
  func.func @transform_2(%arg0: i32) -> (i32, i32) {
    %c0_i32 = arith.constant 0 : i32
    %c0_i32_0 = arith.constant 0 : i32
    %c0_i32_1 = arith.constant 0 : i32
    return %c0_i32, %c0_i32_0 : i32, i32
  }
  func.func @transform_3(%arg0: i32) -> (i32, i32) {
    %c0_i32 = arith.constant 0 : i32
    %c0_i32_0 = arith.constant 0 : i32
    %c0_i32_1 = arith.constant 0 : i32
    return %c0_i32, %c0_i32_0 : i32, i32
  }
  func.func @transform_4(%arg0: i32) -> (i32, i32, i32, i32) {
    %c0_i32 = arith.constant 0 : i32
    %c0_i32_0 = arith.constant 0 : i32
    %c0_i32_1 = arith.constant 0 : i32
    %c0_i32_2 = arith.constant 0 : i32
    return %arg0, %c0_i32, %c0_i32_0, %c0_i32_1 : i32, i32, i32, i32
  }
  func.func @transform_5(%arg0: i32) -> (i32, i32, i32) {
    %c0_i32 = arith.constant 0 : i32
    %c0_i32_0 = arith.constant 0 : i32
    %c0_i32_1 = arith.constant 0 : i32
    return %arg0, %c0_i32, %c0_i32_0 : i32, i32, i32
  }
  func.func @transform_6(%arg0: i32) -> (i32, i32, i32) {
    %c0_i32 = arith.constant 0 : i32
    %c0_i32_0 = arith.constant 0 : i32
    %c0_i32_1 = arith.constant 0 : i32
    return %arg0, %c0_i32, %c0_i32_0 : i32, i32, i32
  }
}

module attributes {stable_mosaic.version = 11 : i64} {
  func.func @_bn_relu_conv1x1_stats_kernel(%arg0: i32, %arg1: memref<256x8xf32, #tpu.memory_space<vmem>>, %arg2: memref<1x8xf32, #tpu.memory_space<vmem>>, %arg3: memref<1x8xf32, #tpu.memory_space<vmem>>, %arg4: memref<8x32xbf16, #tpu.memory_space<vmem>>, %arg5: memref<256x32xf32, #tpu.memory_space<vmem>>, %arg6: memref<1x1x32xf32, #tpu.memory_space<vmem>>, %arg7: memref<1x1x32xf32, #tpu.memory_space<vmem>>) attributes {dimension_semantics = [#tpu.dimension_semantics<parallel>], iteration_bounds = array<i64: 2>, scalar_prefetch = 0 : i64, scratch_operands = 0 : i64, tpu.core_type = #tpu.core_type<tc>, window_params = [{transform_indices = @transform_0, window_bounds = array<i64: 256, 8>}, {pipeline_mode = #tpu.pipeline_mode<synchronous>, transform_indices = @transform_1, window_bounds = array<i64: 1, 8>}, {pipeline_mode = #tpu.pipeline_mode<synchronous>, transform_indices = @transform_2, window_bounds = array<i64: 1, 8>}, {pipeline_mode = #tpu.pipeline_mode<synchronous>, transform_indices = @transform_3, window_bounds = array<i64: 8, 32>}, {transform_indices = @transform_4, window_bounds = array<i64: 256, 32>}, {transform_indices = @transform_5, window_bounds = array<i64: 1, 1, 32>}, {transform_indices = @transform_6, window_bounds = array<i64: 1, 1, 32>}]} {
    %c0 = arith.constant 0 : index
    %c0_0 = arith.constant 0 : index
    %0 = vector.load %arg1[%c0, %c0_0] : memref<256x8xf32, #tpu.memory_space<vmem>>, vector<256x8xf32>
    %c0_1 = arith.constant 0 : index
    %c0_2 = arith.constant 0 : index
    %1 = vector.load %arg2[%c0_1, %c0_2] : memref<1x8xf32, #tpu.memory_space<vmem>>, vector<1x8xf32>
    %2 = vector.broadcast %1 : vector<1x8xf32> to vector<256x8xf32>
    %3 = arith.mulf %0, %2 : vector<256x8xf32>
    %c0_3 = arith.constant 0 : index
    %c0_4 = arith.constant 0 : index
    %4 = vector.load %arg3[%c0_3, %c0_4] : memref<1x8xf32, #tpu.memory_space<vmem>>, vector<1x8xf32>
    %5 = vector.broadcast %4 : vector<1x8xf32> to vector<256x8xf32>
    %6 = arith.addf %3, %5 : vector<256x8xf32>
    %cst = arith.constant 0.000000e+00 : f32
    %7 = vector.broadcast %cst : f32 to vector<256x8xf32>
    %8 = arith.maximumf %6, %7 : vector<256x8xf32>
    %9 = arith.truncf %8 : vector<256x8xf32> to vector<256x8xbf16>
    %c0_5 = arith.constant 0 : index
    %c0_6 = arith.constant 0 : index
    %10 = vector.load %arg4[%c0_5, %c0_6] : memref<8x32xbf16, #tpu.memory_space<vmem>>, vector<8x32xbf16>
    %cst_7 = arith.constant dense<0.000000e+00> : vector<256x32xf32>
    %11 = tpu.matmul %9, %10, %cst_7 {dimension_numbers = #tpu.dot_dimension_numbers<[1], [0], [0], [1], [0, 0, 1, 1], [], []>} : vector<256x8xbf16>, vector<8x32xbf16>, vector<256x32xf32> -> vector<256x32xf32>
    %c0_8 = arith.constant 0 : index
    %c0_9 = arith.constant 0 : index
    %12 = vector.load %arg5[%c0_8, %c0_9] : memref<256x32xf32, #tpu.memory_space<vmem>>, vector<256x32xf32>
    tpu.vector_store %arg5[%c0_8, %c0_9], %11 {strides = array<i32>} : memref<256x32xf32, #tpu.memory_space<vmem>>, vector<256x32xf32>,
    %cst_10 = arith.constant dense<0.000000e+00> : vector<32xf32>
    %13 = vector.multi_reduction <add>, %11, %cst_10 [0] : vector<256x32xf32> to vector<32xf32>
    %14 = vector.shape_cast %13 : vector<32xf32> to vector<1x32xf32>
    %c0_11 = arith.constant 0 : index
    %c0_12 = arith.constant 0 : index
    %c0_13 = arith.constant 0 : index
    %15 = vector.load %arg6[%c0_11, %c0_12, %c0_13] : memref<1x1x32xf32, #tpu.memory_space<vmem>>, vector<1x1x32xf32>
    %16 = vector.shape_cast %15 : vector<1x1x32xf32> to vector<1x32xf32>
    %17 = vector.shape_cast %14 : vector<1x32xf32> to vector<1x1x32xf32>
    tpu.vector_store %arg6[%c0_11, %c0_12, %c0_13], %17 {strides = array<i32>} : memref<1x1x32xf32, #tpu.memory_space<vmem>>, vector<1x1x32xf32>,
    %18 = arith.mulf %11, %11 : vector<256x32xf32>
    %cst_14 = arith.constant dense<0.000000e+00> : vector<32xf32>
    %19 = vector.multi_reduction <add>, %18, %cst_14 [0] : vector<256x32xf32> to vector<32xf32>
    %20 = vector.shape_cast %19 : vector<32xf32> to vector<1x32xf32>
    %c0_15 = arith.constant 0 : index
    %c0_16 = arith.constant 0 : index
    %c0_17 = arith.constant 0 : index
    %21 = vector.load %arg7[%c0_15, %c0_16, %c0_17] : memref<1x1x32xf32, #tpu.memory_space<vmem>>, vector<1x1x32xf32>
    %22 = vector.shape_cast %21 : vector<1x1x32xf32> to vector<1x32xf32>
    %23 = vector.shape_cast %20 : vector<1x32xf32> to vector<1x1x32xf32>
    tpu.vector_store %arg7[%c0_15, %c0_16, %c0_17], %23 {strides = array<i32>} : memref<1x1x32xf32, #tpu.memory_space<vmem>>, vector<1x1x32xf32>,
    return
  }
  func.func @transform_0(%arg0: i32) -> (i32, i32) {
    %c0_i32 = arith.constant 0 : i32
    %c0_i32_0 = arith.constant 0 : i32
    return %arg0, %c0_i32 : i32, i32
  }
  func.func @transform_1(%arg0: i32) -> (i32, i32) {
    %c0_i32 = arith.constant 0 : i32
    %c0_i32_0 = arith.constant 0 : i32
    %c0_i32_1 = arith.constant 0 : i32
    return %c0_i32, %c0_i32_0 : i32, i32
  }
  func.func @transform_2(%arg0: i32) -> (i32, i32) {
    %c0_i32 = arith.constant 0 : i32
    %c0_i32_0 = arith.constant 0 : i32
    %c0_i32_1 = arith.constant 0 : i32
    return %c0_i32, %c0_i32_0 : i32, i32
  }
  func.func @transform_3(%arg0: i32) -> (i32, i32) {
    %c0_i32 = arith.constant 0 : i32
    %c0_i32_0 = arith.constant 0 : i32
    %c0_i32_1 = arith.constant 0 : i32
    return %c0_i32, %c0_i32_0 : i32, i32
  }
  func.func @transform_4(%arg0: i32) -> (i32, i32) {
    %c0_i32 = arith.constant 0 : i32
    %c0_i32_0 = arith.constant 0 : i32
    return %arg0, %c0_i32 : i32, i32
  }
  func.func @transform_5(%arg0: i32) -> (i32, i32, i32) {
    %c0_i32 = arith.constant 0 : i32
    %c0_i32_0 = arith.constant 0 : i32
    %c0_i32_1 = arith.constant 0 : i32
    return %arg0, %c0_i32, %c0_i32_0 : i32, i32, i32
  }
  func.func @transform_6(%arg0: i32) -> (i32, i32, i32) {
    %c0_i32 = arith.constant 0 : i32
    %c0_i32_0 = arith.constant 0 : i32
    %c0_i32_1 = arith.constant 0 : i32
    return %arg0, %c0_i32, %c0_i32_0 : i32, i32, i32
  }
}

module attributes {stable_mosaic.version = 11 : i64} {
  func.func @_bn_add_proj_relu_kernel(%arg0: i32, %arg1: memref<256x32xf32, #tpu.memory_space<vmem>>, %arg2: memref<1x32xf32, #tpu.memory_space<vmem>>, %arg3: memref<1x32xf32, #tpu.memory_space<vmem>>, %arg4: memref<256x8xf32, #tpu.memory_space<vmem>>, %arg5: memref<8x32xbf16, #tpu.memory_space<vmem>>, %arg6: memref<1x32xf32, #tpu.memory_space<vmem>>, %arg7: memref<256x32xf32, #tpu.memory_space<vmem>>) attributes {dimension_semantics = [#tpu.dimension_semantics<parallel>], iteration_bounds = array<i64: 2>, scalar_prefetch = 0 : i64, scratch_operands = 0 : i64, tpu.core_type = #tpu.core_type<tc>, window_params = [{transform_indices = @transform_0, window_bounds = array<i64: 256, 32>}, {pipeline_mode = #tpu.pipeline_mode<synchronous>, transform_indices = @transform_1, window_bounds = array<i64: 1, 32>}, {pipeline_mode = #tpu.pipeline_mode<synchronous>, transform_indices = @transform_2, window_bounds = array<i64: 1, 32>}, {transform_indices = @transform_3, window_bounds = array<i64: 256, 8>}, {pipeline_mode = #tpu.pipeline_mode<synchronous>, transform_indices = @transform_4, window_bounds = array<i64: 8, 32>}, {pipeline_mode = #tpu.pipeline_mode<synchronous>, transform_indices = @transform_5, window_bounds = array<i64: 1, 32>}, {transform_indices = @transform_6, window_bounds = array<i64: 256, 32>}]} {
    %c0 = arith.constant 0 : index
    %c0_0 = arith.constant 0 : index
    %0 = vector.load %arg4[%c0, %c0_0] : memref<256x8xf32, #tpu.memory_space<vmem>>, vector<256x8xf32>
    %1 = arith.truncf %0 : vector<256x8xf32> to vector<256x8xbf16>
    %c0_1 = arith.constant 0 : index
    %c0_2 = arith.constant 0 : index
    %2 = vector.load %arg5[%c0_1, %c0_2] : memref<8x32xbf16, #tpu.memory_space<vmem>>, vector<8x32xbf16>
    %cst = arith.constant dense<0.000000e+00> : vector<256x32xf32>
    %3 = tpu.matmul %1, %2, %cst {dimension_numbers = #tpu.dot_dimension_numbers<[1], [0], [0], [1], [0, 0, 1, 1], [], []>} : vector<256x8xbf16>, vector<8x32xbf16>, vector<256x32xf32> -> vector<256x32xf32>
    %c0_3 = arith.constant 0 : index
    %c0_4 = arith.constant 0 : index
    %4 = vector.load %arg6[%c0_3, %c0_4] : memref<1x32xf32, #tpu.memory_space<vmem>>, vector<1x32xf32>
    %5 = vector.broadcast %4 : vector<1x32xf32> to vector<256x32xf32>
    %6 = arith.addf %3, %5 : vector<256x32xf32>
    %c0_5 = arith.constant 0 : index
    %c0_6 = arith.constant 0 : index
    %7 = vector.load %arg1[%c0_5, %c0_6] : memref<256x32xf32, #tpu.memory_space<vmem>>, vector<256x32xf32>
    %c0_7 = arith.constant 0 : index
    %c0_8 = arith.constant 0 : index
    %8 = vector.load %arg2[%c0_7, %c0_8] : memref<1x32xf32, #tpu.memory_space<vmem>>, vector<1x32xf32>
    %9 = vector.broadcast %8 : vector<1x32xf32> to vector<256x32xf32>
    %10 = arith.mulf %7, %9 : vector<256x32xf32>
    %c0_9 = arith.constant 0 : index
    %c0_10 = arith.constant 0 : index
    %11 = vector.load %arg3[%c0_9, %c0_10] : memref<1x32xf32, #tpu.memory_space<vmem>>, vector<1x32xf32>
    %12 = vector.broadcast %11 : vector<1x32xf32> to vector<256x32xf32>
    %13 = arith.addf %10, %12 : vector<256x32xf32>
    %14 = arith.addf %13, %6 : vector<256x32xf32>
    %cst_11 = arith.constant 0.000000e+00 : f32
    %15 = vector.broadcast %cst_11 : f32 to vector<256x32xf32>
    %16 = arith.maximumf %14, %15 : vector<256x32xf32>
    %c0_12 = arith.constant 0 : index
    %c0_13 = arith.constant 0 : index
    %17 = vector.load %arg7[%c0_12, %c0_13] : memref<256x32xf32, #tpu.memory_space<vmem>>, vector<256x32xf32>
    tpu.vector_store %arg7[%c0_12, %c0_13], %16 {strides = array<i32>} : memref<256x32xf32, #tpu.memory_space<vmem>>, vector<256x32xf32>,
    return
  }
  func.func @transform_0(%arg0: i32) -> (i32, i32) {
    %c0_i32 = arith.constant 0 : i32
    %c0_i32_0 = arith.constant 0 : i32
    return %arg0, %c0_i32 : i32, i32
  }
  func.func @transform_1(%arg0: i32) -> (i32, i32) {
    %c0_i32 = arith.constant 0 : i32
    %c0_i32_0 = arith.constant 0 : i32
    %c0_i32_1 = arith.constant 0 : i32
    return %c0_i32, %c0_i32_0 : i32, i32
  }
  func.func @transform_2(%arg0: i32) -> (i32, i32) {
    %c0_i32 = arith.constant 0 : i32
    %c0_i32_0 = arith.constant 0 : i32
    %c0_i32_1 = arith.constant 0 : i32
    return %c0_i32, %c0_i32_0 : i32, i32
  }
  func.func @transform_3(%arg0: i32) -> (i32, i32) {
    %c0_i32 = arith.constant 0 : i32
    %c0_i32_0 = arith.constant 0 : i32
    return %arg0, %c0_i32 : i32, i32
  }
  func.func @transform_4(%arg0: i32) -> (i32, i32) {
    %c0_i32 = arith.constant 0 : i32
    %c0_i32_0 = arith.constant 0 : i32
    %c0_i32_1 = arith.constant 0 : i32
    return %c0_i32, %c0_i32_0 : i32, i32
  }
  func.func @transform_5(%arg0: i32) -> (i32, i32) {
    %c0_i32 = arith.constant 0 : i32
    %c0_i32_0 = arith.constant 0 : i32
    %c0_i32_1 = arith.constant 0 : i32
    return %c0_i32, %c0_i32_0 : i32, i32
  }
  func.func @transform_6(%arg0: i32) -> (i32, i32) {
    %c0_i32 = arith.constant 0 : i32
    %c0_i32_0 = arith.constant 0 : i32
    return %arg0, %c0_i32 : i32, i32
  }
}

</mosaic_0001>

<bundles_post_ra>
// kernel: block_forward.4
= control target key start
LH: loop header
LB: loop body
LE: loop exit
PB: predicated region body
PF: predicated region fallthrough
CT: control target
= control target key end

     0   :  { %s916_s15 = smov 0   ;;  %s1230_s0 = inlined_call_operand.vmem [shape: f32[512,8], index: 0, kind: input, shape index: {}]   ;;  %s1231_s1 = inlined_call_operand.vmem [shape: bf16[8,8], index: 1, kind: input, shape index: {}]   ;;  %s1232_s2 = inlined_call_operand.vmem [shape: f32[512,8], index: 2, kind: output, shape index: {0}]   ;;  %s1233_s3 = inlined_call_operand.vmem [shape: f32[2,1,8], index: 3, kind: output, shape index: {1}]   ;;  %s1234_s4 = inlined_call_operand.vmem [shape: f32[2,1,8], index: 4, kind: output, shape index: {2}]  }
   0x1 LB: > { %s922_s16 = sadd.s32 4294967295, %s889_s15   ;;  %p797_p0 = scmp.ge.s32.totalorder %s889_s15, 1  ;;  %s889_s15 = sphi %s916_s15, %s15_s15  }
   0x2   : > { %p168_p1 = scmp.lt.s32.totalorder %s889_s15, 3 }
   0x4   : > { %p169_p2 = pnand %p797_p0, %p168_p1 }
   0x5   : > { %v267_v0 = vld [vmem:[%s1231_s1] sm:$0xf] (!%p169_p2)  ;;  %vm317_vm0 = vcmask (!%p169_p2), 1043456   ;;  %s798_s19 = sshll.u32 (!%p169_p2), %s922_s16, 5  ;;  %vm268_vm1 = vcmask (!%p169_p2), 64512   ;;  %p212_p4 = scmp.lt.s32.totalorder (!%p169_p2), %s922_s16, 1 }
   0x6   : > { %172 = sbr.rel (%p169_p2) target bundleno = 313 (0x139), region = 28  ;;  %873 = vmatprep.subr.msk.bf16.mxu0 (!%p169_p2), %vm317_vm0, %v267_v0  ;;  %v319_v1 = vsel (!%p169_p2), %vm317_vm0, %v267_v0, 0  ;;  %p201_p3 = scmp.lt.s32.totalorder (!%p169_p2), %s798_s19, 63  ;;  %874 = vmatprep.subr.msk.bf16.mxu1 (!%p169_p2), %vm317_vm0, %v267_v0  ;;  %vm583_vm2 = vcmask (!%p169_p2), 57344  }
   0x7   : > { %838 = vmatpush3.bf16.msra.mxu0 (!%p169_p2), %v319_v1  ;;  %872 = vmatpush3.bf16.msra.mxu1 (!%p169_p2), %v319_v1 }
   0xd   : > { %s1236_s19 = smov (!%p201_p3, %s798_s19), 63  ;;  %s1238_s16 = smov (!%p212_p4, %s922_s16), 1 }
   0xe   : > { %s799_s20 = sshll.u32 %s1236_s19, 3  ;;  %s214_s29 = scalar_lea.vmem %s1233_s3, %s1238_s16 }
   0xf   : > { %s938_s23 = scalar_lea.vmem %s1230_s0, %s799_s20  ;;  %s993_s26 = scalar_lea.vmem %s1232_s2, %s799_s20 }
  0x10   : > { %v219_v2 = vld [vmem:[%s938_s23] sm:$0xff]  ;;  %v220_v3 = vld [vmem:[%s938_s23 + $0x8] sm:$0xff]  ;;  %v221_v4 = vld [vmem:[%s938_s23 + $0x10] sm:$0xff]  ;;  %s217_s6 = scalar_lea.vmem %s1234_s4, %s1238_s16 }
  0x11   : > { %v251_v5 = vpack.c.bf16 %v220_v3, %v219_v2  ;;  %v222_v6 = vld [vmem:[%s938_s23 + $0x18] sm:$0xff]  ;;  %v223_v7 = vld [vmem:[%s938_s23 + $0x20] sm:$0xff]  ;;  %v224_v8 = vld [vmem:[%s938_s23 + $0x28] sm:$0xff] }
  0x12   : > { %v252_v9 = vpack.c.bf16 %v222_v6, %v221_v4  ;;  %v253_v10 = vpack.c.bf16 %v224_v8, %v223_v7  ;;  %v225_v11 = vld [vmem:[%s938_s23 + $0x30] sm:$0xff]  ;;  %v226_v12 = vld [vmem:[%s938_s23 + $0x38] sm:$0xff]  ;;  %v227_v13 = vld [vmem:[%s938_s23 + $0x40] sm:$0xff] }
  0x13   : > { %839 = vmatprep.mubr.msk.bf16.mxu0 %vm268_vm1, %v251_v5  ;;  %v228_v14 = vld [vmem:[%s938_s23 + $0x48] sm:$0xff]  ;;  %v235_v15 = vld [vmem:[%s938_s23 + $0x80] sm:$0xff]  ;;  %v237_v18 = vld [vmem:[%s938_s23 + $0x90] sm:$0xff]  ;;  %v254_v23 = vpack.c.bf16 %v226_v12, %v225_v11 }
  0x14   : > { %840 = vmatmul.mubr.msk.bf16.vlgmr.msra.gmra.mrb[0].mxu0 %vm268_vm1, %v252_v9  ;;  %v236_v16 = vld [vmem:[%s938_s23 + $0x88] sm:$0xff]  ;;  %v238_v19 = vld [vmem:[%s938_s23 + $0x98] sm:$0xff]  ;;  %v239_v20 = vld [vmem:[%s938_s23 + $0xa0] sm:$0xff]  ;;  %v255_v25 = vpack.c.bf16 %v228_v14, %v227_v13 }
  0x15   : > { %843 = vmatprep.mubr.msk.bf16.mxu0 %vm268_vm1, %v253_v10  ;;  %v259_v17 = vpack.c.bf16 %v236_v16, %v235_v15  ;;  %v260_v21 = vpack.c.bf16 %v238_v19, %v237_v18  ;;  %v240_v22 = vld [vmem:[%s938_s23 + $0xa8] sm:$0xff]  ;;  %v241_v26 = vld [vmem:[%s938_s23 + $0xb0] sm:$0xff]  ;;  %v242_v27 = vld [vmem:[%s938_s23 + $0xb8] sm:$0xff] }
  0x16   : > { %v261_v24 = vpack.c.bf16 %v240_v22, %v239_v20  ;;  %v243_v28 = vld [vmem:[%s938_s23 + $0xc0] sm:$0xff]  ;;  %v244_v29 = vld [vmem:[%s938_s23 + $0xc8] sm:$0xff]  ;;  %v229_v30 = vld [vmem:[%s938_s23 + $0x50] sm:$0xff]  ;;  %v262_v32 = vpack.c.bf16 %v242_v27, %v241_v26 }
  0x17   : > { %855 = vmatprep.mubr.msk.bf16.mxu1 %vm268_vm1, %v259_v17  ;;  %v230_v31 = vld [vmem:[%s938_s23 + $0x58] sm:$0xff]  ;;  %v231_v33 = vld [vmem:[%s938_s23 + $0x60] sm:$0xff]  ;;  %v232_v34 = vld [vmem:[%s938_s23 + $0x68] sm:$0xff]  ;;  %v263_v35 = vpack.c.bf16 %v244_v29, %v243_v28 }
  0x18   : > { %856 = vmatmul.mubr.msk.bf16.vlgmr.msra.gmra.mrb[0].mxu1 %vm268_vm1, %v260_v21  ;;  %v256_v36 = vpack.c.bf16 %v230_v31, %v229_v30  ;;  %v257_v37 = vpack.c.bf16 %v232_v34, %v231_v33  ;;  %v245_v38 = vld [vmem:[%s938_s23 + $0xd0] sm:$0xff]  ;;  %v246_v39 = vld [vmem:[%s938_s23 + $0xd8] sm:$0xff]  ;;  %v247_v40 = vld [vmem:[%s938_s23 + $0xe0] sm:$0xff] }
  0x19   : > { %859 = vmatprep.mubr.msk.bf16.mxu1 %vm268_vm1, %v261_v24  ;;  %v248_v41 = vld [vmem:[%s938_s23 + $0xe8] sm:$0xff]  ;;  %v233_v42 = vld [vmem:[%s938_s23 + $0x70] sm:$0xff]  ;;  %v234_v43 = vld [vmem:[%s938_s23 + $0x78] sm:$0xff]  ;;  %v264_v44 = vpack.c.bf16 %v246_v39, %v245_v38 }
  0x1a   : > { %v265_v45 = vpack.c.bf16 %v248_v41, %v247_v40  ;;  %v258_v46 = vpack.c.bf16 %v234_v43, %v233_v42  ;;  %v249_v47 = vld [vmem:[%s938_s23 + $0xf0] sm:$0xff]  ;;  %v250_v48 = vld [vmem:[%s938_s23 + $0xf8] sm:$0xff] }
  0x1b   : > { %v266_v49 = vpack.c.bf16 %v250_v48, %v249_v47 }
  0x1c   : > { %844 = vmatmul.mubr.msk.bf16.gmra.mrb[4].mxu0 %vm268_vm1, %v254_v23 }
  0x1d   : > { %847 = vmatprep.mubr.msk.bf16.mxu0 %vm268_vm1, %v255_v25 }
  0x20   : > { %860 = vmatmul.mubr.msk.bf16.gmra.mrb[4].mxu1 %vm268_vm1, %v262_v32 }
  0x21   : > { %863 = vmatprep.mubr.msk.bf16.mxu1 %vm268_vm1, %v263_v35 }
  0x24   : > { %848 = vmatmul.mubr.msk.bf16.gmra.mrb[8].mxu0 %vm268_vm1, %v256_v36 }
  0x25   : > { %851 = vmatprep.mubr.msk.bf16.mxu0 %vm268_vm1, %v257_v37 }
  0x28   : > { %864 = vmatmul.mubr.msk.bf16.gmra.mrb[8].mxu1 %vm268_vm1, %v264_v44 }
  0x29   : > { %867 = vmatprep.mubr.msk.bf16.mxu1 %vm268_vm1, %v265_v45 }
  0x2c   : > { %852 = vmatmul.mubr.msk.bf16.gmra.mrb[12].mxu0 %vm268_vm1, %v258_v46 }
  0x30   : > { %868 = vmatmul.mubr.msk.bf16.gmra.mrb[12].mxu1 %vm268_vm1, %v266_v49 }
  0xe7   : > { %v841_v50 = vpop.f32.mrb[0].mxu0 }
  0xe8   : > { %484 = vst.msk [vmem:[%s993_s26 + $0x10] sm:$0xff] %vm268_vm1, %v841_v50  ;;  %v355_v51 = vpop.f32.mrb[1].mxu0  ;;  %v587_v55 = vmul.f32 %v841_v50, %v841_v50  ;;  %v517_v61 = vsel %vm268_vm1, %v841_v50, 0.0 }
  0xe9   : > { %482 = vst.msk [vmem:[%s993_s26] sm:$0xff] %vm268_vm1, %v355_v51  ;;  %v585_v52 = vmul.f32 %v355_v51, %v355_v51  ;;  %v842_v53 = vpop.f32.mrb[2].mxu0  ;;  %v514_v56 = vsel %vm268_vm1, %v355_v51, 0.0 }
  0xea   : > { %485 = vst.msk [vmem:[%s993_s26 + $0x18] sm:$0xff] %vm268_vm1, %v842_v53  ;;  %v358_v54 = vpop.f32.mrb[3].mxu0  ;;  %v588_v63 = vmul.f32 %v842_v53, %v842_v53  ;;  %v620_v5 = vsel %vm268_vm1, %v587_v55, 0.0  ;;  %v519_v6 = vsel %vm268_vm1, %v842_v53, 0.0 }
  0xeb   : > { %483 = vst.msk [vmem:[%s993_s26 + $0x8] sm:$0xff] %vm268_vm1, %v358_v54  ;;  %v515_v57 = vsel %vm268_vm1, %v358_v54, 0.0  ;;  %v586_v58 = vmul.f32 %v358_v54, %v358_v54  ;;  %v1005_v60 = vpop.f32.mrb[0].mxu1  ;;  %v617_v62 = vsel %vm268_vm1, %v585_v52, 0.0 }
  0xec   : > { %v516_v59 = vadd.f32 %v515_v57, %v514_v56  ;;  %500 = vst.msk [vmem:[%s993_s26 + $0x90] sm:$0xff] %vm268_vm1, %v1005_v60  ;;  %v1013_v1 = vpop.f32.mrb[1].mxu1  ;;  %v622_v12 = vsel %vm268_vm1, %v588_v63, 0.0 }
  0xed   : > { %v618_v0 = vsel %vm268_vm1, %v586_v58, 0.0  ;;  %498 = vst.msk [vmem:[%s993_s26 + $0x80] sm:$0xff] %vm268_vm1, %v1013_v1  ;;  %v1018_v4 = vpop.f32.mrb[2].mxu1 }
  0xee   : > { %v518_v2 = vadd.f32 %v517_v61, %v516_v59  ;;  %v619_v3 = vadd.f32 %v618_v0, %v617_v62  ;;  %501 = vst.msk [vmem:[%s993_s26 + $0x98] sm:$0xff] %vm268_vm1, %v1018_v4  ;;  %v1025_v8 = vpop.f32.mrb[3].mxu1 }
  0xef   : > { %v845_v7 = vpop.f32.mrb[4].mxu0  ;;  %499 = vst.msk [vmem:[%s993_s26 + $0x88] sm:$0xff] %vm268_vm1, %v1025_v8 }
  0xf0   : > { %v621_v9 = vadd.f32 %v620_v5, %v619_v3  ;;  %488 = vst.msk [vmem:[%s993_s26 + $0x30] sm:$0xff] %vm268_vm1, %v845_v7  ;;  %v371_v10 = vpop.f32.mrb[5].mxu0  ;;  %v520_v11 = vadd.f32 %v519_v6, %v518_v2  ;;  %v591_v19 = vmul.f32 %v845_v7, %v845_v7  ;;  %v525_v26 = vsel %vm268_vm1, %v845_v7, 0.0 }
  0xf1   : > { %486 = vst.msk [vmem:[%s993_s26 + $0x20] sm:$0xff] %vm268_vm1, %v371_v10  ;;  %v521_v13 = vsel %vm268_vm1, %v371_v10, 0.0  ;;  %v589_v14 = vmul.f32 %v371_v10, %v371_v10  ;;  %v846_v15 = vpop.f32.mrb[6].mxu0 }
  0xf2   : > { %v522_v16 = vadd.f32 %v521_v13, %v520_v11  ;;  %v623_v17 = vadd.f32 %v622_v12, %v621_v9  ;;  %489 = vst.msk [vmem:[%s993_s26 + $0x38] sm:$0xff] %vm268_vm1, %v846_v15  ;;  %v374_v18 = vpop.f32.mrb[7].mxu0  ;;  %v592_v27 = vmul.f32 %v846_v15, %v846_v15  ;;  %v628_v33 = vsel %vm268_vm1, %v591_v19, 0.0 }
  0xf3   : > { %v624_v20 = vsel %vm268_vm1, %v589_v14, 0.0  ;;  %487 = vst.msk [vmem:[%s993_s26 + $0x28] sm:$0xff] %vm268_vm1, %v374_v18  ;;  %v523_v21 = vsel %vm268_vm1, %v374_v18, 0.0  ;;  %v590_v22 = vmul.f32 %v374_v18, %v374_v18  ;;  %v1042_v25 = vpop.f32.mrb[4].mxu1  ;;  %v527_v34 = vsel %vm268_vm1, %v846_v15, 0.0 }
  0xf4   : > { %v625_v23 = vadd.f32 %v624_v20, %v623_v17  ;;  %v524_v24 = vadd.f32 %v523_v21, %v522_v16  ;;  %504 = vst.msk [vmem:[%s993_s26 + $0xb0] sm:$0xff] %vm268_vm1, %v1042_v25  ;;  %v1049_v29 = vpop.f32.mrb[5].mxu1  ;;  %v630_v40 = vsel %vm268_vm1, %v592_v27, 0.0 }
  0xf5   : > { %v626_v28 = vsel %vm268_vm1, %v590_v22, 0.0  ;;  %502 = vst.msk [vmem:[%s993_s26 + $0xa0] sm:$0xff] %vm268_vm1, %v1049_v29  ;;  %v1054_v32 = vpop.f32.mrb[6].mxu1 }
  0xf6   : > { %v526_v30 = vadd.f32 %v525_v26, %v524_v24  ;;  %v627_v31 = vadd.f32 %v626_v28, %v625_v23  ;;  %505 = vst.msk [vmem:[%s993_s26 + $0xb8] sm:$0xff] %vm268_vm1, %v1054_v32  ;;  %v1061_v36 = vpop.f32.mrb[7].mxu1  ;;  %v601_v26 = vmul.f32 %v1013_v1, %v1013_v1 }
  0xf7   : > { %v849_v35 = vpop.f32.mrb[8].mxu0  ;;  %503 = vst.msk [vmem:[%s993_s26 + $0xa8] sm:$0xff] %vm268_vm1, %v1061_v36 }
  0xf8   : > { %v629_v37 = vadd.f32 %v628_v33, %v627_v31  ;;  %492 = vst.msk [vmem:[%s993_s26 + $0x50] sm:$0xff] %vm268_vm1, %v849_v35  ;;  %v387_v38 = vpop.f32.mrb[9].mxu0  ;;  %v528_v39 = vadd.f32 %v527_v34, %v526_v30  ;;  %v595_v47 = vmul.f32 %v849_v35, %v849_v35  ;;  %v533_v54 = vsel %vm268_vm1, %v849_v35, 0.0 }
  0xf9   : > { %490 = vst.msk [vmem:[%s993_s26 + $0x40] sm:$0xff] %vm268_vm1, %v387_v38  ;;  %v529_v41 = vsel %vm268_vm1, %v387_v38, 0.0  ;;  %v593_v42 = vmul.f32 %v387_v38, %v387_v38  ;;  %v850_v43 = vpop.f32.mrb[10].mxu0  ;;  %v545_v35 = vsel %vm268_vm1, %v1013_v1, 0.0  ;;  %v603_v1 = vmul.f32 %v1005_v60, %v1005_v60 }
  0xfa   : > { %v530_v44 = vadd.f32 %v529_v41, %v528_v39  ;;  %v631_v45 = vadd.f32 %v630_v40, %v629_v37  ;;  %493 = vst.msk [vmem:[%s993_s26 + $0x58] sm:$0xff] %vm268_vm1, %v850_v43  ;;  %v390_v46 = vpop.f32.mrb[11].mxu0  ;;  %v596_v55 = vmul.f32 %v850_v43, %v850_v43  ;;  %v636_v62 = vsel %vm268_vm1, %v595_v47, 0.0 }
  0xfb   : > { %v632_v48 = vsel %vm268_vm1, %v593_v42, 0.0  ;;  %491 = vst.msk [vmem:[%s993_s26 + $0x48] sm:$0xff] %vm268_vm1, %v390_v46  ;;  %v531_v49 = vsel %vm268_vm1, %v390_v46, 0.0  ;;  %v594_v50 = vmul.f32 %v390_v46, %v390_v46  ;;  %v1078_v53 = vpop.f32.mrb[8].mxu1  ;;  %v535_v63 = vsel %vm268_vm1, %v850_v43, 0.0 }
  0xfc   : > { %v633_v51 = vadd.f32 %v632_v48, %v631_v45  ;;  %v532_v52 = vadd.f32 %v531_v49, %v530_v44  ;;  %508 = vst.msk [vmem:[%s993_s26 + $0xd0] sm:$0xff] %vm268_vm1, %v1078_v53  ;;  %v1085_v57 = vpop.f32.mrb[9].mxu1  ;;  %v638_v7 = vsel %vm268_vm1, %v596_v55, 0.0  ;;  %v648_v41 = vsel %vm268_vm1, %v601_v26, 0.0 }
  0xfd   : > { %v634_v56 = vsel %vm268_vm1, %v594_v50, 0.0  ;;  %506 = vst.msk [vmem:[%s993_s26 + $0xc0] sm:$0xff] %vm268_vm1, %v1085_v57  ;;  %v1090_v61 = vpop.f32.mrb[10].mxu1  ;;  %v602_v42 = vmul.f32 %v1025_v8, %v1025_v8  ;;  %v547_v45 = vsel %vm268_vm1, %v1025_v8, 0.0  ;;  %v549_v48 = vsel %vm268_vm1, %v1005_v60, 0.0 }
  0xfe   : > { %v534_v58 = vadd.f32 %v533_v54, %v532_v52  ;;  %v635_v59 = vadd.f32 %v634_v56, %v633_v51  ;;  %509 = vst.msk [vmem:[%s993_s26 + $0xd8] sm:$0xff] %vm268_vm1, %v1090_v61  ;;  %v1097_v2 = vpop.f32.mrb[11].mxu1  ;;  %v604_v49 = vmul.f32 %v1018_v4, %v1018_v4  ;;  %v605_v51 = vmul.f32 %v1049_v29, %v1049_v29 }
  0xff   : > { %v853_v0 = vpop.f32.mrb[12].mxu0  ;;  %507 = vst.msk [vmem:[%s993_s26 + $0xc8] sm:$0xff] %vm268_vm1, %v1097_v2  ;;  %v650_v50 = vsel %vm268_vm1, %v602_v42, 0.0  ;;  %v652_v55 = vsel %vm268_vm1, %v603_v1, 0.0  ;;  %v551_v8 = vsel %vm268_vm1, %v1018_v4, 0.0  ;;  %v553_v56 = vsel %vm268_vm1, %v1049_v29, 0.0 }
 0x100   : > { %v637_v3 = vadd.f32 %v636_v62, %v635_v59  ;;  %496 = vst.msk [vmem:[%s993_s26 + $0x70] sm:$0xff] %vm268_vm1, %v853_v0  ;;  %v403_v5 = vpop.f32.mrb[13].mxu0  ;;  %v536_v6 = vadd.f32 %v535_v63, %v534_v58  ;;  %v599_v15 = vmul.f32 %v853_v0, %v853_v0  ;;  %v541_v22 = vsel %vm268_vm1, %v853_v0, 0.0 }
 0x101   : > { %494 = vst.msk [vmem:[%s993_s26 + $0x60] sm:$0xff] %vm268_vm1, %v403_v5  ;;  %v537_v9 = vsel %vm268_vm1, %v403_v5, 0.0  ;;  %v597_v10 = vmul.f32 %v403_v5, %v403_v5  ;;  %v854_v11 = vpop.f32.mrb[14].mxu0  ;;  %v654_v59 = vsel %vm268_vm1, %v604_v49, 0.0  ;;  %v656_v62 = vsel %vm268_vm1, %v605_v51, 0.0 }
 0x102   : > { %v538_v12 = vadd.f32 %v537_v9, %v536_v6  ;;  %v639_v13 = vadd.f32 %v638_v7, %v637_v3  ;;  %497 = vst.msk [vmem:[%s993_s26 + $0x78] sm:$0xff] %vm268_vm1, %v854_v11  ;;  %v406_v14 = vpop.f32.mrb[15].mxu0  ;;  %v600_v23 = vmul.f32 %v854_v11, %v854_v11  ;;  %v644_v33 = vsel %vm268_vm1, %v599_v15, 0.0 }
 0x103   : > { %v640_v16 = vsel %vm268_vm1, %v597_v10, 0.0  ;;  %495 = vst.msk [vmem:[%s993_s26 + $0x68] sm:$0xff] %vm268_vm1, %v406_v14  ;;  %v539_v17 = vsel %vm268_vm1, %v406_v14, 0.0  ;;  %v598_v18 = vmul.f32 %v406_v14, %v406_v14  ;;  %v1114_v21 = vpop.f32.mrb[12].mxu1  ;;  %v543_v34 = vsel %vm268_vm1, %v854_v11, 0.0 }
 0x104   : > { %v641_v19 = vadd.f32 %v640_v16, %v639_v13  ;;  %v540_v20 = vadd.f32 %v539_v17, %v538_v12  ;;  %512 = vst.msk [vmem:[%s993_s26 + $0xf0] sm:$0xff] %vm268_vm1, %v1114_v21  ;;  %v1123_v27 = vpop.f32.mrb[13].mxu1  ;;  %v646_v40 = vsel %vm268_vm1, %v600_v23, 0.0  ;;  %v606_v63 = vmul.f32 %v1061_v36, %v1061_v36 }
 0x105   : > { %v642_v24 = vsel %vm268_vm1, %v598_v18, 0.0  ;;  %510 = vst.msk [vmem:[%s993_s26 + $0xe0] sm:$0xff] %vm268_vm1, %v1123_v27  ;;  %v1128_v31 = vpop.f32.mrb[14].mxu1  ;;  %v607_v5 = vmul.f32 %v1042_v25, %v1042_v25  ;;  %v555_v4 = vsel %vm268_vm1, %v1061_v36, 0.0  ;;  %v557_v29 = vsel %vm268_vm1, %v1042_v25, 0.0 }
 0x106   : > { %v542_v28 = vadd.f32 %v541_v22, %v540_v20  ;;  %v643_v30 = vadd.f32 %v642_v24, %v641_v19  ;;  %513 = vst.msk [vmem:[%s993_s26 + $0xf8] sm:$0xff] %vm268_vm1, %v1128_v31  ;;  %v1137_v37 = vpop.f32.mrb[15].mxu1  ;;  %v608_v9 = vmul.f32 %v1054_v32, %v1054_v32  ;;  %v658_v10 = vsel %vm268_vm1, %v606_v63, 0.0 }
 0x107   : > { %511 = vst.msk [vmem:[%s993_s26 + $0xe8] sm:$0xff] %vm268_vm1, %v1137_v37  ;;  %v609_v11 = vmul.f32 %v1085_v57, %v1085_v57  ;;  %v660_v14 = vsel %vm268_vm1, %v607_v5, 0.0  ;;  %v559_v36 = vsel %vm268_vm1, %v1054_v32, 0.0  ;;  %v561_v15 = vsel %vm268_vm1, %v1085_v57, 0.0 }
 0x108   : > { %v645_v38 = vadd.f32 %v644_v33, %v643_v30  ;;  %v544_v39 = vadd.f32 %v543_v34, %v542_v28  ;;  %v662_v17 = vsel %vm268_vm1, %v608_v9, 0.0  ;;  %v610_v19 = vmul.f32 %v1097_v2, %v1097_v2 }
 0x109   : > { %v664_v18 = vsel %vm268_vm1, %v609_v11, 0.0  ;;  %v611_v23 = vmul.f32 %v1078_v53, %v1078_v53  ;;  %v563_v32 = vsel %vm268_vm1, %v1097_v2, 0.0  ;;  %v565_v57 = vsel %vm268_vm1, %v1078_v53, 0.0 }
 0x10a   : > { %v546_v43 = vadd.f32 %v545_v35, %v544_v39  ;;  %v647_v44 = vadd.f32 %v646_v40, %v645_v38  ;;  %v612_v28 = vmul.f32 %v1090_v61, %v1090_v61  ;;  %v666_v30 = vsel %vm268_vm1, %v610_v19, 0.0 }
 0x10b   : > { %v613_v33 = vmul.f32 %v1123_v27, %v1123_v27  ;;  %v668_v38 = vsel %vm268_vm1, %v611_v23, 0.0  ;;  %v567_v2 = vsel %vm268_vm1, %v1090_v61, 0.0  ;;  %v569_v39 = vsel %vm268_vm1, %v1123_v27, 0.0 }
 0x10c   : > { %v649_v46 = vadd.f32 %v648_v41, %v647_v44  ;;  %v548_v47 = vadd.f32 %v547_v45, %v546_v43  ;;  %v670_v41 = vsel %vm268_vm1, %v612_v28, 0.0  ;;  %v614_v43 = vmul.f32 %v1137_v37, %v1137_v37 }
 0x10d   : > { %v672_v42 = vsel %vm268_vm1, %v613_v33, 0.0  ;;  %v615_v45 = vmul.f32 %v1114_v21, %v1114_v21  ;;  %v571_v61 = vsel %vm268_vm1, %v1137_v37, 0.0 }
 0x10e   : > { %v550_v52 = vadd.f32 %v549_v48, %v548_v47  ;;  %v651_v54 = vadd.f32 %v650_v50, %v649_v46  ;;  %v573_v47 = vsel %vm268_vm1, %v1114_v21, 0.0  ;;  %v616_v48 = vmul.f32 %v1128_v31, %v1128_v31 }
 0x10f   : > { %v674_v49 = vsel %vm268_vm1, %v614_v43, 0.0 }
 0x110   : > { %v653_v58 = vadd.f32 %v652_v55, %v651_v54  ;;  %v552_v60 = vadd.f32 %v551_v8, %v550_v52  ;;  %v676_v52 = vsel %vm268_vm1, %v615_v45, 0.0  ;;  %v575_v54 = vsel %vm268_vm1, %v1128_v31, 0.0 }
 0x111   : > { %v678_v8 = vsel %vm268_vm1, %v616_v48, 0.0 }
 0x112   : > { %v554_v0 = vadd.f32 %v553_v56, %v552_v60  ;;  %v655_v3 = vadd.f32 %v654_v59, %v653_v58 }
 0x114   : > { %v657_v6 = vadd.f32 %v656_v62, %v655_v3  ;;  %v556_v7 = vadd.f32 %v555_v4, %v554_v0 }
 0x116   : > { %v558_v12 = vadd.f32 %v557_v29, %v556_v7  ;;  %v659_v13 = vadd.f32 %v658_v10, %v657_v6 }
 0x118   : > { %v661_v16 = vadd.f32 %v660_v14, %v659_v13  ;;  %v560_v25 = vadd.f32 %v559_v36, %v558_v12 }
 0x11a   : > { %v562_v20 = vadd.f32 %v561_v15, %v560_v25  ;;  %v663_v22 = vadd.f32 %v662_v17, %v661_v16 }
 0x11c   : > { %v665_v24 = vadd.f32 %v664_v18, %v663_v22  ;;  %v564_v26 = vadd.f32 %v563_v32, %v562_v20 }
 0x11e   : > { %v566_v34 = vadd.f32 %v565_v57, %v564_v26  ;;  %v667_v35 = vadd.f32 %v666_v30, %v665_v24 }
 0x120   : > { %v669_v40 = vadd.f32 %v668_v38, %v667_v35  ;;  %v568_v53 = vadd.f32 %v567_v2, %v566_v34 }
 0x122   : > { %v570_v44 = vadd.f32 %v569_v39, %v568_v53  ;;  %v671_v1 = vadd.f32 %v670_v41, %v669_v40 }
 0x124   : > { %v673_v46 = vadd.f32 %v672_v42, %v671_v1  ;;  %v572_v27 = vadd.f32 %v571_v61, %v570_v44 }
 0x126   : > { %v574_v50 = vadd.f32 %v573_v47, %v572_v27  ;;  %v675_v51 = vadd.f32 %v674_v49, %v673_v46 }
 0x128   : > { %v576_v55 = vadd.f32 %v575_v54, %v574_v50  ;;  %v677_v37 = vadd.f32 %v676_v52, %v675_v51 }
 0x12a   : > { %v577_v56 = vrot.slane %v576_v55, 4  ;;  %v679_v58 = vadd.f32 %v678_v8, %v677_v37 }
 0x12c   : > { %v578_v21 = vadd.f32 %v577_v56, %v576_v55  ;;  %v680_v60 = vrot.slane %v679_v58, 4 }
 0x12e   : > { %v579_v59 = vrot.slane %v578_v21, 2  ;;  %v681_v62 = vadd.f32 %v680_v60, %v679_v58 }
 0x130   : > { %v580_v63 = vadd.f32 %v579_v59, %v578_v21  ;;  %v682_v0 = vrot.slane %v681_v62, 2 }
 0x132   : > { %v581_v3 = vrot.slane %v580_v63, 1  ;;  %v683_v5 = vadd.f32 %v682_v0, %v681_v62 }
 0x134   : > { %v582_v31 = vadd.f32 %v581_v3, %v580_v63  ;;  %v684_v4 = vrot.slane %v683_v5, 1 }
 0x136   : > { %584 = vst.msk [vmem:[%s214_s29] sm:$0x1] %vm583_vm2, %v582_v31  ;;  %v685_v6 = vadd.f32 %v684_v4, %v683_v5 }
 0x138   : > { %686 = vst.msk [vmem:[%s217_s6] sm:$0x1] %vm583_vm2, %v685_v6 }
 0x139 PF: > { %s15_s15 = sadd.s32 1, %s889_s15  }
 0x13a   : > { %p12_p5 = scmp.ge.s32.totalorder %s15_s15, 4  }
 0x13c   :  { %14 = sbr.rel (!%p12_p5) target bundleno = 1 (0x1), region = 82 }

// kernel: block_forward.6
= control target key start
LH: loop header
LB: loop body
LE: loop exit
PB: predicated region body
PF: predicated region fallthrough
CT: control target
= control target key end

     0   :  { %s1093_s21 = smov 0   ;;  %s1460_s0 = inlined_call_operand.vmem [shape: f32[512,8], index: 0, kind: input, shape index: {}]   ;;  %s1461_s1 = inlined_call_operand.vmem [shape: f32[1,8], index: 1, kind: input, shape index: {}]   ;;  %s1462_s2 = inlined_call_operand.vmem [shape: f32[1,8], index: 2, kind: input, shape index: {}]   ;;  %s1463_s3 = inlined_call_operand.vmem [shape: bf16[8,32], index: 3, kind: input, shape index: {}]   ;;  %s1464_s4 = inlined_call_operand.vmem [shape: f32[512,32], index: 4, kind: output, shape index: {0}]   ;;  %s1465_s5 = inlined_call_operand.vmem [shape: f32[2,1,32], index: 5, kind: output, shape index: {1}]   ;;  %s1466_s6 = inlined_call_operand.vmem [shape: f32[2,1,32], index: 6, kind: output, shape index: {2}]  }
   0x1 LB: > { %s1099_s22 = sadd.s32 4294967295, %s1056_s21   ;;  %p962_p0 = scmp.ge.s32.totalorder %s1056_s21, 1  ;;  %s1056_s21 = sphi %s1093_s21, %s17_s21  }
   0x2   : > { %p218_p1 = scmp.lt.s32.totalorder %s1056_s21, 3 }
   0x4   : > { %p219_p2 = pnand %p962_p0, %p218_p1 }
   0x5   : > { %v431_v0 = vld [vmem:[%s1463_s3] sm:$0xf] (!%p219_p2)  ;;  %vm481_vm0 = vcmask (!%p219_p2), 1043456   ;;  %s963_s25 = sshll.u32 (!%p219_p2), %s1099_s22, 5  ;;  %vm432_vm1 = vcmask (!%p219_p2), 64512   ;;  %vm646_vm2 = vcmask (!%p219_p2), 261120  }
   0x6   : > { %222 = sbr.rel (%p219_p2) target bundleno = 319 (0x13f), region = 36  ;;  %1040 = vmatprep.subr.msk.bf16.mxu0 (!%p219_p2), %vm481_vm0, %v431_v0  ;;  %v483_v1 = vsel (!%p219_p2), %vm481_vm0, %v431_v0, 0  ;;  %p255_p3 = scmp.lt.s32.totalorder (!%p219_p2), %s963_s25, 63  ;;  %1041 = vmatprep.subr.msk.bf16.mxu1 (!%p219_p2), %vm481_vm0, %v431_v0  ;;  %v1113_v2 = vld [vmem:[%s1461_s1] ss:$0 sm:$0xff] (!%p219_p2)  ;;  %vm748_vm3 = vcmask (!%p219_p2), 253952  }
   0x7   : > { %1005 = vmatpush3.bf16.msra.mxu0 (!%p219_p2), %v483_v1  ;;  %1039 = vmatpush3.bf16.msra.mxu1 (!%p219_p2), %v483_v1  ;;  %v1125_v3 = vld [vmem:[%s1462_s2] ss:$0 sm:$0xff] (!%p219_p2)  ;;  %p266_p4 = scmp.lt.s32.totalorder (!%p219_p2), %s1099_s22, 1 }
   0xd   : > { %s1468_s25 = smov (!%p255_p3, %s963_s25), 63  ;;  %s1470_s22 = smov (!%p266_p4, %s1099_s22), 1 }
   0xe   : > { %s964_s26 = sshll.u32 %s1468_s25, 3  ;;  %s268_s15 = scalar_lea.vmem %s1465_s5, %s1470_s22 }
   0xf   : > { %s1120_s7 = scalar_lea.vmem %s1460_s0, %s964_s26  ;;  %s1247_s12 = scalar_lea.vmem %s1464_s4, %s964_s26 }
  0x10   : > { %v273_v4 = vld [vmem:[%s1120_s7] sm:$0xff]  ;;  %v274_v5 = vld [vmem:[%s1120_s7 + $0x8] sm:$0xff]  ;;  %v275_v6 = vld [vmem:[%s1120_s7 + $0x10] sm:$0xff]  ;;  %s271_s18 = scalar_lea.vmem %s1466_s6, %s1470_s22 }
  0x11   : > { %v312_v7 = vmul.f32 %v1113_v2, %v273_v4  ;;  %v313_v8 = vmul.f32 %v1113_v2, %v274_v5  ;;  %v276_v9 = vld [vmem:[%s1120_s7 + $0x18] sm:$0xff]  ;;  %v314_v10 = vmul.f32 %v1113_v2, %v275_v6  ;;  %v277_v11 = vld [vmem:[%s1120_s7 + $0x20] sm:$0xff]  ;;  %v278_v12 = vld [vmem:[%s1120_s7 + $0x28] sm:$0xff] }
  0x12   : > { %v315_v13 = vmul.f32 %v1113_v2, %v276_v9  ;;  %v316_v14 = vmul.f32 %v1113_v2, %v277_v11  ;;  %v317_v15 = vmul.f32 %v1113_v2, %v278_v12  ;;  %v279_v16 = vld [vmem:[%s1120_s7 + $0x30] sm:$0xff]  ;;  %v280_v17 = vld [vmem:[%s1120_s7 + $0x38] sm:$0xff]  ;;  %v281_v26 = vld [vmem:[%s1120_s7 + $0x40] sm:$0xff] }
  0x13   : > { %v351_v18 = vadd.f32 %v1125_v3, %v312_v7  ;;  %v352_v19 = vadd.f32 %v1125_v3, %v313_v8  ;;  %v353_v20 = vadd.f32 %v1125_v3, %v314_v10  ;;  %v318_v21 = vmul.f32 %v1113_v2, %v279_v16  ;;  %v282_v27 = vld [vmem:[%s1120_s7 + $0x48] sm:$0xff]  ;;  %v283_v32 = vld [vmem:[%s1120_s7 + $0x50] sm:$0xff]  ;;  %v284_v37 = vld [vmem:[%s1120_s7 + $0x58] sm:$0xff] }
  0x14   : > { %v354_v22 = vadd.f32 %v1125_v3, %v315_v13  ;;  %v355_v23 = vadd.f32 %v1125_v3, %v316_v14  ;;  %v356_v24 = vadd.f32 %v1125_v3, %v317_v15  ;;  %v319_v25 = vmul.f32 %v1113_v2, %v280_v17  ;;  %v285_v38 = vld [vmem:[%s1120_s7 + $0x60] sm:$0xff]  ;;  %v286_v43 = vld [vmem:[%s1120_s7 + $0x68] sm:$0xff]  ;;  %v287_v44 = vld [vmem:[%s1120_s7 + $0x70] sm:$0xff] }
  0x15   : > { %v383_v28 = vmax.f32 %v351_v18, 0.0  ;;  %v384_v29 = vmax.f32 %v352_v19, 0.0  ;;  %v385_v30 = vmax.f32 %v353_v20, 0.0  ;;  %v357_v31 = vadd.f32 %v1125_v3, %v318_v21  ;;  %v288_v53 = vld [vmem:[%s1120_s7 + $0x78] sm:$0xff]  ;;  %v289_v57 = vld [vmem:[%s1120_s7 + $0x80] sm:$0xff]  ;;  %v290_v62 = vld [vmem:[%s1120_s7 + $0x88] sm:$0xff] }
  0x16   : > { %v386_v33 = vmax.f32 %v354_v22, 0.0  ;;  %v387_v34 = vmax.f32 %v355_v23, 0.0  ;;  %v388_v35 = vmax.f32 %v356_v24, 0.0  ;;  %v358_v36 = vadd.f32 %v1125_v3, %v319_v25  ;;  %v291_v1 = vld [vmem:[%s1120_s7 + $0x90] sm:$0xff]  ;;  %v292_v4 = vld [vmem:[%s1120_s7 + $0x98] sm:$0xff]  ;;  %v293_v8 = vld [vmem:[%s1120_s7 + $0xa0] sm:$0xff] }
  0x17   : > { %v415_v39 = vpack.c.bf16 %v384_v29, %v383_v28  ;;  %v389_v40 = vmax.f32 %v357_v31, 0.0  ;;  %v320_v41 = vmul.f32 %v1113_v2, %v281_v26  ;;  %v321_v42 = vmul.f32 %v1113_v2, %v282_v27  ;;  %v294_v13 = vld [vmem:[%s1120_s7 + $0xa8] sm:$0xff]  ;;  %v295_v18 = vld [vmem:[%s1120_s7 + $0xb0] sm:$0xff]  ;;  %v296_v23 = vld [vmem:[%s1120_s7 + $0xb8] sm:$0xff] }
  0x18   : > { %v416_v45 = vpack.c.bf16 %v386_v33, %v385_v30  ;;  %v417_v46 = vpack.c.bf16 %v388_v35, %v387_v34  ;;  %v390_v47 = vmax.f32 %v358_v36, 0.0  ;;  %v322_v48 = vmul.f32 %v1113_v2, %v283_v32  ;;  %v297_v28 = vld [vmem:[%s1120_s7 + $0xc0] sm:$0xff]  ;;  %v298_v33 = vld [vmem:[%s1120_s7 + $0xc8] sm:$0xff] }
  0x19   : > { %1006 = vmatprep.mubr.msk.bf16.mxu0 %vm432_vm1, %v415_v39  ;;  %v359_v49 = vadd.f32 %v1125_v3, %v320_v41  ;;  %v360_v50 = vadd.f32 %v1125_v3, %v321_v42  ;;  %v323_v51 = vmul.f32 %v1113_v2, %v284_v37  ;;  %v324_v52 = vmul.f32 %v1113_v2, %v285_v38  ;;  %v299_v38 = vld [vmem:[%s1120_s7 + $0xd0] sm:$0xff] }
  0x1a   : > { %1007 = vmatmul.mubr.msk.bf16.vlgmr.msra.gmra.mrb[0].mxu0 %vm432_vm1, %v416_v45  ;;  %v361_v54 = vadd.f32 %v1125_v3, %v322_v48  ;;  %v325_v55 = vmul.f32 %v1113_v2, %v286_v43  ;;  %v326_v56 = vmul.f32 %v1113_v2, %v287_v44  ;;  %v327_v0 = vmul.f32 %v1113_v2, %v288_v53  ;;  %v300_v43 = vld [vmem:[%s1120_s7 + $0xd8] sm:$0xff]  ;;  %v301_v48 = vld [vmem:[%s1120_s7 + $0xe0] sm:$0xff] }
  0x1b   : > { %1010 = vmatprep.mubr.msk.bf16.mxu0 %vm432_vm1, %v417_v46  ;;  %v391_v58 = vmax.f32 %v359_v49, 0.0  ;;  %v392_v59 = vmax.f32 %v360_v50, 0.0  ;;  %v362_v60 = vadd.f32 %v1125_v3, %v323_v51  ;;  %v363_v61 = vadd.f32 %v1125_v3, %v324_v52  ;;  %v302_v49 = vld [vmem:[%s1120_s7 + $0xe8] sm:$0xff] }
  0x1c   : > { %v364_v63 = vadd.f32 %v1125_v3, %v325_v55  ;;  %v418_v5 = vpack.c.bf16 %v390_v47, %v389_v40  ;;  %v393_v6 = vmax.f32 %v361_v54, 0.0  ;;  %v328_v7 = vmul.f32 %v1113_v2, %v289_v57 }
  0x1d   : > { %v419_v9 = vpack.c.bf16 %v392_v59, %v391_v58  ;;  %v394_v10 = vmax.f32 %v362_v60, 0.0  ;;  %v1183_v11 = vadd.f32 %v1125_v3, %v326_v56  ;;  %v329_v12 = vmul.f32 %v1113_v2, %v290_v62 }
  0x1e   : > { %v395_v14 = vmax.f32 %v363_v61, 0.0  ;;  %v367_v15 = vadd.f32 %v1125_v3, %v328_v7  ;;  %v330_v16 = vmul.f32 %v1113_v2, %v291_v1  ;;  %v331_v17 = vmul.f32 %v1113_v2, %v292_v4 }
  0x1f   : > { %v396_v19 = vmax.f32 %v364_v63, 0.0  ;;  %v366_v20 = vadd.f32 %v1125_v3, %v327_v0  ;;  %v368_v21 = vadd.f32 %v1125_v3, %v329_v12  ;;  %v332_v22 = vmul.f32 %v1113_v2, %v293_v8  ;;  %v303_v8 = vld [vmem:[%s1120_s7 + $0xf0] sm:$0xff] }
  0x20   : > { %v399_v24 = vmax.f32 %v367_v15, 0.0  ;;  %v369_v25 = vadd.f32 %v1125_v3, %v330_v16  ;;  %v370_v26 = vadd.f32 %v1125_v3, %v331_v17  ;;  %v333_v27 = vmul.f32 %v1113_v2, %v294_v13 }
  0x21   : > { %v420_v29 = vpack.c.bf16 %v394_v10, %v393_v6  ;;  %v400_v30 = vmax.f32 %v368_v21, 0.0  ;;  %v371_v31 = vadd.f32 %v1125_v3, %v332_v22  ;;  %v334_v32 = vmul.f32 %v1113_v2, %v295_v18 }
  0x22   : > { %1011 = vmatmul.mubr.msk.bf16.gmra.mrb[4].mxu0 %vm432_vm1, %v418_v5  ;;  %v401_v34 = vmax.f32 %v369_v25, 0.0  ;;  %v402_v35 = vmax.f32 %v370_v26, 0.0  ;;  %v372_v36 = vadd.f32 %v1125_v3, %v333_v27  ;;  %v335_v37 = vmul.f32 %v1113_v2, %v296_v23 }
  0x23   : > { %1014 = vmatprep.mubr.msk.bf16.mxu0 %vm432_vm1, %v419_v9  ;;  %v423_v39 = vpack.c.bf16 %v400_v30, %v399_v24  ;;  %v403_v40 = vmax.f32 %v371_v31, 0.0  ;;  %v373_v41 = vadd.f32 %v1125_v3, %v334_v32  ;;  %v336_v42 = vmul.f32 %v1113_v2, %v297_v28  ;;  %v304_v9 = vld [vmem:[%s1120_s7 + $0xf8] sm:$0xff] }
  0x24   : > { %v424_v44 = vpack.c.bf16 %v402_v35, %v401_v34  ;;  %v404_v45 = vmax.f32 %v372_v36, 0.0  ;;  %v374_v46 = vadd.f32 %v1125_v3, %v335_v37  ;;  %v337_v47 = vmul.f32 %v1113_v2, %v298_v33 }
  0x25   : > { %v421_v50 = vpack.c.bf16 %v396_v19, %v395_v14  ;;  %1022 = vmatprep.mubr.msk.bf16.mxu1 %vm432_vm1, %v423_v39  ;;  %v405_v51 = vmax.f32 %v373_v41, 0.0  ;;  %v375_v52 = vadd.f32 %v1125_v3, %v336_v42  ;;  %v338_v53 = vmul.f32 %v1113_v2, %v299_v38 }
  0x26   : > { %1023 = vmatmul.mubr.msk.bf16.vlgmr.msra.gmra.mrb[0].mxu1 %vm432_vm1, %v424_v44  ;;  %v425_v54 = vpack.c.bf16 %v404_v45, %v403_v40  ;;  %v406_v55 = vmax.f32 %v374_v46, 0.0  ;;  %v376_v56 = vadd.f32 %v1125_v3, %v337_v47  ;;  %v339_v57 = vmul.f32 %v1113_v2, %v300_v43 }
  0x27   : > { %v407_v58 = vmax.f32 %v375_v52, 0.0  ;;  %v340_v59 = vmul.f32 %v1113_v2, %v301_v48  ;;  %v341_v60 = vmul.f32 %v1113_v2, %v302_v49  ;;  %v397_v62 = vmax.f32 %v1183_v11, 0.0 }
  0x28   : > { %1026 = vmatprep.mubr.msk.bf16.mxu1 %vm432_vm1, %v425_v54  ;;  %v408_v61 = vmax.f32 %v376_v56, 0.0  ;;  %v398_v63 = vmax.f32 %v366_v20, 0.0  ;;  %v426_v0 = vpack.c.bf16 %v406_v55, %v405_v51  ;;  %v377_v1 = vadd.f32 %v1125_v3, %v338_v53 }
  0x29   : > { %v378_v4 = vadd.f32 %v1125_v3, %v339_v57  ;;  %v379_v6 = vadd.f32 %v1125_v3, %v340_v59  ;;  %v380_v7 = vadd.f32 %v1125_v3, %v341_v60  ;;  %v342_v13 = vmul.f32 %v1113_v2, %v303_v8 }
  0x2a   : > { %1015 = vmatmul.mubr.msk.bf16.gmra.mrb[8].mxu0 %vm432_vm1, %v420_v29  ;;  %v427_v5 = vpack.c.bf16 %v408_v61, %v407_v58  ;;  %v422_v10 = vpack.c.bf16 %v398_v63, %v397_v62  ;;  %v409_v12 = vmax.f32 %v377_v1, 0.0  ;;  %v343_v14 = vmul.f32 %v1113_v2, %v304_v9 }
  0x2b   : > { %1018 = vmatprep.mubr.msk.bf16.mxu0 %vm432_vm1, %v421_v50  ;;  %v410_v11 = vmax.f32 %v378_v4, 0.0  ;;  %v411_v15 = vmax.f32 %v379_v6, 0.0  ;;  %v412_v16 = vmax.f32 %v380_v7, 0.0  ;;  %v381_v18 = vadd.f32 %v1125_v3, %v342_v13 }
  0x2c   : > { %v382_v19 = vadd.f32 %v1125_v3, %v343_v14 }
  0x2d   : > { %v428_v17 = vpack.c.bf16 %v410_v11, %v409_v12  ;;  %v429_v20 = vpack.c.bf16 %v412_v16, %v411_v15  ;;  %v413_v21 = vmax.f32 %v381_v18, 0.0 }
  0x2e   : > { %1027 = vmatmul.mubr.msk.bf16.gmra.mrb[4].mxu1 %vm432_vm1, %v426_v0  ;;  %v414_v22 = vmax.f32 %v382_v19, 0.0 }
  0x2f   : > { %1030 = vmatprep.mubr.msk.bf16.mxu1 %vm432_vm1, %v427_v5 }
  0x30   : > { %v430_v23 = vpack.c.bf16 %v414_v22, %v413_v21 }
  0x32   : > { %1019 = vmatmul.mubr.msk.bf16.gmra.mrb[12].mxu0 %vm432_vm1, %v422_v10 }
  0x36   : > { %1031 = vmatmul.mubr.msk.bf16.gmra.mrb[8].mxu1 %vm432_vm1, %v428_v17 }
  0x37   : > { %1034 = vmatprep.mubr.msk.bf16.mxu1 %vm432_vm1, %v429_v20 }
  0x3e   : > { %1035 = vmatmul.mubr.msk.bf16.gmra.mrb[12].mxu1 %vm432_vm1, %v430_v23 }
  0xed   : > { %v1008_v2 = vpop.f32.mrb[0].mxu0 }
  0xee   : > { %649 = vst.msk [vmem:[%s1247_s12 + $0x10] sm:$0xff] %vm646_vm2, %v1008_v2  ;;  %v519_v3 = vpop.f32.mrb[1].mxu0  ;;  %v752_v27 = vmul.f32 %v1008_v2, %v1008_v2  ;;  %v682_v32 = vsel %vm646_vm2, %v1008_v2, 0.0 }
  0xef   : > { %647 = vst.msk [vmem:[%s1247_s12] sm:$0xff] %vm646_vm2, %v519_v3  ;;  %v750_v24 = vmul.f32 %v519_v3, %v519_v3  ;;  %v1009_v25 = vpop.f32.mrb[2].mxu0  ;;  %v679_v28 = vsel %vm646_vm2, %v519_v3, 0.0 }
  0xf0   : > { %650 = vst.msk [vmem:[%s1247_s12 + $0x18] sm:$0xff] %vm646_vm2, %v1009_v25  ;;  %v522_v26 = vpop.f32.mrb[3].mxu0  ;;  %v753_v34 = vmul.f32 %v1009_v25, %v1009_v25  ;;  %v785_v38 = vsel %vm646_vm2, %v752_v27, 0.0  ;;  %v684_v39 = vsel %vm646_vm2, %v1009_v25, 0.0 }
  0xf1   : > { %648 = vst.msk [vmem:[%s1247_s12 + $0x8] sm:$0xff] %vm646_vm2, %v522_v26  ;;  %v680_v29 = vsel %vm646_vm2, %v522_v26, 0.0  ;;  %v751_v30 = vmul.f32 %v522_v26, %v522_v26  ;;  %v782_v33 = vsel %vm646_vm2, %v750_v24, 0.0 }
  0xf2   : > { %v681_v31 = vadd.f32 %v680_v29, %v679_v28  ;;  %v787_v44 = vsel %vm646_vm2, %v753_v34, 0.0 }
  0xf3   : > { %v783_v35 = vsel %vm646_vm2, %v751_v30, 0.0 }
  0xf4   : > { %v683_v36 = vadd.f32 %v682_v32, %v681_v31  ;;  %v784_v37 = vadd.f32 %v783_v35, %v782_v33 }
  0xf5   : > { %v1012_v40 = vpop.f32.mrb[4].mxu0 }
  0xf6   : > { %v786_v41 = vadd.f32 %v785_v38, %v784_v37  ;;  %653 = vst.msk [vmem:[%s1247_s12 + $0x30] sm:$0xff] %vm646_vm2, %v1012_v40  ;;  %v535_v42 = vpop.f32.mrb[5].mxu0  ;;  %v685_v43 = vadd.f32 %v684_v39, %v683_v36  ;;  %v756_v51 = vmul.f32 %v1012_v40, %v1012_v40  ;;  %v690_v58 = vsel %vm646_vm2, %v1012_v40, 0.0 }
  0xf7   : > { %651 = vst.msk [vmem:[%s1247_s12 + $0x20] sm:$0xff] %vm646_vm2, %v535_v42  ;;  %v686_v45 = vsel %vm646_vm2, %v535_v42, 0.0  ;;  %v754_v46 = vmul.f32 %v535_v42, %v535_v42  ;;  %v1013_v47 = vpop.f32.mrb[6].mxu0 }
  0xf8   : > { %v687_v48 = vadd.f32 %v686_v45, %v685_v43  ;;  %v788_v49 = vadd.f32 %v787_v44, %v786_v41  ;;  %654 = vst.msk [vmem:[%s1247_s12 + $0x38] sm:$0xff] %vm646_vm2, %v1013_v47  ;;  %v538_v50 = vpop.f32.mrb[7].mxu0  ;;  %v757_v59 = vmul.f32 %v1013_v47, %v1013_v47  ;;  %v793_v1 = vsel %vm646_vm2, %v756_v51, 0.0 }
  0xf9   : > { %v789_v52 = vsel %vm646_vm2, %v754_v46, 0.0  ;;  %652 = vst.msk [vmem:[%s1247_s12 + $0x28] sm:$0xff] %vm646_vm2, %v538_v50  ;;  %v688_v53 = vsel %vm646_vm2, %v538_v50, 0.0  ;;  %v755_v54 = vmul.f32 %v538_v50, %v538_v50  ;;  %v1276_v57 = vpop.f32.mrb[0].mxu1  ;;  %v692_v4 = vsel %vm646_vm2, %v1013_v47, 0.0 }
  0xfa   : > { %v790_v55 = vadd.f32 %v789_v52, %v788_v49  ;;  %v689_v56 = vadd.f32 %v688_v53, %v687_v48  ;;  %665 = vst.msk [vmem:[%s1247_s12 + $0x90] sm:$0xff] %vm646_vm2, %v1276_v57  ;;  %v1283_v61 = vpop.f32.mrb[1].mxu1  ;;  %v795_v10 = vsel %vm646_vm2, %v757_v59, 0.0 }
  0xfb   : > { %v791_v60 = vsel %vm646_vm2, %v755_v54, 0.0  ;;  %663 = vst.msk [vmem:[%s1247_s12 + $0x80] sm:$0xff] %vm646_vm2, %v1283_v61  ;;  %v1288_v0 = vpop.f32.mrb[2].mxu1  ;;  %v766_v53 = vmul.f32 %v1283_v61, %v1283_v61 }
  0xfc   : > { %v691_v62 = vadd.f32 %v690_v58, %v689_v56  ;;  %v792_v63 = vadd.f32 %v791_v60, %v790_v55  ;;  %666 = vst.msk [vmem:[%s1247_s12 + $0x98] sm:$0xff] %vm646_vm2, %v1288_v0  ;;  %v1295_v6 = vpop.f32.mrb[3].mxu1 }
  0xfd   : > { %v1016_v5 = vpop.f32.mrb[8].mxu0  ;;  %664 = vst.msk [vmem:[%s1247_s12 + $0x88] sm:$0xff] %vm646_vm2, %v1295_v6 }
  0xfe   : > { %v794_v7 = vadd.f32 %v793_v1, %v792_v63  ;;  %657 = vst.msk [vmem:[%s1247_s12 + $0x50] sm:$0xff] %vm646_vm2, %v1016_v5  ;;  %v551_v8 = vpop.f32.mrb[9].mxu0  ;;  %v693_v9 = vadd.f32 %v692_v4, %v691_v62  ;;  %v760_v17 = vmul.f32 %v1016_v5, %v1016_v5  ;;  %v698_v2 = vsel %vm646_vm2, %v1016_v5, 0.0 }
  0xff   : > { %655 = vst.msk [vmem:[%s1247_s12 + $0x40] sm:$0xff] %vm646_vm2, %v551_v8  ;;  %v694_v12 = vsel %vm646_vm2, %v551_v8, 0.0  ;;  %v758_v11 = vmul.f32 %v551_v8, %v551_v8  ;;  %v1017_v13 = vpop.f32.mrb[10].mxu0  ;;  %v710_v62 = vsel %vm646_vm2, %v1283_v61, 0.0  ;;  %v767_v8 = vmul.f32 %v1295_v6, %v1295_v6 }
 0x100   : > { %v695_v14 = vadd.f32 %v694_v12, %v693_v9  ;;  %v796_v15 = vadd.f32 %v795_v10, %v794_v7  ;;  %658 = vst.msk [vmem:[%s1247_s12 + $0x58] sm:$0xff] %vm646_vm2, %v1017_v13  ;;  %v554_v16 = vpop.f32.mrb[11].mxu0  ;;  %v761_v3 = vmul.f32 %v1017_v13, %v1017_v13  ;;  %v801_v29 = vsel %vm646_vm2, %v760_v17, 0.0 }
 0x101   : > { %v797_v18 = vsel %vm646_vm2, %v758_v11, 0.0  ;;  %656 = vst.msk [vmem:[%s1247_s12 + $0x48] sm:$0xff] %vm646_vm2, %v554_v16  ;;  %v696_v19 = vsel %vm646_vm2, %v554_v16, 0.0  ;;  %v759_v20 = vmul.f32 %v554_v16, %v554_v16  ;;  %v1312_v23 = vpop.f32.mrb[4].mxu1  ;;  %v700_v30 = vsel %vm646_vm2, %v1017_v13, 0.0 }
 0x102   : > { %v798_v21 = vadd.f32 %v797_v18, %v796_v15  ;;  %v697_v22 = vadd.f32 %v696_v19, %v695_v14  ;;  %669 = vst.msk [vmem:[%s1247_s12 + $0xb0] sm:$0xff] %vm646_vm2, %v1312_v23  ;;  %v1319_v25 = vpop.f32.mrb[5].mxu1  ;;  %v803_v36 = vsel %vm646_vm2, %v761_v3, 0.0  ;;  %v813_v7 = vsel %vm646_vm2, %v766_v53, 0.0 }
 0x103   : > { %v799_v24 = vsel %vm646_vm2, %v759_v20, 0.0  ;;  %667 = vst.msk [vmem:[%s1247_s12 + $0xa0] sm:$0xff] %vm646_vm2, %v1319_v25  ;;  %v1324_v28 = vpop.f32.mrb[6].mxu1  ;;  %v768_v61 = vmul.f32 %v1276_v57, %v1276_v57  ;;  %v712_v12 = vsel %vm646_vm2, %v1295_v6, 0.0  ;;  %v714_v15 = vsel %vm646_vm2, %v1276_v57, 0.0 }
 0x104   : > { %v699_v26 = vadd.f32 %v698_v2, %v697_v22  ;;  %v800_v27 = vadd.f32 %v799_v24, %v798_v21  ;;  %670 = vst.msk [vmem:[%s1247_s12 + $0xb8] sm:$0xff] %vm646_vm2, %v1324_v28  ;;  %v1331_v32 = vpop.f32.mrb[7].mxu1  ;;  %v769_v16 = vmul.f32 %v1288_v0, %v1288_v0  ;;  %v815_v17 = vsel %vm646_vm2, %v767_v8, 0.0 }
 0x105   : > { %v1020_v31 = vpop.f32.mrb[12].mxu0  ;;  %668 = vst.msk [vmem:[%s1247_s12 + $0xa8] sm:$0xff] %vm646_vm2, %v1331_v32  ;;  %v770_v18 = vmul.f32 %v1319_v25, %v1319_v25  ;;  %v817_v57 = vsel %vm646_vm2, %v768_v61, 0.0  ;;  %v716_v22 = vsel %vm646_vm2, %v1288_v0, 0.0  ;;  %v718_v2 = vsel %vm646_vm2, %v1319_v25, 0.0 }
 0x106   : > { %v802_v33 = vadd.f32 %v801_v29, %v800_v27  ;;  %661 = vst.msk [vmem:[%s1247_s12 + $0x70] sm:$0xff] %vm646_vm2, %v1020_v31  ;;  %v567_v34 = vpop.f32.mrb[13].mxu0  ;;  %v701_v35 = vadd.f32 %v700_v30, %v699_v26  ;;  %v764_v43 = vmul.f32 %v1020_v31, %v1020_v31  ;;  %v706_v50 = vsel %vm646_vm2, %v1020_v31, 0.0 }
 0x107   : > { %659 = vst.msk [vmem:[%s1247_s12 + $0x60] sm:$0xff] %vm646_vm2, %v567_v34  ;;  %v702_v37 = vsel %vm646_vm2, %v567_v34, 0.0  ;;  %v762_v38 = vmul.f32 %v567_v34, %v567_v34  ;;  %v1021_v39 = vpop.f32.mrb[14].mxu0  ;;  %v819_v29 = vsel %vm646_vm2, %v769_v16, 0.0  ;;  %v821_v30 = vsel %vm646_vm2, %v770_v18, 0.0 }
 0x108   : > { %v703_v40 = vadd.f32 %v702_v37, %v701_v35  ;;  %v804_v41 = vadd.f32 %v803_v36, %v802_v33  ;;  %662 = vst.msk [vmem:[%s1247_s12 + $0x78] sm:$0xff] %vm646_vm2, %v1021_v39  ;;  %v570_v42 = vpop.f32.mrb[15].mxu0  ;;  %v765_v51 = vmul.f32 %v1021_v39, %v1021_v39  ;;  %v809_v59 = vsel %vm646_vm2, %v764_v43, 0.0 }
 0x109   : > { %v805_v44 = vsel %vm646_vm2, %v762_v38, 0.0  ;;  %660 = vst.msk [vmem:[%s1247_s12 + $0x68] sm:$0xff] %vm646_vm2, %v570_v42  ;;  %v704_v45 = vsel %vm646_vm2, %v570_v42, 0.0  ;;  %v763_v46 = vmul.f32 %v570_v42, %v570_v42  ;;  %v1348_v49 = vpop.f32.mrb[8].mxu1  ;;  %v708_v60 = vsel %vm646_vm2, %v1021_v39, 0.0 }
 0x10a   : > { %v806_v47 = vadd.f32 %v805_v44, %v804_v41  ;;  %v705_v48 = vadd.f32 %v704_v45, %v703_v40  ;;  %673 = vst.msk [vmem:[%s1247_s12 + $0xd0] sm:$0xff] %vm646_vm2, %v1348_v49  ;;  %v615_v54 = vpop.f32.mrb[9].mxu1  ;;  %v811_v5 = vsel %vm646_vm2, %v765_v51, 0.0  ;;  %v771_v0 = vmul.f32 %v1331_v32, %v1331_v32 }
 0x10b   : > { %v807_v52 = vsel %vm646_vm2, %v763_v46, 0.0  ;;  %671 = vst.msk [vmem:[%s1247_s12 + $0xc0] sm:$0xff] %vm646_vm2, %v615_v54  ;;  %v1359_v58 = vpop.f32.mrb[10].mxu1  ;;  %v772_v34 = vmul.f32 %v1312_v23, %v1312_v23  ;;  %v720_v35 = vsel %vm646_vm2, %v1331_v32, 0.0  ;;  %v722_v38 = vsel %vm646_vm2, %v1312_v23, 0.0 }
 0x10c   : > { %v707_v55 = vadd.f32 %v706_v50, %v705_v48  ;;  %v808_v56 = vadd.f32 %v807_v52, %v806_v47  ;;  %674 = vst.msk [vmem:[%s1247_s12 + $0xd8] sm:$0xff] %vm646_vm2, %v1359_v58  ;;  %v618_v63 = vpop.f32.mrb[11].mxu1  ;;  %v773_v39 = vmul.f32 %v1324_v28, %v1324_v28  ;;  %v823_v40 = vsel %vm646_vm2, %v771_v0, 0.0 }
 0x10d   : > { %672 = vst.msk [vmem:[%s1247_s12 + $0xc8] sm:$0xff] %vm646_vm2, %v618_v63  ;;  %v774_v41 = vmul.f32 %v615_v54, %v615_v54  ;;  %v825_v44 = vsel %vm646_vm2, %v772_v34, 0.0  ;;  %v724_v45 = vsel %vm646_vm2, %v1324_v28, 0.0  ;;  %v726_v32 = vsel %vm646_vm2, %v615_v54, 0.0 }
 0x10e   : > { %v810_v1 = vadd.f32 %v809_v59, %v808_v56  ;;  %v709_v4 = vadd.f32 %v708_v60, %v707_v55  ;;  %v827_v48 = vsel %vm646_vm2, %v773_v39, 0.0  ;;  %v775_v50 = vmul.f32 %v618_v63, %v618_v63 }
 0x10f   : > { %v829_v23 = vsel %vm646_vm2, %v774_v41, 0.0  ;;  %v776_v53 = vmul.f32 %v1348_v49, %v1348_v49  ;;  %v728_v55 = vsel %vm646_vm2, %v618_v63, 0.0  ;;  %v730_v28 = vsel %vm646_vm2, %v1348_v49, 0.0 }
 0x110   : > { %v711_v9 = vadd.f32 %v710_v62, %v709_v4  ;;  %v812_v10 = vadd.f32 %v811_v5, %v810_v1  ;;  %v777_v54 = vmul.f32 %v1359_v58, %v1359_v58  ;;  %v831_v60 = vsel %vm646_vm2, %v775_v50, 0.0 }
 0x111   : > { %v1378_v14 = vpop.f32.mrb[12].mxu1  ;;  %v833_v5 = vsel %vm646_vm2, %v776_v53, 0.0 }
 0x112   : > { %v814_v11 = vadd.f32 %v813_v7, %v812_v10  ;;  %v713_v13 = vadd.f32 %v712_v12, %v711_v9  ;;  %677 = vst.msk [vmem:[%s1247_s12 + $0xf0] sm:$0xff] %vm646_vm2, %v1378_v14  ;;  %v631_v6 = vpop.f32.mrb[13].mxu1  ;;  %v732_v7 = vsel %vm646_vm2, %v1359_v58, 0.0  ;;  %v835_v10 = vsel %vm646_vm2, %v777_v54, 0.0 }
 0x113   : > { %675 = vst.msk [vmem:[%s1247_s12 + $0xe0] sm:$0xff] %vm646_vm2, %v631_v6  ;;  %v1392_v21 = vpop.f32.mrb[14].mxu1  ;;  %v778_v62 = vmul.f32 %v631_v6, %v631_v6  ;;  %v734_v63 = vsel %vm646_vm2, %v631_v6, 0.0  ;;  %v738_v58 = vsel %vm646_vm2, %v1378_v14, 0.0 }
 0x114   : > { %v715_v19 = vadd.f32 %v714_v15, %v713_v13  ;;  %v816_v20 = vadd.f32 %v815_v17, %v814_v11  ;;  %678 = vst.msk [vmem:[%s1247_s12 + $0xf8] sm:$0xff] %vm646_vm2, %v1392_v21  ;;  %v781_v3 = vmul.f32 %v1392_v21, %v1392_v21  ;;  %v634_v24 = vpop.f32.mrb[15].mxu1  ;;  %v780_v13 = vmul.f32 %v1378_v14, %v1378_v14 }
 0x115   : > { %676 = vst.msk [vmem:[%s1247_s12 + $0xe8] sm:$0xff] %vm646_vm2, %v634_v24  ;;  %v837_v49 = vsel %vm646_vm2, %v778_v62, 0.0  ;;  %v779_v61 = vmul.f32 %v634_v24, %v634_v24  ;;  %v736_v15 = vsel %vm646_vm2, %v634_v24, 0.0 }
 0x116   : > { %v818_v26 = vadd.f32 %v817_v57, %v816_v20  ;;  %v717_v27 = vadd.f32 %v716_v22, %v715_v19  ;;  %v843_v25 = vsel %vm646_vm2, %v781_v3, 0.0  ;;  %v841_v20 = vsel %vm646_vm2, %v780_v13, 0.0 }
 0x117   : > { %v839_v18 = vsel %vm646_vm2, %v779_v61, 0.0  ;;  %v740_v57 = vsel %vm646_vm2, %v1392_v21, 0.0 }
 0x118   : > { %v719_v31 = vadd.f32 %v718_v2, %v717_v27  ;;  %v820_v33 = vadd.f32 %v819_v29, %v818_v26 }
 0x11a   : > { %v822_v36 = vadd.f32 %v821_v30, %v820_v33  ;;  %v721_v37 = vadd.f32 %v720_v35, %v719_v31 }
 0x11c   : > { %v723_v42 = vadd.f32 %v722_v38, %v721_v37  ;;  %v824_v43 = vadd.f32 %v823_v40, %v822_v36 }
 0x11e   : > { %v826_v46 = vadd.f32 %v825_v44, %v824_v43  ;;  %v725_v47 = vadd.f32 %v724_v45, %v723_v42 }
 0x120   : > { %v727_v51 = vadd.f32 %v726_v32, %v725_v47  ;;  %v828_v52 = vadd.f32 %v827_v48, %v826_v46 }
 0x122   : > { %v830_v56 = vadd.f32 %v829_v23, %v828_v52  ;;  %v729_v59 = vadd.f32 %v728_v55, %v727_v51 }
 0x124   : > { %v731_v1 = vadd.f32 %v730_v28, %v729_v59  ;;  %v832_v4 = vadd.f32 %v831_v60, %v830_v56 }
 0x126   : > { %v834_v8 = vadd.f32 %v833_v5, %v832_v4  ;;  %v733_v9 = vadd.f32 %v732_v7, %v731_v1 }
 0x128   : > { %v735_v12 = vadd.f32 %v734_v63, %v733_v9  ;;  %v836_v11 = vadd.f32 %v835_v10, %v834_v8 }
 0x12a   : > { %v838_v16 = vadd.f32 %v837_v49, %v836_v11  ;;  %v737_v17 = vadd.f32 %v736_v15, %v735_v12 }
 0x12c   : > { %v739_v6 = vadd.f32 %v738_v58, %v737_v17  ;;  %v840_v19 = vadd.f32 %v839_v18, %v838_v16 }
 0x12e   : > { %v741_v22 = vadd.f32 %v740_v57, %v739_v6  ;;  %v842_v2 = vadd.f32 %v841_v20, %v840_v19 }
 0x130   : > { %v742_v3 = vrot.slane %v741_v22, 4  ;;  %v844_v26 = vadd.f32 %v843_v25, %v842_v2 }
 0x132   : > { %v743_v24 = vadd.f32 %v742_v3, %v741_v22  ;;  %v845_v27 = vrot.slane %v844_v26, 4 }
 0x134   : > { %v744_v29 = vrot.slane %v743_v24, 2  ;;  %v846_v30 = vadd.f32 %v845_v27, %v844_v26 }
 0x136   : > { %v745_v14 = vadd.f32 %v744_v29, %v743_v24  ;;  %v847_v0 = vrot.slane %v846_v30, 2 }
 0x138   : > { %v746_v31 = vrot.slane %v745_v14, 1  ;;  %v848_v33 = vadd.f32 %v847_v0, %v846_v30 }
 0x13a   : > { %v747_v21 = vadd.f32 %v746_v31, %v745_v14  ;;  %v849_v34 = vrot.slane %v848_v33, 1 }
 0x13c   : > { %749 = vst.msk [vmem:[%s268_s15] sm:$0x1] %vm748_vm3, %v747_v21  ;;  %v850_v25 = vadd.f32 %v849_v34, %v848_v33 }
 0x13e   : > { %851 = vst.msk [vmem:[%s271_s18] sm:$0x1] %vm748_vm3, %v850_v25 }
 0x13f PF: > { %s17_s21 = sadd.s32 1, %s1056_s21  }
 0x140   : > { %p14_p5 = scmp.ge.s32.totalorder %s17_s21, 4  }
 0x142   :  { %16 = sbr.rel (!%p14_p5) target bundleno = 1 (0x1), region = 90 }

// kernel: block_forward.7
= control target key start
LH: loop header
LB: loop body
LE: loop exit
PB: predicated region body
PF: predicated region fallthrough
CT: control target
= control target key end

     0   :  { %11 = vsyncpa [#allocation3], 0  ;;  %s1502_s0 = inlined_call_operand.vmem [shape: f32[512,32], index: 0, kind: input, shape index: {}]   ;;  %s1503_s1 = inlined_call_operand.vmem [shape: f32[1,32], index: 1, kind: input, shape index: {}]   ;;  %s1504_s2 = inlined_call_operand.vmem [shape: f32[1,32], index: 2, kind: input, shape index: {}]   ;;  %s1505_s3 = inlined_call_operand.vmem [shape: f32[512,8], index: 3, kind: input, shape index: {}]   ;;  %s1506_s4 = inlined_call_operand.vmem [shape: bf16[8,32], index: 4, kind: input, shape index: {}]   ;;  %s1507_s5 = inlined_call_operand.vmem [shape: f32[1,32], index: 5, kind: input, shape index: {}]   ;;  %s1508_s6 = inlined_call_operand.hbm [shape: f32[512,32], index: 6, kind: output, shape index: {}]  }
   0x1   :  { %13 = vsyncpa [#allocation3 + $0x1], 0  ;;  %s1073_s21 = smov 0   ;;  %s1075_s22 = smov 0  }
   0x2   :  { %s1077_s23 = smov 0   ;;  %s1079_s24 = smov 0  }
   0x3 LB: > { %s1094_s25 = sadd.s32 4294967295, %s1033_s24   ;;  %s841_s26 = sadd.s32 4294967294, %s1033_s24   ;;  %s1033_s24 = sphi %s1079_s24, %s1514_s24   ;;  %s1029_s23 = sphi %s1077_s23, %s1513_s23   ;;  %s1025_s22 = sphi %s1075_s22, %s1512_s22   ;;  %s1021_s21 = sphi %s1073_s21, %s1511_s21  }
   0x4   : > { %s1098_s27 = sadd.s32 1, %s1033_s24   ;;  %s162_s28 = sadd.s32 1, %s1029_s23 }
   0x5   : > { %s159_s29 = ssub.s32 %s1033_s24, %s1098_s27  ;;  %p172_p0 = scmp.ne.s32.totalorder %s1029_s23, %s1025_s22 }
   0x6   : > { %p160_p1 = scmp.eq.s32.totalorder %s159_s29, 0  ;;  %p173_p2 = scmp.eq.s32.totalorder %s1094_s25, 1 }
   0x7   : > { %p178_p3 = scmp.ne.s32.totalorder %s1025_s22, %s1021_s21  ;;  %p179_p4 = scmp.eq.s32.totalorder %s841_s26, 1 }
   0x8   : > { %s1109_s30 = scalar_select %p160_p1, %s1029_s23, %s162_s28  }
   0x9   : > { %p1111_p5 = por %p173_p2, %p172_p0  ;;  %p1115_p6 = por %p179_p4, %p178_p3 }
   0xa   : > { %p844_p7 = scmp.ge.s32.totalorder %s1033_s24, 1  ;;  %p227_p8 = scmp.lt.s32.totalorder %s1033_s24, 3 }
   0xc   : > { %p228_p9 = pnand %p844_p7, %p227_p8 }
   0xd   : > { %v324_v0 = vld [vmem:[%s1506_s4] sm:$0xf] (!%p228_p9)  ;;  %vm381_vm0 = vcmask (!%p228_p9), 1043456   ;;  %s846_s11 = sshll.u32 (!%p228_p9), %s1094_s25, 5  ;;  %vm332_vm1 = vcmask (!%p228_p9), 64512   ;;  %s259_s29 = sand.u32 (!%p228_p9), 1, %s1025_s22  }
   0xe   : > { %231 = sbr.rel (%p228_p9) target bundleno = 289 (0x121), region = 44  ;;  %928 = vmatprep.subr.msk.bf16.mxu0 (!%p228_p9), %vm381_vm0, %v324_v0  ;;  %929 = vmatprep.subr.msk.bf16.mxu1 (!%p228_p9), %vm381_vm0, %v324_v0  ;;  %v383_v1 = vsel (!%p228_p9), %vm381_vm0, %v324_v0, 0  ;;  %p263_p10 = scmp.lt.s32.totalorder (!%p228_p9), %s846_s11, 63  ;;  %v1194_v51 = vld [vmem:[%s1503_s1] ss:$0 sm:$0xff] (!%p228_p9)  ;;  %vm720_vm2 = vcmask (!%p228_p9), 261120  }
   0xf   : > { %893 = vmatpush3.bf16.msra.mxu0 (!%p228_p9), %v383_v1  ;;  %927 = vmatpush3.bf16.msra.mxu1 (!%p228_p9), %v383_v1  ;;  %v1201_v54 = vld [vmem:[%s1504_s2] ss:$0 sm:$0xff] (!%p228_p9)  ;;  %s874_s13 = sshll.u32 (!%p228_p9), %s1094_s25, 12  ;;  %s1461_s17 = scalar_lea.sflag (!%p228_p9), [#allocation3], %s259_s29 }
  0x10   : > { %s1445_s16 = scalar_lea.hbm (!%p228_p9), %s1508_s6, %s874_s13  ;;  %s1035_s19 = smov (!%p228_p9), [#allocation2]  }
  0x11   : > { %s975_s20 = sshll.u32 (!%p228_p9), %s1035_s19, 4  ;;  %s976_s20 = int_to_ptr.vmem [resolvable:$false] %s975_s20 }
  0x12   : > { %s977_s26 = scalar_lea.vmem (!%p228_p9), %s976_s20, 8192 }
  0x15   : > { %s1516_s11 = smov (!%p263_p10, %s846_s11), 63 }
  0x16   : > { %s847_s12 = sshll.u32 %s1516_s11, 3  ;;  %s1281_s11 = sshll.u32 %s259_s29, 8 }
  0x17   : > { %s1133_s15 = scalar_lea.vmem %s1505_s3, %s847_s12  ;;  %s1188_s18 = scalar_lea.vmem %s1502_s0, %s847_s12 }
  0x18   : > { %v276_v2 = vld [vmem:[%s1133_s15] sm:$0xff]  ;;  %v277_v3 = vld [vmem:[%s1133_s15 + $0x8] sm:$0xff]  ;;  %v278_v7 = vld [vmem:[%s1133_s15 + $0x10] sm:$0xff]  ;;  %s1301_s12 = scalar_lea.vmem [#allocation2], %s1281_s11 }
  0x19   : > { %v292_v4 = vld [vmem:[%s1133_s15 + $0x80] sm:$0xff]  ;;  %v308_v5 = vpack.c.bf16 %v277_v3, %v276_v2  ;;  %v293_v6 = vld [vmem:[%s1133_s15 + $0x88] sm:$0xff]  ;;  %v279_v8 = vld [vmem:[%s1133_s15 + $0x18] sm:$0xff]  ;;  %s767_s14 = sshll.u32 %s1301_s12, 4  ;;  %s1447_s14 = int_to_ptr.vmem [resolvable:$true] %s767_s14 }
  0x1a   : > { %v316_v9 = vpack.c.bf16 %v293_v6, %v292_v4  ;;  %v309_v10 = vpack.c.bf16 %v279_v8, %v278_v7  ;;  %v294_v11 = vld [vmem:[%s1133_s15 + $0x90] sm:$0xff]  ;;  %v295_v12 = vld [vmem:[%s1133_s15 + $0x98] sm:$0xff]  ;;  %v280_v13 = vld [vmem:[%s1133_s15 + $0x20] sm:$0xff]  ;;  %p978_p0 = scmp.lt.s32.totalorder %s1447_s14, %s976_s20 }
  0x1b   : > { %894 = vmatprep.mubr.msk.bf16.mxu0 %vm332_vm1, %v308_v5  ;;  %v317_v14 = vpack.c.bf16 %v295_v12, %v294_v11  ;;  %v281_v15 = vld [vmem:[%s1133_s15 + $0x28] sm:$0xff]  ;;  %v296_v16 = vld [vmem:[%s1133_s15 + $0xa0] sm:$0xff]  ;;  %v282_v20 = vld [vmem:[%s1133_s15 + $0x30] sm:$0xff] }
  0x1c   : > { %v297_v17 = vld [vmem:[%s1133_s15 + $0xa8] sm:$0xff]  ;;  %910 = vmatprep.mubr.msk.bf16.mxu1 %vm332_vm1, %v316_v9  ;;  %895 = vmatmul.mubr.msk.bf16.vlgmr.msra.gmra.mrb[0].mxu0 %vm332_vm1, %v309_v10  ;;  %v310_v18 = vpack.c.bf16 %v281_v15, %v280_v13  ;;  %v283_v21 = vld [vmem:[%s1133_s15 + $0x38] sm:$0xff]  ;;  %v298_v22 = vld [vmem:[%s1133_s15 + $0xb0] sm:$0xff] }
  0x1d   : > { %v318_v19 = vpack.c.bf16 %v297_v17, %v296_v16  ;;  %911 = vmatmul.mubr.msk.bf16.vlgmr.msra.gmra.mrb[0].mxu1 %vm332_vm1, %v317_v14  ;;  %v299_v23 = vld [vmem:[%s1133_s15 + $0xb8] sm:$0xff]  ;;  %v284_v24 = vld [vmem:[%s1133_s15 + $0x40] sm:$0xff]  ;;  %v285_v25 = vld [vmem:[%s1133_s15 + $0x48] sm:$0xff]  ;;  %v311_v28 = vpack.c.bf16 %v283_v21, %v282_v20 }
  0x1e   : > { %898 = vmatprep.mubr.msk.bf16.mxu0 %vm332_vm1, %v310_v18  ;;  %v300_v26 = vld [vmem:[%s1133_s15 + $0xc0] sm:$0xff]  ;;  %v301_v27 = vld [vmem:[%s1133_s15 + $0xc8] sm:$0xff]  ;;  %v319_v29 = vpack.c.bf16 %v299_v23, %v298_v22  ;;  %v312_v30 = vpack.c.bf16 %v285_v25, %v284_v24  ;;  %v286_v32 = vld [vmem:[%s1133_s15 + $0x50] sm:$0xff] }
  0x1f   : > { %914 = vmatprep.mubr.msk.bf16.mxu1 %vm332_vm1, %v318_v19  ;;  %v320_v31 = vpack.c.bf16 %v301_v27, %v300_v26  ;;  %v287_v33 = vld [vmem:[%s1133_s15 + $0x58] sm:$0xff]  ;;  %v302_v34 = vld [vmem:[%s1133_s15 + $0xd0] sm:$0xff]  ;;  %v288_v36 = vld [vmem:[%s1133_s15 + $0x60] sm:$0xff] }
  0x20   : > { %v303_v35 = vld [vmem:[%s1133_s15 + $0xd8] sm:$0xff]  ;;  %v289_v37 = vld [vmem:[%s1133_s15 + $0x68] sm:$0xff]  ;;  %v304_v38 = vld [vmem:[%s1133_s15 + $0xe0] sm:$0xff]  ;;  %v313_v40 = vpack.c.bf16 %v287_v33, %v286_v32 }
  0x21   : > { %v305_v39 = vld [vmem:[%s1133_s15 + $0xe8] sm:$0xff]  ;;  %v321_v41 = vpack.c.bf16 %v303_v35, %v302_v34  ;;  %v314_v42 = vpack.c.bf16 %v289_v37, %v288_v36  ;;  %v290_v44 = vld [vmem:[%s1133_s15 + $0x70] sm:$0xff]  ;;  %v291_v45 = vld [vmem:[%s1133_s15 + $0x78] sm:$0xff] }
  0x22   : > { %v322_v43 = vpack.c.bf16 %v305_v39, %v304_v38  ;;  %v306_v46 = vld [vmem:[%s1133_s15 + $0xf0] sm:$0xff]  ;;  %v307_v47 = vld [vmem:[%s1133_s15 + $0xf8] sm:$0xff]  ;;  %v315_v48 = vpack.c.bf16 %v291_v45, %v290_v44  ;;  %v546_v55 = vld [vmem:[%s1188_s18] sm:$0xff] }
  0x23   : > { %v323_v49 = vpack.c.bf16 %v307_v47, %v306_v46  ;;  %v548_v50 = vld [vmem:[%s1188_s18 + $0x10] sm:$0xff]  ;;  %v562_v56 = vld [vmem:[%s1188_s18 + $0x80] sm:$0xff]  ;;  %v549_v58 = vld [vmem:[%s1188_s18 + $0x18] sm:$0xff]  ;;  %v585_v0 = vmul.f32 %v1194_v51, %v546_v55 }
  0x24   : > { %899 = vmatmul.mubr.msk.bf16.gmra.mrb[4].mxu0 %vm332_vm1, %v311_v28  ;;  %v564_v52 = vld [vmem:[%s1188_s18 + $0x90] sm:$0xff]  ;;  %v587_v53 = vmul.f32 %v1194_v51, %v548_v50  ;;  %v565_v59 = vld [vmem:[%s1188_s18 + $0x98] sm:$0xff]  ;;  %v547_v60 = vld [vmem:[%s1188_s18 + $0x8] sm:$0xff]  ;;  %v601_v5 = vmul.f32 %v1194_v51, %v562_v56  ;;  %v588_v6 = vmul.f32 %v1194_v51, %v549_v58 }
  0x25   : > { %915 = vmatmul.mubr.msk.bf16.gmra.mrb[4].mxu1 %vm332_vm1, %v319_v29  ;;  %902 = vmatprep.mubr.msk.bf16.mxu0 %vm332_vm1, %v312_v30  ;;  %v603_v57 = vmul.f32 %v1194_v51, %v564_v52  ;;  %v563_v61 = vld [vmem:[%s1188_s18 + $0x88] sm:$0xff]  ;;  %v552_v62 = vld [vmem:[%s1188_s18 + $0x30] sm:$0xff]  ;;  %v550_v1 = vld [vmem:[%s1188_s18 + $0x20] sm:$0xff]  ;;  %v604_v7 = vmul.f32 %v1194_v51, %v565_v59  ;;  %v586_v12 = vmul.f32 %v1194_v51, %v547_v60 }
  0x26   : > { %918 = vmatprep.mubr.msk.bf16.mxu1 %vm332_vm1, %v320_v31  ;;  %v568_v63 = vld [vmem:[%s1188_s18 + $0xb0] sm:$0xff]  ;;  %v566_v2 = vld [vmem:[%s1188_s18 + $0xa0] sm:$0xff]  ;;  %v553_v3 = vld [vmem:[%s1188_s18 + $0x38] sm:$0xff]  ;;  %v626_v4 = vadd.f32 %v1201_v54, %v587_v53  ;;  %v602_v13 = vmul.f32 %v1194_v51, %v563_v61  ;;  %v591_v14 = vmul.f32 %v1194_v51, %v552_v62  ;;  %v589_v17 = vmul.f32 %v1194_v51, %v550_v1 }
  0x27   : > { %v569_v8 = vld [vmem:[%s1188_s18 + $0xb8] sm:$0xff]  ;;  %v551_v9 = vld [vmem:[%s1188_s18 + $0x28] sm:$0xff]  ;;  %v642_v11 = vadd.f32 %v1201_v54, %v603_v57  ;;  %v556_v15 = vld [vmem:[%s1188_s18 + $0x50] sm:$0xff]  ;;  %v607_v16 = vmul.f32 %v1194_v51, %v568_v63  ;;  %v605_v18 = vmul.f32 %v1194_v51, %v566_v2  ;;  %v592_v19 = vmul.f32 %v1194_v51, %v553_v3 }
  0x28   : > { %v567_v10 = vld [vmem:[%s1188_s18 + $0xa8] sm:$0xff]  ;;  %v624_v20 = vadd.f32 %v1201_v54, %v585_v0  ;;  %v608_v21 = vmul.f32 %v1194_v51, %v569_v8  ;;  %v590_v22 = vmul.f32 %v1194_v51, %v551_v9  ;;  %v640_v24 = vadd.f32 %v1201_v54, %v601_v5  ;;  %v572_v28 = vld [vmem:[%s1188_s18 + $0xd0] sm:$0xff]  ;;  %v1245_v29 = vld [vmem:[%s1507_s5] ss:$0 sm:$0xff] }
  0x29   : > { %v606_v23 = vmul.f32 %v1194_v51, %v567_v10  ;;  %v627_v25 = vadd.f32 %v1201_v54, %v588_v6  ;;  %v643_v26 = vadd.f32 %v1201_v54, %v604_v7  ;;  %v595_v27 = vmul.f32 %v1194_v51, %v556_v15  ;;  %v554_v33 = vld [vmem:[%s1188_s18 + $0x40] sm:$0xff]  ;;  %v557_v39 = vld [vmem:[%s1188_s18 + $0x58] sm:$0xff]  ;;  %v555_v46 = vld [vmem:[%s1188_s18 + $0x48] sm:$0xff] }
  0x2a   : > { %v625_v30 = vadd.f32 %v1201_v54, %v586_v12  ;;  %v641_v31 = vadd.f32 %v1201_v54, %v602_v13  ;;  %v1250_v32 = vadd.f32 %v1201_v54, %v591_v14  ;;  %v570_v34 = vld [vmem:[%s1188_s18 + $0xc0] sm:$0xff]  ;;  %v1255_v35 = vadd.f32 %v1201_v54, %v607_v16 }
  0x2b   : > { %v1258_v36 = vadd.f32 %v1201_v54, %v589_v17  ;;  %v1261_v37 = vadd.f32 %v1201_v54, %v605_v18  ;;  %v1264_v38 = vadd.f32 %v1201_v54, %v592_v19  ;;  %v1275_v44 = vadd.f32 %v1201_v54, %v606_v23  ;;  %v571_v17 = vld [vmem:[%s1188_s18 + $0xc8] sm:$0xff] }
  0x2c   : > { %903 = vmatmul.mubr.msk.bf16.gmra.mrb[8].mxu0 %vm332_vm1, %v313_v40  ;;  %v573_v40 = vld [vmem:[%s1188_s18 + $0xd8] sm:$0xff]  ;;  %v611_v45 = vmul.f32 %v1194_v51, %v572_v28  ;;  %v1285_v50 = vadd.f32 %v1201_v54, %v595_v27  ;;  %v593_v52 = vmul.f32 %v1194_v51, %v554_v33  ;;  %v609_v53 = vmul.f32 %v1194_v51, %v570_v34 }
  0x2d   : > { %919 = vmatmul.mubr.msk.bf16.gmra.mrb[8].mxu1 %vm332_vm1, %v321_v41  ;;  %906 = vmatprep.mubr.msk.bf16.mxu0 %vm332_vm1, %v314_v42  ;;  %v1269_v42 = vadd.f32 %v1201_v54, %v608_v21  ;;  %v596_v59 = vmul.f32 %v1194_v51, %v557_v39  ;;  %v612_v60 = vmul.f32 %v1194_v51, %v573_v40 }
  0x2e   : > { %922 = vmatprep.mubr.msk.bf16.mxu1 %vm332_vm1, %v322_v43  ;;  %v1272_v43 = vadd.f32 %v1201_v54, %v590_v22  ;;  %v594_v2 = vmul.f32 %v1194_v51, %v555_v46  ;;  %v610_v34 = vmul.f32 %v1194_v51, %v571_v17 }
  0x2f   : > { %v1325_v33 = vadd.f32 %v1201_v54, %v596_v59  ;;  %v1335_v46 = vadd.f32 %v1201_v54, %v612_v60 }
  0x34   : > { %907 = vmatmul.mubr.msk.bf16.gmra.mrb[12].mxu0 %vm332_vm1, %v315_v48 }
  0x35   : > { %923 = vmatmul.mubr.msk.bf16.gmra.mrb[12].mxu1 %vm332_vm1, %v323_v49 }
  0xef   : > { %v896_v41 = vpop.f32.mrb[0].mxu0 }
  0xf0   : > { %v428_v47 = vadd.f32 %v896_v41, %v1245_v29  ;;  %v912_v48 = vpop.f32.mrb[0].mxu1  ;;  %v419_v49 = vpop.f32.mrb[1].mxu0 }
  0xf1   : > { %v492_v55 = vadd.f32 %v912_v48, %v1245_v29  ;;  %v420_v56 = vadd.f32 %v1245_v29, %v419_v49  ;;  %v483_v57 = vpop.f32.mrb[1].mxu1  ;;  %v897_v58 = vpop.f32.mrb[2].mxu0 }
  0xf2   : > { %v658_v61 = vadd.f32 %v626_v4, %v428_v47  ;;  %v484_v62 = vadd.f32 %v1245_v29, %v483_v57  ;;  %v431_v63 = vadd.f32 %v897_v58, %v1245_v29  ;;  %v913_v0 = vpop.f32.mrb[2].mxu1  ;;  %v422_v1 = vpop.f32.mrb[3].mxu0  ;;  %v1338_v47 = vadd.f32 %v1201_v54, %v594_v2 }
  0xf3   : > { %v674_v3 = vadd.f32 %v642_v11, %v492_v55  ;;  %v656_v5 = vadd.f32 %v624_v20, %v420_v56  ;;  %v495_v6 = vadd.f32 %v913_v0, %v1245_v29  ;;  %v423_v7 = vadd.f32 %v1245_v29, %v422_v1  ;;  %v486_v8 = vpop.f32.mrb[3].mxu1  ;;  %v558_v1 = vld [vmem:[%s1188_s18 + $0x60] sm:$0xff] }
  0xf4   : > { %v690_v9 = vmax.f32 %v658_v61, 0.0  ;;  %v672_v10 = vadd.f32 %v640_v24, %v484_v62  ;;  %v659_v4 = vadd.f32 %v627_v25, %v431_v63  ;;  %v487_v12 = vadd.f32 %v1245_v29, %v486_v8 }
  0xf5   : > { %v706_v13 = vmax.f32 %v674_v3, 0.0  ;;  %v688_v14 = vmax.f32 %v656_v5, 0.0  ;;  %v675_v15 = vadd.f32 %v643_v26, %v495_v6  ;;  %v657_v16 = vadd.f32 %v625_v30, %v423_v7  ;;  %v560_v26 = vld [vmem:[%s1188_s18 + $0x70] sm:$0xff]  ;;  %v574_v6 = vld [vmem:[%s1188_s18 + $0xe0] sm:$0xff] }
  0xf6   : > { %723 = vst.msk [vmem:[%s1301_s12 + $0x10] sm:$0xff] %vm720_vm2, %v690_v9  ;;  %v704_v11 = vmax.f32 %v672_v10, 0.0  ;;  %v691_v18 = vmax.f32 %v659_v4, 0.0  ;;  %v673_v19 = vadd.f32 %v641_v31, %v487_v12  ;;  %v1306_v20 = vadd.f32 %v1201_v54, %v611_v45  ;;  %v561_v9 = vld [vmem:[%s1188_s18 + $0x78] sm:$0xff] }
  0xf7   : > { %739 = vst.msk [vmem:[%s1301_s12 + $0x90] sm:$0xff] %vm720_vm2, %v706_v13  ;;  %721 = vst.msk [vmem:[%s1301_s12] sm:$0xff] %vm720_vm2, %v688_v14  ;;  %v707_v21 = vmax.f32 %v675_v15, 0.0  ;;  %v689_v22 = vmax.f32 %v657_v16, 0.0  ;;  %v900_v23 = vpop.f32.mrb[4].mxu0  ;;  %v1313_v24 = vadd.f32 %v1201_v54, %v593_v52  ;;  %v1316_v25 = vadd.f32 %v1201_v54, %v609_v53  ;;  %v577_v10 = vld [vmem:[%s1188_s18 + $0xf8] sm:$0xff] }
  0xf8   : > { %737 = vst.msk [vmem:[%s1301_s12 + $0x80] sm:$0xff] %vm720_vm2, %v704_v11  ;;  %724 = vst.msk [vmem:[%s1301_s12 + $0x18] sm:$0xff] %vm720_vm2, %v691_v18  ;;  %v705_v27 = vmax.f32 %v673_v19, 0.0  ;;  %v444_v28 = vadd.f32 %v900_v23, %v1245_v29  ;;  %v916_v30 = vpop.f32.mrb[4].mxu1  ;;  %v435_v31 = vpop.f32.mrb[5].mxu0  ;;  %v599_v56 = vmul.f32 %v1194_v51, %v560_v26  ;;  %v649_v8 = vadd.f32 %v1201_v54, %v610_v34  ;;  %v559_v14 = vld [vmem:[%s1188_s18 + $0x68] sm:$0xff] }
  0xf9   : > { %740 = vst.msk [vmem:[%s1301_s12 + $0x98] sm:$0xff] %vm720_vm2, %v707_v21  ;;  %722 = vst.msk [vmem:[%s1301_s12 + $0x8] sm:$0xff] %vm720_vm2, %v689_v22  ;;  %v508_v39 = vadd.f32 %v916_v30, %v1245_v29  ;;  %v436_v40 = vadd.f32 %v1245_v29, %v435_v31  ;;  %v499_v41 = vpop.f32.mrb[5].mxu1  ;;  %v901_v45 = vpop.f32.mrb[6].mxu0  ;;  %v597_v13 = vmul.f32 %v1194_v51, %v558_v1 }
  0xfa   : > { %738 = vst.msk [vmem:[%s1301_s12 + $0x88] sm:$0xff] %vm720_vm2, %v705_v27  ;;  %v662_v48 = vadd.f32 %v1250_v32, %v444_v28  ;;  %v500_v49 = vadd.f32 %v1245_v29, %v499_v41  ;;  %v447_v52 = vadd.f32 %v901_v45, %v1245_v29  ;;  %v917_v53 = vpop.f32.mrb[6].mxu1  ;;  %v438_v55 = vpop.f32.mrb[7].mxu0  ;;  %v638_v11 = vadd.f32 %v1201_v54, %v599_v56 }
  0xfb   : > { %v678_v57 = vadd.f32 %v1255_v35, %v508_v39  ;;  %v660_v58 = vadd.f32 %v1258_v36, %v436_v40  ;;  %v511_v59 = vadd.f32 %v917_v53, %v1245_v29  ;;  %v439_v60 = vadd.f32 %v1245_v29, %v438_v55  ;;  %v502_v32 = vpop.f32.mrb[7].mxu1  ;;  %v576_v35 = vld [vmem:[%s1188_s18 + $0xf0] sm:$0xff] }
  0xfc   : > { %v694_v61 = vmax.f32 %v662_v48, 0.0  ;;  %v676_v62 = vadd.f32 %v1261_v37, %v500_v49  ;;  %v663_v63 = vadd.f32 %v1264_v38, %v447_v52  ;;  %v503_v0 = vadd.f32 %v1245_v29, %v502_v32 }
  0xfd   : > { %v710_v2 = vmax.f32 %v678_v57, 0.0  ;;  %v692_v36 = vmax.f32 %v660_v58, 0.0  ;;  %v679_v3 = vadd.f32 %v1269_v42, %v511_v59  ;;  %v661_v5 = vadd.f32 %v1272_v43, %v439_v60 }
  0xfe   : > { %727 = vst.msk [vmem:[%s1301_s12 + $0x30] sm:$0xff] %vm720_vm2, %v694_v61  ;;  %v708_v37 = vmax.f32 %v676_v62, 0.0  ;;  %v695_v38 = vmax.f32 %v663_v63, 0.0  ;;  %v677_v7 = vadd.f32 %v1275_v44, %v503_v0  ;;  %v615_v12 = vmul.f32 %v1194_v51, %v576_v35 }
  0xff   : > { %743 = vst.msk [vmem:[%s1301_s12 + $0xb0] sm:$0xff] %vm720_vm2, %v710_v2  ;;  %725 = vst.msk [vmem:[%s1301_s12 + $0x20] sm:$0xff] %vm720_vm2, %v692_v36  ;;  %v711_v42 = vmax.f32 %v679_v3, 0.0  ;;  %v693_v43 = vmax.f32 %v661_v5, 0.0  ;;  %v904_v4 = vpop.f32.mrb[8].mxu0  ;;  %v613_v18 = vmul.f32 %v1194_v51, %v574_v6  ;;  %v600_v26 = vmul.f32 %v1194_v51, %v561_v9 }
 0x100   : > { %741 = vst.msk [vmem:[%s1301_s12 + $0xa0] sm:$0xff] %vm720_vm2, %v708_v37  ;;  %728 = vst.msk [vmem:[%s1301_s12 + $0x38] sm:$0xff] %vm720_vm2, %v695_v38  ;;  %v709_v44 = vmax.f32 %v677_v7, 0.0  ;;  %v460_v15 = vadd.f32 %v904_v4, %v1245_v29  ;;  %v920_v16 = vpop.f32.mrb[8].mxu1  ;;  %v451_v17 = vpop.f32.mrb[9].mxu0  ;;  %v616_v27 = vmul.f32 %v1194_v51, %v577_v10  ;;  %v598_v40 = vmul.f32 %v1194_v51, %v559_v14 }
 0x101   : > { %744 = vst.msk [vmem:[%s1301_s12 + $0xb8] sm:$0xff] %vm720_vm2, %v711_v42  ;;  %726 = vst.msk [vmem:[%s1301_s12 + $0x28] sm:$0xff] %vm720_vm2, %v693_v43  ;;  %v524_v19 = vadd.f32 %v920_v16, %v1245_v29  ;;  %v452_v21 = vadd.f32 %v1245_v29, %v451_v17  ;;  %v515_v22 = vpop.f32.mrb[9].mxu1  ;;  %v905_v23 = vpop.f32.mrb[10].mxu0  ;;  %v652_v2 = vadd.f32 %v1201_v54, %v613_v18 }
 0x102   : > { %742 = vst.msk [vmem:[%s1301_s12 + $0xa8] sm:$0xff] %vm720_vm2, %v709_v44  ;;  %v666_v28 = vadd.f32 %v1285_v50, %v460_v15  ;;  %v516_v30 = vadd.f32 %v1245_v29, %v515_v22  ;;  %v463_v31 = vadd.f32 %v905_v23, %v1245_v29  ;;  %v921_v34 = vpop.f32.mrb[10].mxu1  ;;  %v454_v39 = vpop.f32.mrb[11].mxu0  ;;  %v575_v50 = vld [vmem:[%s1188_s18 + $0xe8] sm:$0xff]  ;;  %v639_v36 = vadd.f32 %v1201_v54, %v600_v26  ;;  %s971_s18 = scalar_lea.vmem %s1447_s14, 4096 }
 0x103   : > { %v682_v41 = vadd.f32 %v1306_v20, %v524_v19  ;;  %v664_v45 = vadd.f32 %v1313_v24, %v452_v21  ;;  %v527_v48 = vadd.f32 %v921_v34, %v1245_v29  ;;  %v455_v49 = vadd.f32 %v1245_v29, %v454_v39  ;;  %v518_v52 = vpop.f32.mrb[11].mxu1  ;;  %p972_p11 = scmp.ne.s32.totalorder %s1447_s14, %s971_s18  ;;  %p979_p1 = scmp.lt.s32.totalorder %s977_s26, %s971_s18 }
 0x104   : > { %v698_v53 = vmax.f32 %v666_v28, 0.0  ;;  %v680_v55 = vadd.f32 %v1316_v25, %v516_v30  ;;  %v667_v56 = vadd.f32 %v1325_v33, %v463_v31  ;;  %v519_v57 = vadd.f32 %v1245_v29, %v518_v52 }
 0x105   : > { %v714_v58 = vmax.f32 %v682_v41, 0.0  ;;  %v696_v20 = vmax.f32 %v664_v45, 0.0  ;;  %v683_v24 = vadd.f32 %v1335_v46, %v527_v48  ;;  %v665_v59 = vadd.f32 %v1338_v47, %v455_v49  ;;  %p973_p12 = pnand %p972_p11, %p1111_p5  ;;  %p980_p2 = por %p979_p1, %p978_p0 }
 0x106   : > { %731 = vst.msk [vmem:[%s1301_s12 + $0x50] sm:$0xff] %vm720_vm2, %v698_v53  ;;  %v712_v60 = vmax.f32 %v680_v55, 0.0  ;;  %v699_v32 = vmax.f32 %v667_v56, 0.0  ;;  %v681_v61 = vadd.f32 %v649_v8, %v519_v57  ;;  %v614_v62 = vmul.f32 %v1194_v51, %v575_v50 }
 0x107   : > { %747 = vst.msk [vmem:[%s1301_s12 + $0xd0] sm:$0xff] %vm720_vm2, %v714_v58  ;;  %729 = vst.msk [vmem:[%s1301_s12 + $0x40] sm:$0xff] %vm720_vm2, %v696_v20  ;;  %v715_v25 = vmax.f32 %v683_v24, 0.0  ;;  %v697_v33 = vmax.f32 %v665_v59, 0.0  ;;  %v908_v63 = vpop.f32.mrb[12].mxu0  ;;  %v654_v46 = vadd.f32 %v1201_v54, %v615_v12  ;;  %v636_v47 = vadd.f32 %v1201_v54, %v597_v13  ;;  %p974_p13 = pneg %p973_p12 }
 0x108   : > { %745 = vst.msk [vmem:[%s1301_s12 + $0xc0] sm:$0xff] %vm720_vm2, %v712_v60  ;;  %732 = vst.msk [vmem:[%s1301_s12 + $0x58] sm:$0xff] %vm720_vm2, %v699_v32  ;;  %v713_v0 = vmax.f32 %v681_v61, 0.0  ;;  %v476_v51 = vadd.f32 %v908_v63, %v1245_v29  ;;  %v924_v35 = vpop.f32.mrb[12].mxu1  ;;  %v467_v1 = vpop.f32.mrb[13].mxu0  ;;  %v655_v38 = vadd.f32 %v1201_v54, %v616_v27  ;;  %v637_v7 = vadd.f32 %v1201_v54, %v598_v40 }
 0x109   : > { %748 = vst.msk [vmem:[%s1301_s12 + $0xd8] sm:$0xff] %vm720_vm2, %v715_v25  ;;  %730 = vst.msk [vmem:[%s1301_s12 + $0x48] sm:$0xff] %vm720_vm2, %v697_v33  ;;  %v540_v3 = vadd.f32 %v924_v35, %v1245_v29  ;;  %v468_v5 = vadd.f32 %v1245_v29, %v467_v1  ;;  %v531_v6 = vpop.f32.mrb[13].mxu1  ;;  %v909_v37 = vpop.f32.mrb[14].mxu0  ;;  %v653_v4 = vadd.f32 %v1201_v54, %v614_v62  ;;  %p981_p3 = pnand %p980_p2, %p974_p13 }
 0x10a   : > { %746 = vst.msk [vmem:[%s1301_s12 + $0xc8] sm:$0xff] %vm720_vm2, %v713_v0  ;;  %v670_v8 = vadd.f32 %v638_v11, %v476_v51  ;;  %v532_v9 = vadd.f32 %v1245_v29, %v531_v6  ;;  %v479_v10 = vadd.f32 %v909_v37, %v1245_v29  ;;  %v925_v42 = vpop.f32.mrb[14].mxu1  ;;  %v470_v43 = vpop.f32.mrb[15].mxu0 }
 0x10b   : > { %v686_v12 = vadd.f32 %v654_v46, %v540_v3  ;;  %v668_v13 = vadd.f32 %v636_v47, %v468_v5  ;;  %v543_v14 = vadd.f32 %v925_v42, %v1245_v29  ;;  %v471_v44 = vadd.f32 %v1245_v29, %v470_v43  ;;  %v534_v15 = vpop.f32.mrb[15].mxu1 }
 0x10c   : > { %v702_v16 = vmax.f32 %v670_v8, 0.0  ;;  %v684_v17 = vadd.f32 %v652_v2, %v532_v9  ;;  %v671_v11 = vadd.f32 %v639_v36, %v479_v10  ;;  %v535_v18 = vadd.f32 %v1245_v29, %v534_v15 }
 0x10d   : > { %v718_v54 = vmax.f32 %v686_v12, 0.0  ;;  %v700_v19 = vmax.f32 %v668_v13, 0.0  ;;  %v687_v21 = vadd.f32 %v655_v38, %v543_v14  ;;  %v669_v22 = vadd.f32 %v637_v7, %v471_v44 }
 0x10e   : > { %735 = vst.msk [vmem:[%s1301_s12 + $0x70] sm:$0xff] %vm720_vm2, %v702_v16  ;;  %v716_v23 = vmax.f32 %v684_v17, 0.0  ;;  %v703_v26 = vmax.f32 %v671_v11, 0.0  ;;  %v685_v27 = vadd.f32 %v653_v4, %v535_v18 }
 0x10f   : > { %751 = vst.msk [vmem:[%s1301_s12 + $0xf0] sm:$0xff] %vm720_vm2, %v718_v54  ;;  %733 = vst.msk [vmem:[%s1301_s12 + $0x60] sm:$0xff] %vm720_vm2, %v700_v19  ;;  %v719_v29 = vmax.f32 %v687_v21, 0.0  ;;  %v701_v28 = vmax.f32 %v669_v22, 0.0 }
 0x110   : > { %749 = vst.msk [vmem:[%s1301_s12 + $0xe0] sm:$0xff] %vm720_vm2, %v716_v23  ;;  %736 = vst.msk [vmem:[%s1301_s12 + $0x78] sm:$0xff] %vm720_vm2, %v703_v26  ;;  %v717_v30 = vmax.f32 %v685_v27, 0.0 }
 0x111   : > { %752 = vst.msk [vmem:[%s1301_s12 + $0xf8] sm:$0xff] %vm720_vm2, %v719_v29  ;;  %734 = vst.msk [vmem:[%s1301_s12 + $0x68] sm:$0xff] %vm720_vm2, %v701_v28 }
 0x112   : > { %750 = vst.msk [vmem:[%s1301_s12 + $0xe8] sm:$0xff] %vm720_vm2, %v717_v30 }
 0x113   : > { %984 = shalt.err (!%p981_p3)
}
 0x114   : > { %s985_s28 = scalar_lea.hbm %s1445_s16, 4096  ;;  %s989_s10 = scalar_lea.hbm %s1508_s6, 8192 }
 0x115   : > { %p986_p4 = scmp.ne.s32.totalorder %s1445_s16, %s985_s28  ;;  %p990_p9 = scmp.lt.u32.totalorder %s1445_s16, %s1508_s6 }
 0x116   : > { %p991_p10 = scmp.lt.u32.totalorder %s989_s10, %s985_s28  ;;  %p993_p12 = scmp.lt.u32.totalorder %s985_s28, %s1445_s16 }
 0x117   : > { %p987_p7 = pnand %p986_p4, %p1111_p5 }
 0x118   : > { %p992_p11 = por %p991_p10, %p990_p9 }
 0x119   : > { %p988_p8 = pneg %p987_p7 }
 0x11a   : > { %p994_p13 = por %p993_p12, %p992_p11 }
 0x11c   : > { %p995_p0 = pnand %p994_p13, %p988_p8 }
 0x11e   : > { %998 = shalt.err (!%p995_p0)
}
 0x11f   : > { %s1036_s13 = smov 128   ;;  %s1037_s25 = smov 8  }
 0x120   : > { %930 = dma.vmem_to_hbm [thread:$0]  (%p1111_p5), %s1447_s14, 4096, %s1445_s16, %s1461_s17, %s1036_s13, %s1036_s13, %s1037_s25  }
 0x121 PF: > { %p936_p1 = scmp.ge.s32.totalorder %s1033_s24, 2  ;;  %s782_s15 = sand.u32 1, %s1021_s21  }
 0x122   : > { %s783_s18 = scalar_lea.sflag [#allocation3], %s782_s15 }
 0x123   : > { %p933_p2 = pnand %p936_p1, %p1115_p6 }
 0x125   : > { %1016 = dma.done.wait (!%p933_p2), %s783_s18, 4096  }
 0x126   : > { %1018 = vsyncadd (!%p933_p2), %s783_s18, 4294963200  ;;  %p16_p3 = scmp.ge.s32.totalorder %s1098_s27, 4   ;;  %s1511_s21 = smov %s1025_s22 }
 0x127   : > { %s1512_s22 = smov %s1029_s23  ;;  %s1513_s23 = smov %s1109_s30 }
 0x128   : > { %s1514_s24 = smov %s1098_s27  ;;  %18 = sbr.rel (!%p16_p3) target bundleno = 3 (0x3), region = 82 }
 0x12f   :  { %788 = vsyncpa [#allocation3], 1 }
 0x130   :  { %790 = vsyncpa [#allocation3 + $0x1], 1 }

// kernel: block_forward.5
= control target key start
LH: loop header
LB: loop body
LE: loop exit
PB: predicated region body
PF: predicated region fallthrough
CT: control target
= control target key end

     0   :  { %s2905_s21 = smov 0   ;;  %s4096_s0 = inlined_call_operand.vmem [shape: f32[2,16,16,8], index: 0, kind: input, shape index: {}]   ;;  %s4097_s1 = inlined_call_operand.vmem [shape: f32[1,8], index: 1, kind: input, shape index: {}]   ;;  %s4098_s2 = inlined_call_operand.vmem [shape: f32[1,8], index: 2, kind: input, shape index: {}]   ;;  %s4099_s3 = inlined_call_operand.vmem [shape: bf16[72,8], index: 3, kind: input, shape index: {}]   ;;  %s4100_s4 = inlined_call_operand.vmem [shape: f32[2,16,16,8], index: 4, kind: output, shape index: {0}]   ;;  %s4101_s5 = inlined_call_operand.vmem [shape: f32[2,1,8], index: 5, kind: output, shape index: {1}]   ;;  %s4102_s6 = inlined_call_operand.vmem [shape: f32[2,1,8], index: 6, kind: output, shape index: {2}]  }
   0x1 LB: > { %s2718_s22 = sadd.s32 4294967295, %s2859_s21   ;;  %p2722_p0 = scmp.ge.s32.totalorder %s2859_s21, 1  ;;  %s2859_s21 = sphi %s2905_s21, %s17_s21  }
   0x2   : > { %p217_p1 = scmp.lt.s32.totalorder %s2859_s21, 3 }
   0x4   : > { %p218_p2 = pnand %p2722_p0, %p217_p1 }
   0x5   : > { %vm412_vm0 = vcmask (!%p218_p2), 64512   ;;  %p2915_p3 = scmp.lt.s32.totalorder (!%p218_p2), %s2718_s22, 1  ;;  %v2861_v0 = vmov (!%p218_p2), 0.0   ;;  %vm415_vm1 = vcmask (!%p218_p2), 58368   ;;  %v2964_v1 = vld [vmem:[%s4097_s1] ss:$0 sm:$0xff] (!%p218_p2) }
   0x6   : > { %221 = sbr.rel (%p218_p2) target bundleno = 911 (0x38f), region = 36  ;;  %413 = vst.msk [vmem:[#allocation2] sm:$0xff] (!%p218_p2), %vm412_vm0, %v2861_v0  ;;  %414 = vst.msk [vmem:[#allocation2 + $0x8] sm:$0xff] (!%p218_p2), %vm412_vm0, %v2861_v0  ;;  %v2995_v2 = vld [vmem:[%s4098_s2] ss:$0 sm:$0xff] (!%p218_p2)  ;;  %s2862_s8 = smov (!%p218_p2), 8  }
   0x7   : > { %417 = vst.msk [vmem:[#allocation2 + $0x18] sm:$0xff] (!%p218_p2), %vm412_vm0, %v2861_v0  ;;  %418 = vst.msk [vmem:[#allocation2 + $0x20] sm:$0xff] (!%p218_p2), %vm412_vm0, %v2861_v0  ;;  %s2863_s9 = smov (!%p218_p2), 16   ;;  %vm725_vm2 = vcmask (!%p218_p2), 130112   ;;  %s2864_s10 = smov (!%p218_p2), 24   ;;  %vm918_vm3 = vcmask (!%p218_p2), 195712  }
   0x8   : > { %420 = vst.msk [vmem:[#allocation2 + $0x30] sm:$0xff] (!%p218_p2), %vm412_vm0, %v2861_v0  ;;  %421 = vst.msk [vmem:[#allocation2 + $0x38] sm:$0xff] (!%p218_p2), %vm412_vm0, %v2861_v0  ;;  %s2865_s11 = smov (!%p218_p2), 32   ;;  %s2866_s12 = smov (!%p218_p2), 40   ;;  %vm2243_vm4 = vcmask (!%p218_p2), 1043456   ;;  %vm1111_vm5 = vcmask (!%p218_p2), 261312  }
   0x9   : > { %423 = vst.msk [vmem:[#allocation2 + $0x48] sm:$0xff] (!%p218_p2), %vm412_vm0, %v2861_v0  ;;  %424 = vst.msk [vmem:[#allocation2 + $0x50] sm:$0xff] (!%p218_p2), %vm412_vm0, %v2861_v0  ;;  %s2867_s13 = smov (!%p218_p2), 48   ;;  %s2868_s18 = smov (!%p218_p2), 56   ;;  %vm1304_vm6 = vcmask (!%p218_p2), 326912   ;;  %vm1497_vm7 = vcmask (!%p218_p2), 392512  }
   0xa   : > { %426 = vst.msk [vmem:[#allocation2 + $0x60] sm:$0xff] (!%p218_p2), %vm412_vm0, %v2861_v0  ;;  %427 = vst.msk [vmem:[#allocation2 + $0x68] sm:$0xff] (!%p218_p2), %vm412_vm0, %v2861_v0  ;;  %s2869_s25 = smov (!%p218_p2), 64   ;;  %vm1691_vm8 = vcmask (!%p218_p2), 458112   ;;  %vm1884_vm9 = vcmask (!%p218_p2), 523712   ;;  %vm2077_vm10 = vcmask (!%p218_p2), 589312  }
   0xb   : > { %429 = vst.msk [vmem:[#allocation2 + $0x78] sm:$0xff] (!%p218_p2), %vm412_vm0, %v2861_v0  ;;  %430 = vst.msk [vmem:[#allocation2 + $0x80] sm:$0xff] (!%p218_p2), %vm412_vm0, %v2861_v0  ;;  %vm2194_vm11 = vcmask (!%p218_p2), 588800   ;;  %vm2509_vm12 = vcmask (!%p218_p2), 57344  }
   0xc   : > { %432 = vst.msk [vmem:[#allocation2 + $0x90] sm:$0xff] (!%p218_p2), %vm412_vm0, %v2861_v0  ;;  %433 = vst.msk [vmem:[#allocation2 + $0x98] sm:$0xff] (!%p218_p2), %vm412_vm0, %v2861_v0 }
   0xd   : > { %435 = vst.msk [vmem:[#allocation2 + $0xa8] sm:$0xff] %vm412_vm0, %v2861_v0  ;;  %436 = vst.msk [vmem:[#allocation2 + $0xb0] sm:$0xff] %vm412_vm0, %v2861_v0  ;;  %s4105_s22 = smov (!%p2915_p3, %s2718_s22), 1  ;;  %v565_v12 = vld [vmem:[#allocation2 + $0x1] sm:$0xff] }
   0xe   : > { %438 = vst.msk [vmem:[#allocation2 + $0xc0] sm:$0xff] %vm412_vm0, %v2861_v0  ;;  %439 = vst.msk [vmem:[#allocation2 + $0xc8] sm:$0xff] %vm412_vm0, %v2861_v0  ;;  %s2752_s26 = sshll.u32 %s4105_s22, 8  ;;  %629 = vrot.lane.b32.xlu0 %v565_v12, %s2862_s8  ;;  %s268_s16 = scalar_lea.vmem %s4102_s6, %s4105_s22 }
   0xf   : > { %441 = vst.msk [vmem:[#allocation2 + $0xd8] sm:$0xff] %vm412_vm0, %v2861_v0  ;;  %442 = vst.msk [vmem:[#allocation2 + $0xe0] sm:$0xff] %vm412_vm0, %v2861_v0  ;;  %s2990_s29 = scalar_lea.vmem %s4096_s0, %s2752_s26 }
  0x10   : > { %444 = vst.msk [vmem:[#allocation2 + $0xf0] sm:$0xff] %vm412_vm0, %v2861_v0  ;;  %445 = vst.msk [vmem:[#allocation2 + $0xf8] sm:$0xff] %vm412_vm0, %v2861_v0  ;;  %v270_v3 = vld [vmem:[%s2990_s29] sm:$0xff]  ;;  %v271_v4 = vld [vmem:[%s2990_s29 + $0x8] sm:$0xff] }
  0x11   : > { %447 = vst.msk [vmem:[#allocation2 + $0x108] sm:$0xff] %vm412_vm0, %v2861_v0  ;;  %448 = vst.msk [vmem:[#allocation2 + $0x110] sm:$0xff] %vm412_vm0, %v2861_v0  ;;  %v272_v5 = vld [vmem:[%s2990_s29 + $0x10] sm:$0xff]  ;;  %v309_v6 = vmul.f32 %v2964_v1, %v270_v3  ;;  %v310_v7 = vmul.f32 %v2964_v1, %v271_v4  ;;  %v273_v9 = vld [vmem:[%s2990_s29 + $0x18] sm:$0xff] }
  0x12   : > { %450 = vst.msk [vmem:[#allocation2 + $0x120] sm:$0xff] %vm412_vm0, %v2861_v0  ;;  %451 = vst.msk [vmem:[#allocation2 + $0x128] sm:$0xff] %vm412_vm0, %v2861_v0  ;;  %v311_v8 = vmul.f32 %v2964_v1, %v272_v5  ;;  %v274_v10 = vld [vmem:[%s2990_s29 + $0x20] sm:$0xff]  ;;  %v275_v11 = vld [vmem:[%s2990_s29 + $0x28] sm:$0xff]  ;;  %v312_v13 = vmul.f32 %v2964_v1, %v273_v9 }
  0x13   : > { %453 = vst.msk [vmem:[#allocation2 + $0x138] sm:$0xff] %vm412_vm0, %v2861_v0  ;;  %454 = vst.msk [vmem:[#allocation2 + $0x140] sm:$0xff] %vm412_vm0, %v2861_v0  ;;  %v313_v14 = vmul.f32 %v2964_v1, %v274_v10  ;;  %v314_v15 = vmul.f32 %v2964_v1, %v275_v11  ;;  %v276_v16 = vld [vmem:[%s2990_s29 + $0x30] sm:$0xff]  ;;  %v277_v17 = vld [vmem:[%s2990_s29 + $0x38] sm:$0xff]  ;;  %v348_v18 = vadd.f32 %v2995_v2, %v309_v6 }
  0x14   : > { %456 = vst.msk [vmem:[#allocation2 + $0x150] sm:$0xff] %vm412_vm0, %v2861_v0  ;;  %457 = vst.msk [vmem:[#allocation2 + $0x158] sm:$0xff] %vm412_vm0, %v2861_v0  ;;  %v349_v20 = vadd.f32 %v2995_v2, %v310_v7  ;;  %v350_v21 = vadd.f32 %v2995_v2, %v311_v8  ;;  %v315_v22 = vmul.f32 %v2964_v1, %v276_v16  ;;  %v278_v27 = vld [vmem:[%s2990_s29 + $0x40] sm:$0xff]  ;;  %v279_v28 = vld [vmem:[%s2990_s29 + $0x48] sm:$0xff] }
  0x15   : > { %459 = vst.msk [vmem:[#allocation2 + $0x168] sm:$0xff] %vm412_vm0, %v2861_v0  ;;  %460 = vst.msk [vmem:[#allocation2 + $0x170] sm:$0xff] %vm412_vm0, %v2861_v0  ;;  %v351_v23 = vadd.f32 %v2995_v2, %v312_v13  ;;  %v352_v24 = vadd.f32 %v2995_v2, %v313_v14  ;;  %v353_v25 = vadd.f32 %v2995_v2, %v314_v15  ;;  %v280_v29 = vld [vmem:[%s2990_s29 + $0x50] sm:$0xff]  ;;  %v380_v30 = vmax.f32 %v348_v18, 0.0  ;;  %v281_v34 = vld [vmem:[%s2990_s29 + $0x58] sm:$0xff] }
  0x16   : > { %462 = vst.msk [vmem:[#allocation2 + $0x180] sm:$0xff] %vm412_vm0, %v2861_v0  ;;  %463 = vst.msk [vmem:[#allocation2 + $0x188] sm:$0xff] %vm412_vm0, %v2861_v0  ;;  %v316_v26 = vmul.f32 %v2964_v1, %v277_v17  ;;  %v381_v31 = vmax.f32 %v349_v20, 0.0  ;;  %v382_v32 = vmax.f32 %v350_v21, 0.0  ;;  %v354_v33 = vadd.f32 %v2995_v2, %v315_v22  ;;  %v282_v35 = vld [vmem:[%s2990_s29 + $0x60] sm:$0xff]  ;;  %v283_v36 = vld [vmem:[%s2990_s29 + $0x68] sm:$0xff] }
  0x17   : > { %465 = vst.msk [vmem:[#allocation2 + $0x198] sm:$0xff] %vm412_vm0, %v2861_v0  ;;  %466 = vst.msk [vmem:[#allocation2 + $0x1a0] sm:$0xff] %vm412_vm0, %v2861_v0  ;;  %v383_v37 = vmax.f32 %v351_v23, 0.0  ;;  %v384_v38 = vmax.f32 %v352_v24, 0.0  ;;  %v385_v39 = vmax.f32 %v353_v25, 0.0  ;;  %v284_v41 = vld [vmem:[%s2990_s29 + $0x70] sm:$0xff]  ;;  %v317_v43 = vmul.f32 %v2964_v1, %v278_v27 }
  0x18   : > { %416 = vst.msk [vmem:[#allocation2 + $0x10] sm:$0x3] %vm415_vm1, %v2861_v0  ;;  %419 = vst.msk [vmem:[#allocation2 + $0x28] sm:$0x3] %vm415_vm1, %v2861_v0  ;;  %v355_v40 = vadd.f32 %v2995_v2, %v316_v26  ;;  %v386_v42 = vmax.f32 %v354_v33, 0.0  ;;  %v318_v44 = vmul.f32 %v2964_v1, %v279_v28  ;;  %v319_v45 = vmul.f32 %v2964_v1, %v280_v29  ;;  %v285_v46 = vld [vmem:[%s2990_s29 + $0x78] sm:$0xff] }
  0x19   : > { %422 = vst.msk [vmem:[#allocation2 + $0x40] sm:$0x3] %vm415_vm1, %v2861_v0  ;;  %425 = vst.msk [vmem:[#allocation2 + $0x58] sm:$0x3] %vm415_vm1, %v2861_v0  ;;  %v320_v48 = vmul.f32 %v2964_v1, %v281_v34  ;;  %v321_v49 = vmul.f32 %v2964_v1, %v282_v35  ;;  %v322_v50 = vmul.f32 %v2964_v1, %v283_v36  ;;  %v286_v55 = vld [vmem:[%s2990_s29 + $0x80] sm:$0xff]  ;;  %v287_v56 = vld [vmem:[%s2990_s29 + $0x88] sm:$0xff] }
  0x1a   : > { %428 = vst.msk [vmem:[#allocation2 + $0x70] sm:$0x3] %vm415_vm1, %v2861_v0  ;;  %431 = vst.msk [vmem:[#allocation2 + $0x88] sm:$0x3] %vm415_vm1, %v2861_v0  ;;  %v387_v47 = vmax.f32 %v355_v40, 0.0  ;;  %v356_v51 = vadd.f32 %v2995_v2, %v317_v43  ;;  %v357_v52 = vadd.f32 %v2995_v2, %v318_v44  ;;  %v358_v53 = vadd.f32 %v2995_v2, %v319_v45  ;;  %v288_v61 = vld [vmem:[%s2990_s29 + $0x90] sm:$0xff] }
  0x1b   : > { %434 = vst.msk [vmem:[#allocation2 + $0xa0] sm:$0x3] %vm415_vm1, %v2861_v0  ;;  %437 = vst.msk [vmem:[#allocation2 + $0xb8] sm:$0x3] %vm415_vm1, %v2861_v0  ;;  %v323_v54 = vmul.f32 %v2964_v1, %v284_v41  ;;  %v359_v57 = vadd.f32 %v2995_v2, %v320_v48  ;;  %v360_v58 = vadd.f32 %v2995_v2, %v321_v49  ;;  %v289_v62 = vld [vmem:[%s2990_s29 + $0x98] sm:$0xff]  ;;  %v290_v63 = vld [vmem:[%s2990_s29 + $0xa0] sm:$0xff] }
  0x1c   : > { %440 = vst.msk [vmem:[#allocation2 + $0xd0] sm:$0x3] %vm415_vm1, %v2861_v0  ;;  %443 = vst.msk [vmem:[#allocation2 + $0xe8] sm:$0x3] %vm415_vm1, %v2861_v0  ;;  %v361_v59 = vadd.f32 %v2995_v2, %v322_v50  ;;  %v324_v60 = vmul.f32 %v2964_v1, %v285_v46  ;;  %v389_v3 = vmax.f32 %v357_v52, 0.0  ;;  %v390_v4 = vmax.f32 %v358_v53, 0.0 }
  0x1d   : > { %446 = vst.msk [vmem:[#allocation2 + $0x100] sm:$0x3] %vm415_vm1, %v2861_v0  ;;  %449 = vst.msk [vmem:[#allocation2 + $0x118] sm:$0x3] %vm415_vm1, %v2861_v0  ;;  %v362_v5 = vadd.f32 %v2995_v2, %v323_v54  ;;  %v291_v6 = vld [vmem:[%s2990_s29 + $0xa8] sm:$0xff]  ;;  %v501_v7 = vld [vmem:[#allocation2] sm:$0xff]  ;;  %v325_v14 = vmul.f32 %v2964_v1, %v286_v55  ;;  %v326_v15 = vmul.f32 %v2964_v1, %v287_v56 }
  0x1e   : > { %452 = vst.msk [vmem:[#allocation2 + $0x130] sm:$0x3] %vm415_vm1, %v2861_v0  ;;  %455 = vst.msk [vmem:[#allocation2 + $0x148] sm:$0x3] %vm415_vm1, %v2861_v0  ;;  %v502_v8 = vld [vmem:[#allocation2 + $0x8] sm:$0xff]  ;;  %v391_v9 = vmax.f32 %v359_v57, 0.0  ;;  %v363_v12 = vadd.f32 %v2995_v2, %v324_v60  ;;  %v327_v16 = vmul.f32 %v2964_v1, %v288_v61  ;;  %v328_v21 = vmul.f32 %v2964_v1, %v289_v62 }
  0x1f   : > { %458 = vst.msk [vmem:[#allocation2 + $0x160] sm:$0x3] %vm415_vm1, %v2861_v0  ;;  %461 = vst.msk [vmem:[#allocation2 + $0x178] sm:$0x3] %vm415_vm1, %v2861_v0  ;;  %v566_v19 = vld [vmem:[#allocation2 + $0x9] sm:$0xff]  ;;  %v392_v10 = vmax.f32 %v360_v58, 0.0  ;;  %v329_v22 = vmul.f32 %v2964_v1, %v290_v63  ;;  %v330_v23 = vmul.f32 %v2964_v1, %v291_v6  ;;  %v364_v25 = vadd.f32 %v2995_v2, %v325_v14 }
  0x20   : > { %464 = vst.msk [vmem:[#allocation2 + $0x190] sm:$0x3] %vm415_vm1, %v2861_v0  ;;  %467 = vst.msk [vmem:[#allocation2 + $0x1a8] sm:$0x3] %vm415_vm1, %v2861_v0  ;;  %631 = vrot.lane.b32.xlu0 %v566_v19, %s2862_s8  ;;  %v388_v0 = vmax.f32 %v356_v51, 0.0  ;;  %v393_v11 = vmax.f32 %v361_v59, 0.0  ;;  %v365_v26 = vadd.f32 %v2995_v2, %v326_v15  ;;  %v366_v27 = vadd.f32 %v2995_v2, %v327_v16 }
  0x21   : > { %469 = vst.msk [vmem:[#allocation2 + $0x19] sm:$0xff] %vm412_vm0, %v380_v30  ;;  %470 = vst.msk [vmem:[#allocation2 + $0x21] sm:$0xff] %vm412_vm0, %v381_v31  ;;  %v394_v13 = vmax.f32 %v362_v5, 0.0  ;;  %v292_v17 = vld [vmem:[%s2990_s29 + $0xb0] sm:$0xff]  ;;  %v395_v20 = vmax.f32 %v363_v12, 0.0  ;;  %v293_v24 = vld [vmem:[%s2990_s29 + $0xb8] sm:$0xff]  ;;  %v367_v31 = vadd.f32 %v2995_v2, %v328_v21  ;;  %v369_v33 = vadd.f32 %v2995_v2, %v330_v23 }
  0x22   : > { %471 = vst.msk [vmem:[#allocation2 + $0x31] sm:$0xff] %vm412_vm0, %v382_v32  ;;  %472 = vst.msk [vmem:[#allocation2 + $0x39] sm:$0xff] %vm412_vm0, %v383_v37  ;;  %v294_v28 = vld [vmem:[%s2990_s29 + $0xc0] sm:$0xff]  ;;  %v368_v32 = vadd.f32 %v2995_v2, %v329_v22  ;;  %v331_v34 = vmul.f32 %v2964_v1, %v292_v17  ;;  %v295_v35 = vld [vmem:[%s2990_s29 + $0xc8] sm:$0xff]  ;;  %v396_v36 = vmax.f32 %v364_v25, 0.0  ;;  %v397_v37 = vmax.f32 %v365_v26, 0.0 }
  0x23   : > { %473 = vst.msk [vmem:[#allocation2 + $0x49] sm:$0xff] %vm412_vm0, %v384_v38  ;;  %474 = vst.msk [vmem:[#allocation2 + $0x51] sm:$0xff] %vm412_vm0, %v385_v39  ;;  %v398_v38 = vmax.f32 %v366_v27, 0.0  ;;  %v332_v39 = vmul.f32 %v2964_v1, %v293_v24  ;;  %v296_v40 = vld [vmem:[%s2990_s29 + $0xd0] sm:$0xff]  ;;  %v297_v41 = vld [vmem:[%s2990_s29 + $0xd8] sm:$0xff]  ;;  %v399_v43 = vmax.f32 %v367_v31, 0.0  ;;  %v333_v49 = vmul.f32 %v2964_v1, %v294_v28 }
  0x24   : > { %475 = vst.msk [vmem:[#allocation2 + $0x61] sm:$0xff] %vm412_vm0, %v386_v42  ;;  %476 = vst.msk [vmem:[#allocation2 + $0x69] sm:$0xff] %vm412_vm0, %v387_v47  ;;  %v298_v42 = vld [vmem:[%s2990_s29 + $0xe0] sm:$0xff]  ;;  %v400_v44 = vmax.f32 %v368_v32, 0.0  ;;  %v401_v45 = vmax.f32 %v369_v33, 0.0  ;;  %v370_v46 = vadd.f32 %v2995_v2, %v331_v34  ;;  %v299_v47 = vld [vmem:[%s2990_s29 + $0xe8] sm:$0xff]  ;;  %v334_v50 = vmul.f32 %v2964_v1, %v295_v35 }
  0x25   : > { %533 = vst.msk [vmem:[#allocation3] sm:$0xff] %vm412_vm0, %v501_v7  ;;  %534 = vst.msk [vmem:[#allocation3 + $0x8] sm:$0xff] %vm412_vm0, %v502_v8  ;;  %v371_v48 = vadd.f32 %v2995_v2, %v332_v39  ;;  %v335_v56 = vmul.f32 %v2964_v1, %v296_v40  ;;  %v336_v57 = vmul.f32 %v2964_v1, %v297_v41 }
  0x26   : > { %477 = vst.msk [vmem:[#allocation2 + $0x79] sm:$0xff] %vm412_vm0, %v388_v0  ;;  %478 = vst.msk [vmem:[#allocation2 + $0x81] sm:$0xff] %vm412_vm0, %v389_v3  ;;  %v402_v55 = vmax.f32 %v370_v46, 0.0  ;;  %v337_v58 = vmul.f32 %v2964_v1, %v298_v42  ;;  %v372_v60 = vadd.f32 %v2995_v2, %v333_v49  ;;  %v373_v61 = vadd.f32 %v2995_v2, %v334_v50 }
  0x27   : > { %479 = vst.msk [vmem:[#allocation2 + $0x91] sm:$0xff] %vm412_vm0, %v390_v4  ;;  %480 = vst.msk [vmem:[#allocation2 + $0x99] sm:$0xff] %vm412_vm0, %v391_v9  ;;  %v403_v59 = vmax.f32 %v371_v48, 0.0  ;;  %v338_v62 = vmul.f32 %v2964_v1, %v299_v47  ;;  %v374_v63 = vadd.f32 %v2995_v2, %v335_v56  ;;  %v375_v0 = vadd.f32 %v2995_v2, %v336_v57 }
  0x28   : > { %v3070_v18 = vld [vmem:[#allocation2 + $0x19] sm:$0xff]  ;;  %481 = vst.msk [vmem:[#allocation2 + $0xa9] sm:$0xff] %vm412_vm0, %v392_v10  ;;  %482 = vst.msk [vmem:[#allocation2 + $0xb1] sm:$0xff] %vm412_vm0, %v393_v11  ;;  %v3090_v29 = vld [vmem:[#allocation2 + $0x21] sm:$0xff]  ;;  %v376_v3 = vadd.f32 %v2995_v2, %v337_v58  ;;  %v404_v4 = vmax.f32 %v372_v60, 0.0  ;;  %v405_v5 = vmax.f32 %v373_v61, 0.0 }
  0x29   : > { %v3072_v19 = vld [vmem:[#allocation2 + $0x31] sm:$0xff]  ;;  %633 = vrot.lane.b32.xlu1 %v3070_v18, %s2862_s8  ;;  %483 = vst.msk [vmem:[#allocation2 + $0xc1] sm:$0xff] %vm412_vm0, %v394_v13  ;;  %484 = vst.msk [vmem:[#allocation2 + $0xc9] sm:$0xff] %vm412_vm0, %v395_v20  ;;  %v3118_v52 = vld [vmem:[#allocation2 + $0x20] sm:$0xff]  ;;  %v377_v1 = vadd.f32 %v2995_v2, %v338_v62  ;;  %v406_v8 = vmax.f32 %v374_v63, 0.0  ;;  %v407_v9 = vmax.f32 %v375_v0, 0.0 }
  0x2a   : > { %637 = vrot.lane.b32.xlu0 %v3072_v19, %s2862_s8  ;;  %v3092_v30 = vld [vmem:[#allocation2 + $0x49] sm:$0xff]  ;;  %485 = vst.msk [vmem:[#allocation2 + $0xd9] sm:$0xff] %vm412_vm0, %v396_v36  ;;  %486 = vst.msk [vmem:[#allocation2 + $0xe1] sm:$0xff] %vm412_vm0, %v397_v37  ;;  %v3116_v51 = vld [vmem:[#allocation2 + $0x18] sm:$0xff]  ;;  %v408_v10 = vmax.f32 %v376_v3, 0.0 }
  0x2b   : > { %487 = vst.msk [vmem:[#allocation2 + $0xf1] sm:$0xff] %vm412_vm0, %v398_v38  ;;  %v3120_v53 = vld [vmem:[#allocation2 + $0x39] sm:$0xff]  ;;  %v3122_v54 = vld [vmem:[#allocation2 + $0x61] sm:$0xff]  ;;  %488 = vst.msk [vmem:[#allocation2 + $0xf9] sm:$0xff] %vm412_vm0, %v399_v43  ;;  %v409_v11 = vmax.f32 %v377_v1, 0.0 }
  0x2c   : > { %489 = vst.msk [vmem:[#allocation2 + $0x109] sm:$0xff] %vm412_vm0, %v400_v44  ;;  %490 = vst.msk [vmem:[#allocation2 + $0x111] sm:$0xff] %vm412_vm0, %v401_v45  ;;  %v3147_v6 = vld [vmem:[#allocation2 + $0x51] sm:$0xff]  ;;  %v3169_v2 = vld [vmem:[#allocation2 + $0x69] sm:$0xff] }
  0x2d   : > { %635 = vrot.lane.b32.xlu1 %v3090_v29, %s2862_s8  ;;  %535 = vst.msk [vmem:[#allocation3 + $0x10] sm:$0xff] %vm412_vm0, %v3116_v51  ;;  %536 = vst.msk [vmem:[#allocation3 + $0x18] sm:$0xff] %vm412_vm0, %v3118_v52  ;;  %v3149_v7 = vld [vmem:[#allocation2 + $0x79] sm:$0xff]  ;;  %v3153_v12 = vld [vmem:[#allocation2 + $0x30] sm:$0xff] }
  0x2e   : > { %641 = vrot.lane.b32.xlu0 %v3092_v30, %s2862_s8  ;;  %491 = vst.msk [vmem:[#allocation2 + $0x121] sm:$0xff] %vm412_vm0, %v402_v55  ;;  %492 = vst.msk [vmem:[#allocation2 + $0x129] sm:$0xff] %vm412_vm0, %v403_v59  ;;  %v3155_v13 = vld [vmem:[#allocation2 + $0x38] sm:$0xff]  ;;  %v3177_v15 = vld [vmem:[#allocation2 + $0x48] sm:$0xff] }
  0x2f   : > { %493 = vst.msk [vmem:[#allocation2 + $0x139] sm:$0xff] %vm412_vm0, %v404_v4  ;;  %494 = vst.msk [vmem:[#allocation2 + $0x141] sm:$0xff] %vm412_vm0, %v405_v5  ;;  %v3171_v14 = vld [vmem:[#allocation2 + $0x91] sm:$0xff]  ;;  %v3181_v17 = vld [vmem:[#allocation2 + $0x81] sm:$0xff] }
  0x30   : > { %495 = vst.msk [vmem:[#allocation2 + $0x151] sm:$0xff] %vm412_vm0, %v406_v8  ;;  %496 = vst.msk [vmem:[#allocation2 + $0x159] sm:$0xff] %vm412_vm0, %v407_v9  ;;  %v3179_v16 = vld [vmem:[#allocation2 + $0x50] sm:$0xff]  ;;  %v3189_v21 = vld [vmem:[#allocation2 + $0x99] sm:$0xff] }
  0x31   : > { %639 = vrot.lane.b32.xlu1 %v3120_v53, %s2862_s8  ;;  %497 = vst.msk [vmem:[#allocation2 + $0x169] sm:$0xff] %vm412_vm0, %v408_v10  ;;  %537 = vst.msk [vmem:[#allocation3 + $0x20] sm:$0xff] %vm412_vm0, %v3153_v12  ;;  %v579_v20 = vld [vmem:[#allocation2 + $0xa9] sm:$0xff]  ;;  %v581_v22 = vld [vmem:[#allocation2 + $0xc1] sm:$0xff] }
  0x32   : > { %645 = vrot.lane.b32.xlu0 %v3122_v54, %s2862_s8  ;;  %538 = vst.msk [vmem:[#allocation3 + $0x28] sm:$0xff] %vm412_vm0, %v3155_v13  ;;  %498 = vst.msk [vmem:[#allocation2 + $0x171] sm:$0xff] %vm412_vm0, %v409_v11  ;;  %v3192_v23 = vld [vmem:[#allocation2 + $0x60] sm:$0xff]  ;;  %v3194_v24 = vld [vmem:[#allocation2 + $0x68] sm:$0xff] }
  0x33   : > { %539 = vst.msk [vmem:[#allocation3 + $0x30] sm:$0xff] %vm412_vm0, %v3177_v15  ;;  %540 = vst.msk [vmem:[#allocation3 + $0x38] sm:$0xff] %vm412_vm0, %v3179_v16  ;;  %v3196_v25 = vld [vmem:[#allocation2 + $0x78] sm:$0xff]  ;;  %v3204_v26 = vld [vmem:[#allocation2 + $0x80] sm:$0xff] }
  0x34   : > { %541 = vst.msk [vmem:[#allocation3 + $0x40] sm:$0xff] %vm412_vm0, %v3192_v23  ;;  %542 = vst.msk [vmem:[#allocation3 + $0x48] sm:$0xff] %vm412_vm0, %v3194_v24  ;;  %v3206_v27 = vld [vmem:[#allocation2 + $0x90] sm:$0xff]  ;;  %v3208_v28 = vld [vmem:[#allocation2 + $0x98] sm:$0xff] }
  0x35   : > { %643 = vrot.lane.b32.xlu1 %v3147_v6, %s2862_s8  ;;  %543 = vst.msk [vmem:[#allocation3 + $0x50] sm:$0xff] %vm412_vm0, %v3196_v25  ;;  %v580_v31 = vld [vmem:[#allocation2 + $0xb1] sm:$0xff]  ;;  %544 = vst.msk [vmem:[#allocation3 + $0x58] sm:$0xff] %vm412_vm0, %v3204_v26  ;;  %v3216_v32 = vld [vmem:[#allocation2 + $0xa8] sm:$0xff] }
  0x36   : > { %649 = vrot.lane.b32.xlu0 %v3149_v7, %s2862_s8  ;;  %545 = vst.msk [vmem:[#allocation3 + $0x60] sm:$0xff] %vm412_vm0, %v3206_v27  ;;  %546 = vst.msk [vmem:[#allocation3 + $0x68] sm:$0xff] %vm412_vm0, %v3208_v28  ;;  %v3218_v33 = vld [vmem:[#allocation2 + $0xb0] sm:$0xff]  ;;  %v3220_v34 = vld [vmem:[#allocation2 + $0xc0] sm:$0xff] }
  0x37   : > { %547 = vst.msk [vmem:[#allocation3 + $0x70] sm:$0xff] %vm412_vm0, %v3216_v32  ;;  %548 = vst.msk [vmem:[#allocation3 + $0x78] sm:$0xff] %vm412_vm0, %v3218_v33  ;;  %v3231_v35 = vld [vmem:[#allocation2 + $0xc8] sm:$0xff]  ;;  %v3233_v36 = vld [vmem:[#allocation2 + $0xd8] sm:$0xff] }
  0x38   : > { %549 = vst.msk [vmem:[#allocation3 + $0x80] sm:$0xff] %vm412_vm0, %v3220_v34  ;;  %v3235_v37 = vld [vmem:[#allocation2 + $0xe0] sm:$0xff]  ;;  %550 = vst.msk [vmem:[#allocation3 + $0x88] sm:$0xff] %vm412_vm0, %v3231_v35  ;;  %v3243_v39 = vld [vmem:[#allocation2 + $0xf0] sm:$0xff] }
  0x39   : > { %647 = vrot.lane.b32.xlu1 %v3169_v2, %s2862_s8  ;;  %v583_v38 = vld [vmem:[#allocation2 + $0xd9] sm:$0xff]  ;;  %551 = vst.msk [vmem:[#allocation3 + $0x90] sm:$0xff] %vm412_vm0, %v3233_v36  ;;  %552 = vst.msk [vmem:[#allocation3 + $0x98] sm:$0xff] %vm412_vm0, %v3235_v37  ;;  %v3253_v41 = vld [vmem:[#allocation2 + $0x108] sm:$0xff] }
  0x3a   : > { %653 = vrot.lane.b32.xlu0 %v3171_v14, %s2862_s8  ;;  %v3245_v40 = vld [vmem:[#allocation2 + $0xf8] sm:$0xff]  ;;  %553 = vst.msk [vmem:[#allocation3 + $0xa0] sm:$0xff] %vm412_vm0, %v3243_v39  ;;  %v3255_v42 = vld [vmem:[#allocation2 + $0x110] sm:$0xff]  ;;  %555 = vst.msk [vmem:[#allocation3 + $0xb0] sm:$0xff] %vm412_vm0, %v3253_v41 }
  0x3b   : > { %554 = vst.msk [vmem:[#allocation3 + $0xa8] sm:$0xff] %vm412_vm0, %v3245_v40  ;;  %v582_v43 = vld [vmem:[#allocation2 + $0xc9] sm:$0xff]  ;;  %v585_v44 = vld [vmem:[#allocation2 + $0xf1] sm:$0xff]  ;;  %556 = vst.msk [vmem:[#allocation3 + $0xb8] sm:$0xff] %vm412_vm0, %v3255_v42 }
  0x3c   : > { %v3263_v45 = vld [vmem:[#allocation2 + $0x120] sm:$0xff]  ;;  %v3265_v46 = vld [vmem:[#allocation2 + $0x128] sm:$0xff]  ;;  %v527_v49 = vld [vmem:[#allocation2 + $0x138] sm:$0xff] }
  0x3d   : > { %651 = vrot.lane.b32.xlu1 %v3181_v17, %s2862_s8  ;;  %v584_v47 = vld [vmem:[#allocation2 + $0xe1] sm:$0xff]  ;;  %v587_v48 = vld [vmem:[#allocation2 + $0x109] sm:$0xff]  ;;  %557 = vst.msk [vmem:[#allocation3 + $0xc0] sm:$0xff] %vm412_vm0, %v3263_v45  ;;  %558 = vst.msk [vmem:[#allocation3 + $0xc8] sm:$0xff] %vm412_vm0, %v3265_v46 }
  0x3e   : > { %657 = vrot.lane.b32.xlu0 %v579_v20, %s2862_s8  ;;  %v528_v50 = vld [vmem:[#allocation2 + $0x140] sm:$0xff]  ;;  %559 = vst.msk [vmem:[#allocation3 + $0xd0] sm:$0xff] %vm412_vm0, %v527_v49  ;;  %v529_v57 = vld [vmem:[#allocation2 + $0x150] sm:$0xff]  ;;  %v530_v58 = vld [vmem:[#allocation2 + $0x158] sm:$0xff] }
  0x3f   : > { %v586_v55 = vld [vmem:[#allocation2 + $0xf9] sm:$0xff]  ;;  %v589_v56 = vld [vmem:[#allocation2 + $0x121] sm:$0xff]  ;;  %560 = vst.msk [vmem:[#allocation3 + $0xd8] sm:$0xff] %vm412_vm0, %v528_v50  ;;  %v588_v59 = vld [vmem:[#allocation2 + $0x111] sm:$0xff] }
  0x40   : > { %v591_v60 = vld [vmem:[#allocation2 + $0x139] sm:$0xff]  ;;  %561 = vst.msk [vmem:[#allocation3 + $0xe0] sm:$0xff] %vm412_vm0, %v529_v57  ;;  %562 = vst.msk [vmem:[#allocation3 + $0xe8] sm:$0xff] %vm412_vm0, %v530_v58  ;;  %v531_v61 = vld [vmem:[#allocation2 + $0x168] sm:$0xff] }
  0x41   : > { %655 = vrot.lane.b32.xlu1 %v3189_v21, %s2862_s8  ;;  %v532_v62 = vld [vmem:[#allocation2 + $0x170] sm:$0xff]  ;;  %563 = vst.msk [vmem:[#allocation3 + $0xf0] sm:$0xff] %vm412_vm0, %v531_v61  ;;  %v592_v3 = vld [vmem:[#allocation2 + $0x141] sm:$0xff]  ;;  %v594_v5 = vld [vmem:[#allocation2 + $0x159] sm:$0xff] }
  0x42   : > { %661 = vrot.lane.b32.xlu0 %v581_v22, %s2862_s8  ;;  %v590_v63 = vld [vmem:[#allocation2 + $0x129] sm:$0xff]  ;;  %v593_v0 = vld [vmem:[#allocation2 + $0x151] sm:$0xff]  ;;  %564 = vst.msk [vmem:[#allocation3 + $0xf8] sm:$0xff] %vm412_vm0, %v532_v62  ;;  %v3289_v9 = vld [vmem:[#allocation2 + $0x1a] sm:$0xff] }
  0x43   : > { %v595_v4 = vld [vmem:[#allocation2 + $0x169] sm:$0xff]  ;;  %v596_v8 = vld [vmem:[#allocation2 + $0x171] sm:$0xff]  ;;  %v776_v58 = vld [vmem:[#allocation2 + $0xda] sm:$0xff] }
  0x44   : > { %v758_v1 = vld [vmem:[#allocation2 + $0x2] sm:$0xff]  ;;  %v759_v10 = vld [vmem:[#allocation2 + $0xa] sm:$0xff]  ;;  %v3294_v11 = vld [vmem:[#allocation2 + $0x32] sm:$0xff] }
  0x45   : > { %659 = vrot.lane.b32.xlu1 %v580_v31, %s2862_s8  ;;  %v3299_v20 = vld [vmem:[#allocation2 + $0x22] sm:$0xff]  ;;  %v3301_v22 = vld [vmem:[#allocation2 + $0x4a] sm:$0xff]  ;;  %v3307_v31 = vld [vmem:[#allocation2 + $0x3a] sm:$0xff] }
  0x46   : > { %665 = vrot.lane.b32.xlu0 %v583_v38, %s2862_s8  ;;  %v3309_v38 = vld [vmem:[#allocation2 + $0x62] sm:$0xff]  ;;  %v3333_v50 = vld [vmem:[#allocation2 + $0xaa] sm:$0xff]  ;;  %v3347_v57 = vld [vmem:[#allocation2 + $0xb2] sm:$0xff] }
  0x47   : > { %v3331_v49 = vld [vmem:[#allocation2 + $0x82] sm:$0xff]  ;;  %v780_v62 = vld [vmem:[#allocation2 + $0x10a] sm:$0xff] }
  0x48   : > { %v777_v61 = vld [vmem:[#allocation2 + $0xe2] sm:$0xff] }
  0x49   : > { %663 = vrot.lane.b32.xlu1 %v582_v43, %s2862_s8  ;;  %v3315_v43 = vld [vmem:[#allocation2 + $0x52] sm:$0xff] }
  0x4a   : > { %669 = vrot.lane.b32.xlu0 %v585_v44, %s2862_s8  ;;  %v3317_v44 = vld [vmem:[#allocation2 + $0x7a] sm:$0xff] }
  0x4d   : > { %667 = vrot.lane.b32.xlu1 %v584_v47, %s2862_s8  ;;  %v3323_v47 = vld [vmem:[#allocation2 + $0x6a] sm:$0xff] }
  0x4e   : > { %673 = vrot.lane.b32.xlu0 %v587_v48, %s2862_s8  ;;  %v3325_v48 = vld [vmem:[#allocation2 + $0x92] sm:$0xff] }
  0x51   : > { %671 = vrot.lane.b32.xlu1 %v586_v55, %s2862_s8  ;;  %v3339_v55 = vld [vmem:[#allocation2 + $0x9a] sm:$0xff] }
  0x52   : > { %677 = vrot.lane.b32.xlu0 %v589_v56, %s2862_s8  ;;  %v3341_v56 = vld [vmem:[#allocation2 + $0xc2] sm:$0xff] }
  0x55   : > { %675 = vrot.lane.b32.xlu1 %v588_v59, %s2862_s8  ;;  %v3352_v59 = vld [vmem:[#allocation2 + $0xca] sm:$0xff] }
  0x56   : > { %681 = vrot.lane.b32.xlu0 %v591_v60, %s2862_s8  ;;  %v778_v60 = vld [vmem:[#allocation2 + $0xf2] sm:$0xff] }
  0x59   : > { %679 = vrot.lane.b32.xlu1 %v590_v63, %s2862_s8  ;;  %v779_v63 = vld [vmem:[#allocation2 + $0xfa] sm:$0xff] }
  0x5a   : > { %685 = vrot.lane.b32.xlu0 %v593_v0, %s2862_s8  ;;  %v782_v0 = vld [vmem:[#allocation2 + $0x122] sm:$0xff] }
  0x5d   : > { %683 = vrot.lane.b32.xlu1 %v592_v3, %s2862_s8 }
  0x5e   : > { %689 = vrot.lane.b32.xlu0 %v595_v4, %s2862_s8  ;;  %v781_v4 = vld [vmem:[#allocation2 + $0x112] sm:$0xff] }
  0x61   : > { %687 = vrot.lane.b32.xlu1 %v594_v5, %s2862_s8  ;;  %v784_v5 = vld [vmem:[#allocation2 + $0x13a] sm:$0xff] }
  0x62   : > { %822 = vrot.lane.b32.xlu0 %v758_v1, %s2863_s9 }
  0x65   : > { %691 = vrot.lane.b32.xlu1 %v596_v8, %s2862_s8  ;;  %v783_v8 = vld [vmem:[#allocation2 + $0x12a] sm:$0xff] }
  0x66   : > { %826 = vrot.lane.b32.xlu0 %v3289_v9, %s2863_s9 }
  0x69   : > { %824 = vrot.lane.b32.xlu1 %v759_v10, %s2863_s9  ;;  %v786_v10 = vld [vmem:[#allocation2 + $0x152] sm:$0xff] }
  0x6a   : > { %830 = vrot.lane.b32.xlu0 %v3294_v11, %s2863_s9 }
  0x6d   : > { %828 = vrot.lane.b32.xlu1 %v3299_v20, %s2863_s9 }
  0x6e   : > { %834 = vrot.lane.b32.xlu0 %v3301_v22, %s2863_s9 }
  0x71   : > { %832 = vrot.lane.b32.xlu1 %v3307_v31, %s2863_s9 }
  0x72   : > { %838 = vrot.lane.b32.xlu0 %v3309_v38, %s2863_s9 }
  0x75   : > { %836 = vrot.lane.b32.xlu1 %v3315_v43, %s2863_s9 }
  0x76   : > { %842 = vrot.lane.b32.xlu0 %v3317_v44, %s2863_s9 }
  0x79   : > { %840 = vrot.lane.b32.xlu1 %v3323_v47, %s2863_s9 }
  0x7a   : > { %846 = vrot.lane.b32.xlu0 %v3325_v48, %s2863_s9 }
  0x7d   : > { %844 = vrot.lane.b32.xlu1 %v3331_v49, %s2863_s9 }
  0x7e   : > { %850 = vrot.lane.b32.xlu0 %v3333_v50, %s2863_s9 }
  0x80   : > { %v630_v3 = vpop.permute.xlu0 %629 }
  0x81   : > { %848 = vrot.lane.b32.xlu1 %v3339_v55, %s2863_s9  ;;  %726 = vst.msk [vmem:[#allocation3] sm:$0xff] %vm725_vm2, %v630_v3 }
  0x82   : > { %854 = vrot.lane.b32.xlu0 %v3341_v56, %s2863_s9 }
  0x85   : > { %852 = vrot.lane.b32.xlu1 %v3347_v57, %s2863_s9 }
  0x86   : > { %858 = vrot.lane.b32.xlu0 %v776_v58, %s2863_s9  ;;  %v785_v58 = vld [vmem:[#allocation2 + $0x142] sm:$0xff] }
  0x89   : > { %856 = vrot.lane.b32.xlu1 %v3352_v59, %s2863_s9 }
  0x8a   : > { %862 = vrot.lane.b32.xlu0 %v778_v60, %s2863_s9  ;;  %v788_v60 = vld [vmem:[#allocation2 + $0x16a] sm:$0xff] }
  0x8d   : > { %860 = vrot.lane.b32.xlu1 %v777_v61, %s2863_s9 }
  0x8e   : > { %866 = vrot.lane.b32.xlu0 %v780_v62, %s2863_s9 }
  0x91   : > { %864 = vrot.lane.b32.xlu1 %v779_v63, %s2863_s9  ;;  %v787_v63 = vld [vmem:[#allocation2 + $0x15a] sm:$0xff] }
  0x92   : > { %870 = vrot.lane.b32.xlu0 %v782_v0, %s2863_s9  ;;  %v632_v1 = vpop.permute.xlu0 %631 }
  0x93   : > { %727 = vst.msk [vmem:[#allocation3 + $0x8] sm:$0xff] %vm725_vm2, %v632_v1 }
  0x95   : > { %868 = vrot.lane.b32.xlu1 %v781_v4, %s2863_s9  ;;  %v789_v4 = vld [vmem:[#allocation2 + $0x172] sm:$0xff] }
  0x96   : > { %874 = vrot.lane.b32.xlu0 %v784_v5, %s2863_s9 }
  0x99   : > { %872 = vrot.lane.b32.xlu1 %v783_v8, %s2863_s9 }
  0x9a   : > { %878 = vrot.lane.b32.xlu0 %v786_v10, %s2863_s9 }
  0x9b   : > { %v634_v61 = vpop.permute.xlu1 %633 }
  0x9c   : > { %v638_v62 = vpop.permute.xlu0 %637  ;;  %728 = vst.msk [vmem:[#allocation3 + $0x10] sm:$0xff] %vm725_vm2, %v634_v61 }
  0x9d   : > { %730 = vst.msk [vmem:[#allocation3 + $0x20] sm:$0xff] %vm725_vm2, %v638_v62  ;;  %876 = vrot.lane.b32.xlu1 %v785_v58, %s2863_s9 }
  0x9e   : > { %882 = vrot.lane.b32.xlu0 %v788_v60, %s2863_s9 }
  0x9f   : > { %v636_v0 = vpop.permute.xlu1 %635 }
  0xa0   : > { %v642_v3 = vpop.permute.xlu0 %641  ;;  %729 = vst.msk [vmem:[#allocation3 + $0x18] sm:$0xff] %vm725_vm2, %v636_v0 }
  0xa1   : > { %732 = vst.msk [vmem:[#allocation3 + $0x30] sm:$0xff] %vm725_vm2, %v642_v3  ;;  %880 = vrot.lane.b32.xlu1 %v787_v63, %s2863_s9 }
  0xa2   : > { %1015 = vrot.lane.b32.xlu0 %v3116_v51, %s2864_s10 }
  0xa3   : > { %v640_v5 = vpop.permute.xlu1 %639 }
  0xa4   : > { %v646_v1 = vpop.permute.xlu0 %645  ;;  %731 = vst.msk [vmem:[#allocation3 + $0x28] sm:$0xff] %vm725_vm2, %v640_v5 }
  0xa5   : > { %734 = vst.msk [vmem:[#allocation3 + $0x40] sm:$0xff] %vm725_vm2, %v646_v1  ;;  %884 = vrot.lane.b32.xlu1 %v789_v4, %s2863_s9 }
  0xa6   : > { %1019 = vrot.lane.b32.xlu0 %v3153_v12, %s2864_s10 }
  0xa7   : > { %v644_v8 = vpop.permute.xlu1 %643 }
  0xa8   : > { %v650_v10 = vpop.permute.xlu0 %649  ;;  %733 = vst.msk [vmem:[#allocation3 + $0x38] sm:$0xff] %vm725_vm2, %v644_v8 }
  0xa9   : > { %736 = vst.msk [vmem:[#allocation3 + $0x50] sm:$0xff] %vm725_vm2, %v650_v10  ;;  %1017 = vrot.lane.b32.xlu1 %v3118_v52, %s2864_s10  ;;  %v2846_v10 = vld [vmem:[%s4099_s3] sm:$0xff]  }
  0xaa   : > { %1023 = vrot.lane.b32.xlu0 %v3177_v15, %s2864_s10  ;;  %2775 = vmatprep.subr.bf16.mxu0 %v2846_v10 }
  0xab   : > { %v648_v51 = vpop.permute.xlu1 %647  ;;  %2817 = vmatprep.subr.bf16.mxu1 %v2846_v10  ;;  %2776 = vmatpush3.bf16.msra.mxu0 %v2846_v10 }
  0xac   : > { %v654_v58 = vpop.permute.xlu0 %653  ;;  %735 = vst.msk [vmem:[#allocation3 + $0x48] sm:$0xff] %vm725_vm2, %v648_v51  ;;  %2822 = vmatpush3.bf16.msra.mxu1 %v2846_v10  ;;  %v2847_v51 = vld [vmem:[%s4099_s3 + $0x8] sm:$0xff]  }
  0xad   : > { %738 = vst.msk [vmem:[#allocation3 + $0x60] sm:$0xff] %vm725_vm2, %v654_v58  ;;  %1021 = vrot.lane.b32.xlu1 %v3155_v13, %s2864_s10  ;;  %2777 = vmatprep.subr.bf16.mxu0 %v2847_v51 }
  0xae   : > { %1027 = vrot.lane.b32.xlu0 %v3192_v23, %s2864_s10  ;;  %2818 = vmatprep.subr.bf16.mxu1 %v2847_v51 }
  0xaf   : > { %v652_v60 = vpop.permute.xlu1 %651  ;;  %2778 = vmatpush3.bf16.msra.mxu0 %v2847_v51 }
  0xb0   : > { %v658_v61 = vpop.permute.xlu0 %657  ;;  %737 = vst.msk [vmem:[#allocation3 + $0x58] sm:$0xff] %vm725_vm2, %v652_v60  ;;  %2823 = vmatpush3.bf16.msra.mxu1 %v2847_v51  ;;  %v2848_v60 = vld [vmem:[%s4099_s3 + $0x10] sm:$0xff]  }
  0xb1   : > { %740 = vst.msk [vmem:[#allocation3 + $0x70] sm:$0xff] %vm725_vm2, %v658_v61  ;;  %1025 = vrot.lane.b32.xlu1 %v3179_v16, %s2864_s10  ;;  %2779 = vmatprep.subr.bf16.mxu0 %v2848_v60  ;;  %v2849_v61 = vld [vmem:[%s4099_s3 + $0x18] sm:$0xff]  }
  0xb2   : > { %1031 = vrot.lane.b32.xlu0 %v3196_v25, %s2864_s10  ;;  %2819 = vmatprep.subr.bf16.mxu1 %v2848_v60 }
  0xb3   : > { %v656_v52 = vpop.permute.xlu1 %655  ;;  %2780 = vmatpush3.bf16.msra.mxu0 %v2848_v60 }
  0xb4   : > { %v662_v62 = vpop.permute.xlu0 %661  ;;  %739 = vst.msk [vmem:[#allocation3 + $0x68] sm:$0xff] %vm725_vm2, %v656_v52  ;;  %2824 = vmatpush3.bf16.msra.mxu1 %v2848_v60  ;;  %2781 = vmatprep.subr.bf16.mxu0 %v2849_v61 }
  0xb5   : > { %742 = vst.msk [vmem:[#allocation3 + $0x80] sm:$0xff] %vm725_vm2, %v662_v62  ;;  %1029 = vrot.lane.b32.xlu1 %v3194_v24, %s2864_s10  ;;  %2820 = vmatprep.subr.bf16.mxu1 %v2849_v61  ;;  %v2850_v62 = vld [vmem:[%s4099_s3 + $0x20] ss:$0 sps:$4 sm:$0xff]  }
  0xb6   : > { %1208 = vrot.lane.b32.xlu0 %v3070_v18, %s2865_s11 }
  0xb7   : > { %v660_v63 = vpop.permute.xlu1 %659  ;;  %2782 = vmatpush3.bf16.msra.mxu0 %v2849_v61 }
  0xb8   : > { %v666_v0 = vpop.permute.xlu0 %665  ;;  %741 = vst.msk [vmem:[#allocation3 + $0x78] sm:$0xff] %vm725_vm2, %v660_v63  ;;  %2825 = vmatpush3.bf16.msra.mxu1 %v2849_v61  ;;  %2827 = vmatprep.subr.msk.bf16.mxu0 %vm2243_vm4, %v2850_v62  ;;  %v1733_v61 = vld [vmem:[#allocation2 + $0x99] sm:$0xff] }
  0xb9   : > { %744 = vst.msk [vmem:[#allocation3 + $0x90] sm:$0xff] %vm725_vm2, %v666_v0  ;;  %1033 = vrot.lane.b32.xlu1 %v3204_v26, %s2864_s10  ;;  %2828 = vmatprep.subr.msk.bf16.mxu1 %vm2243_vm4, %v2850_v62 }
  0xba   : > { %1212 = vrot.lane.b32.xlu0 %v3072_v19, %s2865_s11 }
  0xbb   : > { %v664_v3 = vpop.permute.xlu1 %663 }
  0xbc   : > { %v670_v4 = vpop.permute.xlu0 %669  ;;  %743 = vst.msk [vmem:[#allocation3 + $0x88] sm:$0xff] %vm725_vm2, %v664_v3 }
  0xbd   : > { %746 = vst.msk [vmem:[#allocation3 + $0xa0] sm:$0xff] %vm725_vm2, %v670_v4  ;;  %1210 = vrot.lane.b32.xlu1 %v3090_v29, %s2865_s11 }
  0xbe   : > { %1401 = vrot.lane.b32.xlu0 %v3289_v9, %s2866_s12 }
  0xbf   : > { %v668_v18 = vpop.permute.xlu1 %667 }
  0xc0   : > { %v674_v5 = vpop.permute.xlu0 %673  ;;  %745 = vst.msk [vmem:[#allocation3 + $0x98] sm:$0xff] %vm725_vm2, %v668_v18 }
  0xc1   : > { %748 = vst.msk [vmem:[#allocation3 + $0xb0] sm:$0xff] %vm725_vm2, %v674_v5  ;;  %1214 = vrot.lane.b32.xlu1 %v3120_v53, %s2865_s11 }
  0xc2   : > { %1405 = vrot.lane.b32.xlu0 %v3294_v11, %s2866_s12 }
  0xc3   : > { %v672_v1 = vpop.permute.xlu1 %671 }
  0xc4   : > { %v678_v8 = vpop.permute.xlu0 %677  ;;  %747 = vst.msk [vmem:[#allocation3 + $0xa8] sm:$0xff] %vm725_vm2, %v672_v1 }
  0xc5   : > { %750 = vst.msk [vmem:[#allocation3 + $0xc0] sm:$0xff] %vm725_vm2, %v678_v8  ;;  %1403 = vrot.lane.b32.xlu1 %v3299_v20, %s2866_s12 }
  0xc6   : > { %1595 = vrot.lane.b32.xlu0 %v3153_v12, %s2867_s13 }
  0xc7   : > { %v676_v29 = vpop.permute.xlu1 %675 }
  0xc8   : > { %v682_v9 = vpop.permute.xlu0 %681  ;;  %749 = vst.msk [vmem:[#allocation3 + $0xb8] sm:$0xff] %vm725_vm2, %v676_v29 }
  0xc9   : > { %752 = vst.msk [vmem:[#allocation3 + $0xd0] sm:$0xff] %vm725_vm2, %v682_v9  ;;  %1407 = vrot.lane.b32.xlu1 %v3307_v31, %s2866_s12 }
  0xca   : > { %1599 = vrot.lane.b32.xlu0 %v3177_v15, %s2867_s13 }
  0xcb   : > { %v680_v20 = vpop.permute.xlu1 %679 }
  0xcc   : > { %v686_v12 = vpop.permute.xlu0 %685  ;;  %751 = vst.msk [vmem:[#allocation3 + $0xc8] sm:$0xff] %vm725_vm2, %v680_v20 }
  0xcd   : > { %754 = vst.msk [vmem:[#allocation3 + $0xe0] sm:$0xff] %vm725_vm2, %v686_v12  ;;  %1597 = vrot.lane.b32.xlu1 %v3155_v13, %s2867_s13 }
  0xce   : > { %1788 = vrot.lane.b32.xlu0 %v3072_v19, %s2868_s18 }
  0xcf   : > { %v684_v15 = vpop.permute.xlu1 %683 }
  0xd0   : > { %v690_v58 = vpop.permute.xlu0 %689  ;;  %753 = vst.msk [vmem:[#allocation3 + $0xd8] sm:$0xff] %vm725_vm2, %v684_v15 }
  0xd1   : > { %756 = vst.msk [vmem:[#allocation3 + $0xf0] sm:$0xff] %vm725_vm2, %v690_v58  ;;  %1601 = vrot.lane.b32.xlu1 %v3179_v16, %s2867_s13 }
  0xd2   : > { %1792 = vrot.lane.b32.xlu0 %v3092_v30, %s2868_s18 }
  0xd3   : > { %v688_v19 = vpop.permute.xlu1 %687 }
  0xd4   : > { %v823_v13 = vpop.permute.xlu0 %822  ;;  %755 = vst.msk [vmem:[#allocation3 + $0xe8] sm:$0xff] %vm725_vm2, %v688_v19 }
  0xd5   : > { %919 = vst.msk [vmem:[#allocation3] sm:$0xff] %vm918_vm3, %v823_v13  ;;  %1790 = vrot.lane.b32.xlu1 %v3120_v53, %s2868_s18  ;;  %v2245_v53 = vsel %vm2243_vm4, %v2850_v62, 0 }
  0xd6   : > { %1981 = vrot.lane.b32.xlu0 %v3294_v11, %s2869_s25  ;;  %2784 = vmatpush3.bf16.msra.mxu0 %v2245_v53 }
  0xd7   : > { %v692_v16 = vpop.permute.xlu1 %691  ;;  %2826 = vmatpush3.bf16.msra.mxu1 %v2245_v53 }
  0xd8   : > { %v827_v52 = vpop.permute.xlu0 %826  ;;  %757 = vst.msk [vmem:[#allocation3 + $0xf8] sm:$0xff] %vm725_vm2, %v692_v16 }
  0xd9   : > { %921 = vst.msk [vmem:[#allocation3 + $0x10] sm:$0xff] %vm918_vm3, %v827_v52  ;;  %1794 = vrot.lane.b32.xlu1 %v3147_v6, %s2868_s18 }
  0xda   : > { %1985 = vrot.lane.b32.xlu0 %v3301_v22, %s2869_s25 }
  0xdb   : > { %v825_v11 = vpop.permute.xlu1 %824 }
  0xdc   : > { %v831_v63 = vpop.permute.xlu0 %830  ;;  %920 = vst.msk [vmem:[#allocation3 + $0x8] sm:$0xff] %vm918_vm3, %v825_v11 }
  0xdd   : > { %923 = vst.msk [vmem:[#allocation3 + $0x20] sm:$0xff] %vm918_vm3, %v831_v63  ;;  %1983 = vrot.lane.b32.xlu1 %v3307_v31, %s2869_s25 }
  0xde   : > { %1216 = vrot.lane.b32.xlu0 %v3092_v30, %s2865_s11 }
  0xdf   : > { %v829_v0 = vpop.permute.xlu1 %828 }
  0xe0   : > { %v835_v3 = vpop.permute.xlu0 %834  ;;  %922 = vst.msk [vmem:[#allocation3 + $0x18] sm:$0xff] %vm918_vm3, %v829_v0 }
  0xe1   : > { %925 = vst.msk [vmem:[#allocation3 + $0x30] sm:$0xff] %vm918_vm3, %v835_v3  ;;  %1987 = vrot.lane.b32.xlu1 %v3315_v43, %s2869_s25 }
  0xe2   : > { %1220 = vrot.lane.b32.xlu0 %v3122_v54, %s2865_s11 }
  0xe3   : > { %v833_v4 = vpop.permute.xlu1 %832 }
  0xe4   : > { %v839_v18 = vpop.permute.xlu0 %838  ;;  %924 = vst.msk [vmem:[#allocation3 + $0x28] sm:$0xff] %vm918_vm3, %v833_v4 }
  0xe5   : > { %927 = vst.msk [vmem:[#allocation3 + $0x40] sm:$0xff] %vm918_vm3, %v839_v18  ;;  %1218 = vrot.lane.b32.xlu1 %v3147_v6, %s2865_s11 }
  0xe6   : > { %1409 = vrot.lane.b32.xlu0 %v3301_v22, %s2866_s12 }
  0xe7   : > { %v837_v30 = vpop.permute.xlu1 %836 }
  0xe8   : > { %v843_v31 = vpop.permute.xlu0 %842  ;;  %926 = vst.msk [vmem:[#allocation3 + $0x38] sm:$0xff] %vm918_vm3, %v837_v30 }
  0xe9   : > { %929 = vst.msk [vmem:[#allocation3 + $0x50] sm:$0xff] %vm918_vm3, %v843_v31  ;;  %1222 = vrot.lane.b32.xlu1 %v3169_v2, %s2865_s11 }
  0xea   : > { %1413 = vrot.lane.b32.xlu0 %v3309_v38, %s2866_s12 }
  0xeb   : > { %v841_v5 = vpop.permute.xlu1 %840 }
  0xec   : > { %v847_v1 = vpop.permute.xlu0 %846  ;;  %928 = vst.msk [vmem:[#allocation3 + $0x48] sm:$0xff] %vm918_vm3, %v841_v5 }
  0xed   : > { %931 = vst.msk [vmem:[#allocation3 + $0x60] sm:$0xff] %vm918_vm3, %v847_v1  ;;  %1411 = vrot.lane.b32.xlu1 %v3315_v43, %s2866_s12 }
  0xee   : > { %1603 = vrot.lane.b32.xlu0 %v3192_v23, %s2867_s13 }
  0xef   : > { %v845_v6 = vpop.permute.xlu1 %844 }
  0xf0   : > { %v851_v22 = vpop.permute.xlu0 %850  ;;  %930 = vst.msk [vmem:[#allocation3 + $0x58] sm:$0xff] %vm918_vm3, %v845_v6 }
  0xf1   : > { %933 = vst.msk [vmem:[#allocation3 + $0x70] sm:$0xff] %vm918_vm3, %v851_v22  ;;  %1415 = vrot.lane.b32.xlu1 %v3323_v47, %s2866_s12 }
  0xf2   : > { %1607 = vrot.lane.b32.xlu0 %v3196_v25, %s2867_s13 }
  0xf3   : > { %v849_v8 = vpop.permute.xlu1 %848 }
  0xf4   : > { %v855_v29 = vpop.permute.xlu0 %854  ;;  %932 = vst.msk [vmem:[#allocation3 + $0x68] sm:$0xff] %vm918_vm3, %v849_v8 }
  0xf5   : > { %935 = vst.msk [vmem:[#allocation3 + $0x80] sm:$0xff] %vm918_vm3, %v855_v29  ;;  %1605 = vrot.lane.b32.xlu1 %v3194_v24, %s2867_s13 }
  0xf6   : > { %1796 = vrot.lane.b32.xlu0 %v3122_v54, %s2868_s18 }
  0xf7   : > { %v853_v23 = vpop.permute.xlu1 %852 }
  0xf8   : > { %v859_v43 = vpop.permute.xlu0 %858  ;;  %934 = vst.msk [vmem:[#allocation3 + $0x78] sm:$0xff] %vm918_vm3, %v853_v23 }
  0xf9   : > { %937 = vst.msk [vmem:[#allocation3 + $0x90] sm:$0xff] %vm918_vm3, %v859_v43  ;;  %1609 = vrot.lane.b32.xlu1 %v3204_v26, %s2867_s13  ;;  %v1929_v43 = vld [vmem:[#allocation2 + $0xc2] sm:$0xff] }
  0xfa   : > { %1800 = vrot.lane.b32.xlu0 %v3149_v7, %s2868_s18 }
  0xfb   : > { %v857_v25 = vpop.permute.xlu1 %856 }
  0xfc   : > { %v863_v9 = vpop.permute.xlu0 %862  ;;  %936 = vst.msk [vmem:[#allocation3 + $0x88] sm:$0xff] %vm918_vm3, %v857_v25 }
  0xfd   : > { %939 = vst.msk [vmem:[#allocation3 + $0xa0] sm:$0xff] %vm918_vm3, %v863_v9  ;;  %1798 = vrot.lane.b32.xlu1 %v3169_v2, %s2868_s18 }
  0xfe   : > { %1989 = vrot.lane.b32.xlu0 %v3309_v38, %s2869_s25 }
  0xff   : > { %v861_v54 = vpop.permute.xlu1 %860 }
 0x100   : > { %v867_v24 = vpop.permute.xlu0 %866  ;;  %938 = vst.msk [vmem:[#allocation3 + $0x98] sm:$0xff] %vm918_vm3, %v861_v54 }
 0x101   : > { %941 = vst.msk [vmem:[#allocation3 + $0xb0] sm:$0xff] %vm918_vm3, %v867_v24  ;;  %1802 = vrot.lane.b32.xlu1 %v3181_v17, %s2868_s18 }
 0x102   : > { %1993 = vrot.lane.b32.xlu0 %v3317_v44, %s2869_s25 }
 0x103   : > { %v865_v26 = vpop.permute.xlu1 %864 }
 0x104   : > { %v871_v10 = vpop.permute.xlu0 %870  ;;  %940 = vst.msk [vmem:[#allocation3 + $0xa8] sm:$0xff] %vm918_vm3, %v865_v26  ;;  %v1739_v26 = vld [vmem:[#allocation2 + $0xe1] sm:$0xff] }
 0x105   : > { %943 = vst.msk [vmem:[#allocation3 + $0xc0] sm:$0xff] %vm918_vm3, %v871_v10  ;;  %1991 = vrot.lane.b32.xlu1 %v3323_v47, %s2869_s25  ;;  %v1931_v10 = vld [vmem:[#allocation2 + $0xda] sm:$0xff] }
 0x106   : > { %1035 = vrot.lane.b32.xlu0 %v3206_v27, %s2864_s10 }
 0x107   : > { %v869_v2 = vpop.permute.xlu1 %868 }
 0x108   : > { %v875_v38 = vpop.permute.xlu0 %874  ;;  %942 = vst.msk [vmem:[#allocation3 + $0xb8] sm:$0xff] %vm918_vm3, %v869_v2 }
 0x109   : > { %945 = vst.msk [vmem:[#allocation3 + $0xd0] sm:$0xff] %vm918_vm3, %v875_v38  ;;  %1995 = vrot.lane.b32.xlu1 %v3331_v49, %s2869_s25 }
 0x10a   : > { %1224 = vrot.lane.b32.xlu0 %v3149_v7, %s2865_s11 }
 0x10b   : > { %v873_v20 = vpop.permute.xlu1 %872 }
 0x10c   : > { %v879_v12 = vpop.permute.xlu0 %878  ;;  %944 = vst.msk [vmem:[#allocation3 + $0xc8] sm:$0xff] %vm918_vm3, %v873_v20 }
 0x10d   : > { %947 = vst.msk [vmem:[#allocation3 + $0xe0] sm:$0xff] %vm918_vm3, %v879_v12  ;;  %1037 = vrot.lane.b32.xlu1 %v3208_v28, %s2864_s10 }
 0x10e   : > { %1228 = vrot.lane.b32.xlu0 %v3171_v14, %s2865_s11 }
 0x10f   : > { %v877_v47 = vpop.permute.xlu1 %876 }
 0x110   : > { %v883_v51 = vpop.permute.xlu0 %882  ;;  %946 = vst.msk [vmem:[#allocation3 + $0xd8] sm:$0xff] %vm918_vm3, %v877_v47  ;;  %v1930_v47 = vld [vmem:[#allocation2 + $0xca] sm:$0xff] }
 0x111   : > { %949 = vst.msk [vmem:[#allocation3 + $0xf0] sm:$0xff] %vm918_vm3, %v883_v51  ;;  %1226 = vrot.lane.b32.xlu1 %v3181_v17, %s2865_s11 }
 0x112   : > { %1417 = vrot.lane.b32.xlu0 %v3317_v44, %s2866_s12 }
 0x113   : > { %v881_v7 = vpop.permute.xlu1 %880 }
 0x114   : > { %v1016_v15 = vpop.permute.xlu0 %1015  ;;  %948 = vst.msk [vmem:[#allocation3 + $0xe8] sm:$0xff] %vm918_vm3, %v881_v7 }
 0x115   : > { %1112 = vst.msk [vmem:[#allocation3] sm:$0xff] %vm1111_vm5, %v1016_v15  ;;  %1230 = vrot.lane.b32.xlu1 %v3189_v21, %s2865_s11  ;;  %v1732_v21 = vld [vmem:[#allocation2 + $0x91] sm:$0xff]  ;;  %v1932_v15 = vld [vmem:[#allocation2 + $0xe2] sm:$0xff] }
 0x116   : > { %1421 = vrot.lane.b32.xlu0 %v3325_v48, %s2866_s12 }
 0x117   : > { %v885_v14 = vpop.permute.xlu1 %884 }
 0x118   : > { %v1020_v58 = vpop.permute.xlu0 %1019  ;;  %950 = vst.msk [vmem:[#allocation3 + $0xf8] sm:$0xff] %vm918_vm3, %v885_v14 }
 0x119   : > { %1114 = vst.msk [vmem:[#allocation3 + $0x10] sm:$0xff] %vm1111_vm5, %v1020_v58  ;;  %1419 = vrot.lane.b32.xlu1 %v3331_v49, %s2866_s12 }
 0x11a   : > { %1611 = vrot.lane.b32.xlu0 %v3206_v27, %s2867_s13  ;;  %v1734_v27 = vld [vmem:[#allocation2 + $0xa9] sm:$0xff] }
 0x11b   : > { %v1018_v17 = vpop.permute.xlu1 %1017 }
 0x11c   : > { %v1024_v44 = vpop.permute.xlu0 %1023  ;;  %1113 = vst.msk [vmem:[#allocation3 + $0x8] sm:$0xff] %vm1111_vm5, %v1018_v17 }
 0x11d   : > { %1116 = vst.msk [vmem:[#allocation3 + $0x20] sm:$0xff] %vm1111_vm5, %v1024_v44  ;;  %1423 = vrot.lane.b32.xlu1 %v3339_v55, %s2866_s12 }
 0x11e   : > { %1615 = vrot.lane.b32.xlu0 %v3216_v32, %s2867_s13 }
 0x11f   : > { %v1022_v60 = vpop.permute.xlu1 %1021 }
 0x120   : > { %v1028_v19 = vpop.permute.xlu0 %1027  ;;  %1115 = vst.msk [vmem:[#allocation3 + $0x18] sm:$0xff] %vm1111_vm5, %v1022_v60 }
 0x121   : > { %1118 = vst.msk [vmem:[#allocation3 + $0x30] sm:$0xff] %vm1111_vm5, %v1028_v19  ;;  %1613 = vrot.lane.b32.xlu1 %v3208_v28, %s2867_s13  ;;  %v1735_v28 = vld [vmem:[#allocation2 + $0xb1] sm:$0xff] }
 0x122   : > { %1804 = vrot.lane.b32.xlu0 %v1732_v21, %s2868_s18  ;;  %v300_v19 = vld [vmem:[%s2990_s29 + $0xf0] sm:$0xff] }
 0x123   : > { %v1026_v49 = vpop.permute.xlu1 %1025 }
 0x124   : > { %v1032_v13 = vpop.permute.xlu0 %1031  ;;  %1117 = vst.msk [vmem:[#allocation3 + $0x28] sm:$0xff] %vm1111_vm5, %v1026_v49 }
 0x125   : > { %1120 = vst.msk [vmem:[#allocation3 + $0x40] sm:$0xff] %vm1111_vm5, %v1032_v13  ;;  %1617 = vrot.lane.b32.xlu1 %v3218_v33, %s2867_s13 }
 0x126   : > { %1808 = vrot.lane.b32.xlu0 %v1734_v27, %s2868_s18 }
 0x127   : > { %v1030_v16 = vpop.permute.xlu1 %1029 }
 0x128   : > { %v1209_v52 = vpop.permute.xlu0 %1208  ;;  %1119 = vst.msk [vmem:[#allocation3 + $0x38] sm:$0xff] %vm1111_vm5, %v1030_v16 }
 0x129   : > { %1305 = vst.msk [vmem:[#allocation3] sm:$0xff] %vm1304_vm6, %v1209_v52  ;;  %1806 = vrot.lane.b32.xlu1 %v1733_v61, %s2868_s18  ;;  %v2852_v52 = vld [vmem:[%s4098_s2] ss:$0 sm:$0xff] }
 0x12a   : > { %1997 = vrot.lane.b32.xlu0 %v3325_v48, %s2869_s25 }
 0x12b   : > { %v1034_v62 = vpop.permute.xlu1 %1033 }
 0x12c   : > { %v1213_v53 = vpop.permute.xlu0 %1212  ;;  %1121 = vst.msk [vmem:[#allocation3 + $0x48] sm:$0xff] %vm1111_vm5, %v1034_v62 }
 0x12d   : > { %1307 = vst.msk [vmem:[#allocation3 + $0x10] sm:$0xff] %vm1304_vm6, %v1213_v53  ;;  %1810 = vrot.lane.b32.xlu1 %v1735_v28, %s2868_s18  ;;  %v1163_v53 = vld [vmem:[#allocation2 + $0xf9] sm:$0xff] }
 0x12e   : > { %2001 = vrot.lane.b32.xlu0 %v3333_v50, %s2869_s25 }
 0x12f   : > { %v1211_v11 = vpop.permute.xlu1 %1210 }
 0x130   : > { %v1402_v63 = vpop.permute.xlu0 %1401  ;;  %1306 = vst.msk [vmem:[#allocation3 + $0x8] sm:$0xff] %vm1304_vm6, %v1211_v11  ;;  %v1355_v11 = vld [vmem:[#allocation2 + $0xf2] sm:$0xff] }
 0x131   : > { %1498 = vst.msk [vmem:[#allocation3] sm:$0xff] %vm1497_vm7, %v1402_v63  ;;  %1999 = vrot.lane.b32.xlu1 %v3339_v55, %s2869_s25 }
 0x132   : > { %1039 = vrot.lane.b32.xlu0 %v3216_v32, %s2864_s10  ;;  %v1158_v32 = vld [vmem:[#allocation2 + $0xc1] sm:$0xff] }
 0x133   : > { %v1215_v48 = vpop.permute.xlu1 %1214 }
 0x134   : > { %v1406_v0 = vpop.permute.xlu0 %1405  ;;  %1308 = vst.msk [vmem:[#allocation3 + $0x18] sm:$0xff] %vm1304_vm6, %v1215_v48 }
 0x135   : > { %1500 = vst.msk [vmem:[#allocation3 + $0x10] sm:$0xff] %vm1497_vm7, %v1406_v0  ;;  %2003 = vrot.lane.b32.xlu1 %v3347_v57, %s2869_s25 }
 0x136   : > { %1043 = vrot.lane.b32.xlu0 %v3220_v34, %s2864_s10 }
 0x137   : > { %v1404_v3 = vpop.permute.xlu1 %1403 }
 0x138   : > { %v1596_v4 = vpop.permute.xlu0 %1595  ;;  %1499 = vst.msk [vmem:[#allocation3 + $0x8] sm:$0xff] %vm1497_vm7, %v1404_v3 }
 0x139   : > { %1692 = vst.msk [vmem:[#allocation3] sm:$0xff] %vm1691_vm8, %v1596_v4  ;;  %1041 = vrot.lane.b32.xlu1 %v3218_v33, %s2864_s10  ;;  %v1159_v33 = vld [vmem:[#allocation2 + $0xc9] sm:$0xff] }
 0x13a   : > { %1232 = vrot.lane.b32.xlu0 %v1734_v27, %s2865_s11  ;;  %v301_v27 = vld [vmem:[%s2990_s29 + $0xf8] sm:$0xff] }
 0x13b   : > { %v1408_v55 = vpop.permute.xlu1 %1407 }
 0x13c   : > { %v1600_v18 = vpop.permute.xlu0 %1599  ;;  %1501 = vst.msk [vmem:[#allocation3 + $0x18] sm:$0xff] %vm1497_vm7, %v1408_v55  ;;  %v1356_v55 = vld [vmem:[#allocation2 + $0xfa] sm:$0xff] }
 0x13d   : > { %1694 = vst.msk [vmem:[#allocation3 + $0x10] sm:$0xff] %vm1691_vm8, %v1600_v18  ;;  %1045 = vrot.lane.b32.xlu1 %v3231_v35, %s2864_s10 }
 0x13e   : > { %1236 = vrot.lane.b32.xlu0 %v1158_v32, %s2865_s11 }
 0x13f   : > { %v1598_v30 = vpop.permute.xlu1 %1597 }
 0x140   : > { %v1789_v31 = vpop.permute.xlu0 %1788  ;;  %1693 = vst.msk [vmem:[#allocation3 + $0x8] sm:$0xff] %vm1691_vm8, %v1598_v30 }
 0x141   : > { %1885 = vst.msk [vmem:[#allocation3] sm:$0xff] %vm1884_vm9, %v1789_v31  ;;  %1234 = vrot.lane.b32.xlu1 %v1735_v28, %s2865_s11 }
 0x142   : > { %1425 = vrot.lane.b32.xlu0 %v3333_v50, %s2866_s12 }
 0x143   : > { %v1602_v5 = vpop.permute.xlu1 %1601 }
 0x144   : > { %v1793_v1 = vpop.permute.xlu0 %1792  ;;  %1695 = vst.msk [vmem:[#allocation3 + $0x18] sm:$0xff] %vm1691_vm8, %v1602_v5 }
 0x145   : > { %1887 = vst.msk [vmem:[#allocation3 + $0x10] sm:$0xff] %vm1884_vm9, %v1793_v1  ;;  %1238 = vrot.lane.b32.xlu1 %v1159_v33, %s2865_s11 }
 0x146   : > { %1429 = vrot.lane.b32.xlu0 %v3341_v56, %s2866_s12 }
 0x147   : > { %v1791_v6 = vpop.permute.xlu1 %1790 }
 0x148   : > { %v1982_v22 = vpop.permute.xlu0 %1981  ;;  %1886 = vst.msk [vmem:[#allocation3 + $0x8] sm:$0xff] %vm1884_vm9, %v1791_v6 }
 0x149   : > { %2078 = vst.msk [vmem:[#allocation3] sm:$0xff] %vm2077_vm10, %v1982_v22  ;;  %1427 = vrot.lane.b32.xlu1 %v3347_v57, %s2866_s12  ;;  %v1742_v22 = vld [vmem:[#allocation2 + $0x109] sm:$0xff] }
 0x14a   : > { %1619 = vrot.lane.b32.xlu0 %v3220_v34, %s2867_s13  ;;  %v1738_v34 = vld [vmem:[#allocation2 + $0xd9] sm:$0xff] }
 0x14b   : > { %v1795_v50 = vpop.permute.xlu1 %1794 }
 0x14c   : > { %v1986_v8 = vpop.permute.xlu0 %1985  ;;  %1888 = vst.msk [vmem:[#allocation3 + $0x18] sm:$0xff] %vm1884_vm9, %v1795_v50 }
 0x14d   : > { %2080 = vst.msk [vmem:[#allocation3 + $0x10] sm:$0xff] %vm2077_vm10, %v1986_v8  ;;  %1431 = vrot.lane.b32.xlu1 %v3352_v59, %s2866_s12 }
 0x14e   : > { %1623 = vrot.lane.b32.xlu0 %v3233_v36, %s2867_s13 }
 0x14f   : > { %v1984_v56 = vpop.permute.xlu1 %1983 }
 0x150   : > { %v1217_v29 = vpop.permute.xlu0 %1216  ;;  %2079 = vst.msk [vmem:[#allocation3 + $0x8] sm:$0xff] %vm2077_vm10, %v1984_v56  ;;  %v2110_v59 = vld [vmem:[#allocation3] sm:$0xff] }
 0x151   : > { %1309 = vst.msk [vmem:[#allocation3 + $0x20] sm:$0xff] %vm1304_vm6, %v1217_v29  ;;  %1621 = vrot.lane.b32.xlu1 %v3231_v35, %s2867_s13 }
 0x152   : > { %1812 = vrot.lane.b32.xlu0 %v1158_v32, %s2868_s18 }
 0x153   : > { %v1988_v57 = vpop.permute.xlu1 %1987 }
 0x154   : > { %v1221_v23 = vpop.permute.xlu0 %1220  ;;  %2081 = vst.msk [vmem:[#allocation3 + $0x18] sm:$0xff] %vm2077_vm10, %v1988_v57  ;;  %v2112_v24 = vld [vmem:[#allocation3 + $0x10] sm:$0xff]  ;;  %v1743_v57 = vld [vmem:[#allocation2 + $0x111] sm:$0xff] }
 0x155   : > { %1311 = vst.msk [vmem:[#allocation3 + $0x30] sm:$0xff] %vm1304_vm6, %v1221_v23  ;;  %1625 = vrot.lane.b32.xlu1 %v3235_v37, %s2867_s13  ;;  %v1935_v23 = vld [vmem:[#allocation2 + $0x10a] sm:$0xff] }
 0x156   : > { %1816 = vrot.lane.b32.xlu0 %v1738_v34, %s2868_s18 }
 0x157   : > { %v1219_v25 = vpop.permute.xlu1 %1218  ;;  %v2111_v9 = vld [vmem:[#allocation3 + $0x8] sm:$0xff] }
 0x158   : > { %v1410_v35 = vpop.permute.xlu0 %1409  ;;  %1310 = vst.msk [vmem:[#allocation3 + $0x28] sm:$0xff] %vm1304_vm6, %v1219_v25  ;;  %v2142_v54 = vpack.c.bf16 %v2111_v9, %v2110_v59 }
 0x159   : > { %1502 = vst.msk [vmem:[#allocation3 + $0x20] sm:$0xff] %vm1497_vm7, %v1410_v35  ;;  %1814 = vrot.lane.b32.xlu1 %v1159_v33, %s2868_s18  ;;  %v1936_v35 = vld [vmem:[#allocation2 + $0x112] sm:$0xff] }
 0x15a   : > { %2005 = vrot.lane.b32.xlu0 %v1929_v43, %s2869_s25  ;;  %2785 = vmatprep.mubr.msk.bf16.mxu0 %vm2194_vm11, %v2142_v54 }
 0x15b   : > { %v1223_v2 = vpop.permute.xlu1 %1222  ;;  %v2113_v38 = vld [vmem:[#allocation3 + $0x18] sm:$0xff] }
 0x15c   : > { %v1414_v20 = vpop.permute.xlu0 %1413  ;;  %1312 = vst.msk [vmem:[#allocation3 + $0x38] sm:$0xff] %vm1304_vm6, %v1223_v2  ;;  %v2143_v12 = vpack.c.bf16 %v2113_v38, %v2112_v24 }
 0x15d   : > { %1504 = vst.msk [vmem:[#allocation3 + $0x30] sm:$0xff] %vm1497_vm7, %v1414_v20  ;;  %1818 = vrot.lane.b32.xlu1 %v1739_v26, %s2868_s18 }
 0x15e   : > { %2009 = vrot.lane.b32.xlu0 %v1931_v10, %s2869_s25  ;;  %2786 = vmatmul.mubr.msk.bf16.vlgmr.msra.gmra.mrb[0].mxu0 %vm2194_vm11, %v2143_v12  ;;  %v1359_v12 = vld [vmem:[#allocation2 + $0x122] sm:$0xff] }
 0x15f   : > { %v1412_v51 = vpop.permute.xlu1 %1411 }
 0x160   : > { %v1604_v7 = vpop.permute.xlu0 %1603  ;;  %1503 = vst.msk [vmem:[#allocation3 + $0x28] sm:$0xff] %vm1497_vm7, %v1412_v51 }
 0x161   : > { %1696 = vst.msk [vmem:[#allocation3 + $0x20] sm:$0xff] %vm1691_vm8, %v1604_v7  ;;  %2007 = vrot.lane.b32.xlu1 %v1930_v47, %s2869_s25 }
 0x162   : > { %1047 = vrot.lane.b32.xlu0 %v3233_v36, %s2864_s10  ;;  %v1162_v36 = vld [vmem:[#allocation2 + $0xf1] sm:$0xff] }
 0x163   : > { %v1416_v14 = vpop.permute.xlu1 %1415 }
 0x164   : > { %v1608_v58 = vpop.permute.xlu0 %1607  ;;  %1505 = vst.msk [vmem:[#allocation3 + $0x38] sm:$0xff] %vm1497_vm7, %v1416_v14 }
 0x165   : > { %1698 = vst.msk [vmem:[#allocation3 + $0x30] sm:$0xff] %vm1691_vm8, %v1608_v58  ;;  %2011 = vrot.lane.b32.xlu1 %v1932_v15, %s2869_s25  ;;  %v1360_v58 = vld [vmem:[#allocation2 + $0x12a] sm:$0xff] }
 0x166   : > { %1051 = vrot.lane.b32.xlu0 %v3243_v39, %s2864_s10 }
 0x167   : > { %v1606_v17 = vpop.permute.xlu1 %1605 }
 0x168   : > { %v1797_v44 = vpop.permute.xlu0 %1796  ;;  %1697 = vst.msk [vmem:[#allocation3 + $0x28] sm:$0xff] %vm1691_vm8, %v1606_v17  ;;  %v1553_v17 = vld [vmem:[#allocation2 + $0x138] sm:$0xff] }
 0x169   : > { %1889 = vst.msk [vmem:[#allocation3 + $0x20] sm:$0xff] %vm1884_vm9, %v1797_v44  ;;  %1049 = vrot.lane.b32.xlu1 %v3235_v37, %s2864_s10  ;;  %v2851_v37 = vld [vmem:[%s4097_s1] ss:$0 sm:$0xff] }
 0x16a   : > { %1240 = vrot.lane.b32.xlu0 %v1738_v34, %s2865_s11  ;;  %v339_v61 = vmul.f32 %v2851_v37, %v300_v19  ;;  %v340_v16 = vmul.f32 %v2851_v37, %v301_v27  ;;  %v1552_v27 = vld [vmem:[#allocation2 + $0x128] sm:$0xff] }
 0x16b   : > { %v1610_v21 = vpop.permute.xlu1 %1609 }
 0x16c   : > { %v1801_v60 = vpop.permute.xlu0 %1800  ;;  %1699 = vst.msk [vmem:[#allocation3 + $0x38] sm:$0xff] %vm1691_vm8, %v1610_v21  ;;  %v378_v28 = vadd.f32 %v2852_v52, %v339_v61  ;;  %v379_v62 = vadd.f32 %v2852_v52, %v340_v16  ;;  %v1554_v16 = vld [vmem:[#allocation2 + $0x140] sm:$0xff] }
 0x16d   : > { %1891 = vst.msk [vmem:[#allocation3 + $0x30] sm:$0xff] %vm1884_vm9, %v1801_v60  ;;  %1053 = vrot.lane.b32.xlu1 %v3245_v40, %s2864_s10  ;;  %v1746_v52 = vld [vmem:[#allocation2 + $0x139] sm:$0xff] }
 0x16e   : > { %1244 = vrot.lane.b32.xlu0 %v1162_v36, %s2865_s11  ;;  %v410_v0 = vmax.f32 %v378_v28, 0.0  ;;  %v411_v3 = vmax.f32 %v379_v62, 0.0 }
 0x16f   : > { %v1799_v49 = vpop.permute.xlu1 %1798 }
 0x170   : > { %v1990_v13 = vpop.permute.xlu0 %1989  ;;  %1890 = vst.msk [vmem:[#allocation3 + $0x28] sm:$0xff] %vm1884_vm9, %v1799_v49 }
 0x171   : > { %2082 = vst.msk [vmem:[#allocation3 + $0x20] sm:$0xff] %vm2077_vm10, %v1990_v13  ;;  %1242 = vrot.lane.b32.xlu1 %v1739_v26, %s2865_s11 }
 0x172   : > { %1433 = vrot.lane.b32.xlu0 %v1931_v10, %s2866_s12  ;;  %499 = vst.msk [vmem:[#allocation2 + $0x181] sm:$0xff] %vm412_vm0, %v410_v0  ;;  %500 = vst.msk [vmem:[#allocation2 + $0x189] sm:$0xff] %vm412_vm0, %v411_v3 }
 0x173   : > { %v1803_v63 = vpop.permute.xlu1 %1802 }
 0x174   : > { %v1994_v48 = vpop.permute.xlu0 %1993  ;;  %1892 = vst.msk [vmem:[#allocation3 + $0x38] sm:$0xff] %vm1884_vm9, %v1803_v63  ;;  %v1747_v63 = vld [vmem:[#allocation2 + $0x141] sm:$0xff] }
 0x175   : > { %2084 = vst.msk [vmem:[#allocation3 + $0x30] sm:$0xff] %vm2077_vm10, %v1994_v48  ;;  %1246 = vrot.lane.b32.xlu1 %v1163_v53, %s2865_s11  ;;  %v1939_v48 = vld [vmem:[#allocation2 + $0x13a] sm:$0xff] }
 0x176   : > { %1437 = vrot.lane.b32.xlu0 %v1355_v11, %s2866_s12 }
 0x177   : > { %v1992_v4 = vpop.permute.xlu1 %1991 }
 0x178   : > { %v1036_v32 = vpop.permute.xlu0 %1035  ;;  %2083 = vst.msk [vmem:[#allocation3 + $0x28] sm:$0xff] %vm2077_vm10, %v1992_v4  ;;  %v2114_v31 = vld [vmem:[#allocation3 + $0x20] sm:$0xff] }
 0x179   : > { %1122 = vst.msk [vmem:[#allocation3 + $0x50] sm:$0xff] %vm1111_vm5, %v1036_v32  ;;  %1435 = vrot.lane.b32.xlu1 %v1932_v15, %s2866_s12 }
 0x17a   : > { %1627 = vrot.lane.b32.xlu0 %v3243_v39, %s2867_s13 }
 0x17b   : > { %v1996_v18 = vpop.permute.xlu1 %1995 }
 0x17c   : > { %v1225_v30 = vpop.permute.xlu0 %1224  ;;  %2085 = vst.msk [vmem:[#allocation3 + $0x38] sm:$0xff] %vm2077_vm10, %v1996_v18  ;;  %v2116_v39 = vld [vmem:[#allocation3 + $0x30] sm:$0xff]  ;;  %v977_v18 = vld [vmem:[#allocation2 + $0x150] sm:$0xff] }
 0x17d   : > { %1313 = vst.msk [vmem:[#allocation3 + $0x40] sm:$0xff] %vm1304_vm6, %v1225_v30  ;;  %1439 = vrot.lane.b32.xlu1 %v1356_v55, %s2866_s12 }
 0x17e   : > { %1631 = vrot.lane.b32.xlu0 %v3253_v41, %s2867_s13 }
 0x17f   : > { %v1038_v33 = vpop.permute.xlu1 %1037  ;;  %v2115_v5 = vld [vmem:[#allocation3 + $0x28] sm:$0xff] }
 0x180   : > { %v1229_v1 = vpop.permute.xlu0 %1228  ;;  %1123 = vst.msk [vmem:[#allocation3 + $0x58] sm:$0xff] %vm1111_vm5, %v1038_v33  ;;  %v2144_v6 = vpack.c.bf16 %v2115_v5, %v2114_v31 }
 0x181   : > { %1315 = vst.msk [vmem:[#allocation3 + $0x50] sm:$0xff] %vm1304_vm6, %v1229_v1  ;;  %1629 = vrot.lane.b32.xlu1 %v3245_v40, %s2867_s13  ;;  %v978_v1 = vld [vmem:[#allocation2 + $0x158] sm:$0xff] }
 0x182   : > { %1820 = vrot.lane.b32.xlu0 %v1162_v36, %s2868_s18  ;;  %2789 = vmatprep.mubr.msk.bf16.mxu0 %vm2194_vm11, %v2144_v6  ;;  %v1170_v6 = vld [vmem:[#allocation2 + $0x151] sm:$0xff] }
 0x183   : > { %v1227_v50 = vpop.permute.xlu1 %1226  ;;  %v2117_v8 = vld [vmem:[#allocation3 + $0x38] sm:$0xff] }
 0x184   : > { %v1418_v56 = vpop.permute.xlu0 %1417  ;;  %1314 = vst.msk [vmem:[#allocation3 + $0x48] sm:$0xff] %vm1304_vm6, %v1227_v50  ;;  %v2145_v29 = vpack.c.bf16 %v2117_v8, %v2116_v39 }
 0x185   : > { %1506 = vst.msk [vmem:[#allocation3 + $0x40] sm:$0xff] %vm1497_vm7, %v1418_v56  ;;  %1633 = vrot.lane.b32.xlu1 %v3255_v42, %s2867_s13  ;;  %v1171_v56 = vld [vmem:[#allocation2 + $0x159] sm:$0xff] }
 0x186   : > { %1824 = vrot.lane.b32.xlu0 %v1742_v22, %s2868_s18  ;;  %2790 = vmatmul.mubr.msk.bf16.gmra.mrb[4].mxu0 %vm2194_vm11, %v2145_v29  ;;  %v1363_v29 = vld [vmem:[#allocation2 + $0x152] sm:$0xff] }
 0x187   : > { %v1231_v40 = vpop.permute.xlu1 %1230 }
 0x188   : > { %v1422_v34 = vpop.permute.xlu0 %1421  ;;  %1316 = vst.msk [vmem:[#allocation3 + $0x58] sm:$0xff] %vm1304_vm6, %v1231_v40 }
 0x189   : > { %1508 = vst.msk [vmem:[#allocation3 + $0x50] sm:$0xff] %vm1497_vm7, %v1422_v34  ;;  %1822 = vrot.lane.b32.xlu1 %v1163_v53, %s2868_s18 }
 0x18a   : > { %2013 = vrot.lane.b32.xlu0 %v1355_v11, %s2869_s25 }
 0x18b   : > { %v1420_v59 = vpop.permute.xlu1 %1419 }
 0x18c   : > { %v1612_v43 = vpop.permute.xlu0 %1611  ;;  %1507 = vst.msk [vmem:[#allocation3 + $0x48] sm:$0xff] %vm1497_vm7, %v1420_v59 }
 0x18d   : > { %1700 = vst.msk [vmem:[#allocation3 + $0x40] sm:$0xff] %vm1691_vm8, %v1612_v43  ;;  %1826 = vrot.lane.b32.xlu1 %v1743_v57, %s2868_s18  ;;  %v1364_v43 = vld [vmem:[#allocation2 + $0x15a] sm:$0xff] }
 0x18e   : > { %2017 = vrot.lane.b32.xlu0 %v1935_v23, %s2869_s25 }
 0x18f   : > { %v1424_v25 = vpop.permute.xlu1 %1423 }
 0x190   : > { %v1616_v9 = vpop.permute.xlu0 %1615  ;;  %1509 = vst.msk [vmem:[#allocation3 + $0x58] sm:$0xff] %vm1497_vm7, %v1424_v25  ;;  %v1557_v25 = vld [vmem:[#allocation2 + $0x168] sm:$0xff] }
 0x191   : > { %1702 = vst.msk [vmem:[#allocation3 + $0x50] sm:$0xff] %vm1691_vm8, %v1616_v9  ;;  %2015 = vrot.lane.b32.xlu1 %v1356_v55, %s2869_s25  ;;  %v1940_v55 = vld [vmem:[#allocation2 + $0x142] sm:$0xff] }
 0x192   : > { %1055 = vrot.lane.b32.xlu0 %v3253_v41, %s2864_s10  ;;  %v1166_v41 = vld [vmem:[#allocation2 + $0x121] sm:$0xff] }
 0x193   : > { %v1614_v54 = vpop.permute.xlu1 %1613 }
 0x194   : > { %v1805_v24 = vpop.permute.xlu0 %1804  ;;  %1701 = vst.msk [vmem:[#allocation3 + $0x48] sm:$0xff] %vm1691_vm8, %v1614_v54 }
 0x195   : > { %1893 = vst.msk [vmem:[#allocation3 + $0x40] sm:$0xff] %vm1884_vm9, %v1805_v24  ;;  %2019 = vrot.lane.b32.xlu1 %v1936_v35, %s2869_s25 }
 0x196   : > { %1059 = vrot.lane.b32.xlu0 %v3263_v45, %s2864_s10 }
 0x197   : > { %v1618_v26 = vpop.permute.xlu1 %1617 }
 0x198   : > { %v1809_v10 = vpop.permute.xlu0 %1808  ;;  %1703 = vst.msk [vmem:[#allocation3 + $0x58] sm:$0xff] %vm1691_vm8, %v1618_v26 }
 0x199   : > { %1895 = vst.msk [vmem:[#allocation3 + $0x50] sm:$0xff] %vm1884_vm9, %v1809_v10  ;;  %1057 = vrot.lane.b32.xlu1 %v3255_v42, %s2864_s10  ;;  %v1167_v42 = vld [vmem:[#allocation2 + $0x129] sm:$0xff] }
 0x19a   : > { %1248 = vrot.lane.b32.xlu0 %v1742_v22, %s2865_s11 }
 0x19b   : > { %v1807_v2 = vpop.permute.xlu1 %1806 }
 0x19c   : > { %v1998_v38 = vpop.permute.xlu0 %1997  ;;  %1894 = vst.msk [vmem:[#allocation3 + $0x48] sm:$0xff] %vm1884_vm9, %v1807_v2 }
 0x19d   : > { %2086 = vst.msk [vmem:[#allocation3 + $0x40] sm:$0xff] %vm2077_vm10, %v1998_v38  ;;  %1061 = vrot.lane.b32.xlu1 %v3265_v46, %s2864_s10  ;;  %v1551_v46 = vld [vmem:[#allocation2 + $0x120] sm:$0xff] }
 0x19e   : > { %1252 = vrot.lane.b32.xlu0 %v1166_v41, %s2865_s11 }
 0x19f   : > { %v1811_v45 = vpop.permute.xlu1 %1810 }
 0x1a0   : > { %v2002_v20 = vpop.permute.xlu0 %2001  ;;  %1896 = vst.msk [vmem:[#allocation3 + $0x58] sm:$0xff] %vm1884_vm9, %v1811_v45  ;;  %v1558_v45 = vld [vmem:[#allocation2 + $0x170] sm:$0xff] }
 0x1a1   : > { %2088 = vst.msk [vmem:[#allocation3 + $0x50] sm:$0xff] %vm2077_vm10, %v2002_v20  ;;  %1250 = vrot.lane.b32.xlu1 %v1743_v57, %s2865_s11  ;;  %v1750_v20 = vld [vmem:[#allocation2 + $0x169] sm:$0xff] }
 0x1a2   : > { %1441 = vrot.lane.b32.xlu0 %v1935_v23, %s2866_s12 }
 0x1a3   : > { %v2000_v47 = vpop.permute.xlu1 %1999 }
 0x1a4   : > { %v1040_v51 = vpop.permute.xlu0 %1039  ;;  %2087 = vst.msk [vmem:[#allocation3 + $0x48] sm:$0xff] %vm2077_vm10, %v2000_v47  ;;  %v2118_v14 = vld [vmem:[#allocation3 + $0x40] sm:$0xff] }
 0x1a5   : > { %1124 = vst.msk [vmem:[#allocation3 + $0x60] sm:$0xff] %vm1111_vm5, %v1040_v51  ;;  %1254 = vrot.lane.b32.xlu1 %v1167_v42, %s2865_s11 }
 0x1a6   : > { %1445 = vrot.lane.b32.xlu0 %v1359_v12, %s2866_s12 }
 0x1a7   : > { %v2004_v7 = vpop.permute.xlu1 %2003 }
 0x1a8   : > { %v1044_v15 = vpop.permute.xlu0 %1043  ;;  %2089 = vst.msk [vmem:[#allocation3 + $0x58] sm:$0xff] %vm2077_vm10, %v2004_v7  ;;  %v2120_v19 = vld [vmem:[#allocation3 + $0x50] sm:$0xff]  ;;  %v1943_v7 = vld [vmem:[#allocation2 + $0x16a] sm:$0xff] }
 0x1a9   : > { %1126 = vst.msk [vmem:[#allocation3 + $0x70] sm:$0xff] %vm1111_vm5, %v1044_v15  ;;  %1443 = vrot.lane.b32.xlu1 %v1936_v35, %s2866_s12 }
 0x1aa   : > { %1635 = vrot.lane.b32.xlu0 %v1551_v46, %s2867_s13  ;;  %v1751_v46 = vld [vmem:[#allocation2 + $0x171] sm:$0xff] }
 0x1ab   : > { %v1042_v44 = vpop.permute.xlu1 %1041  ;;  %v2119_v36 = vld [vmem:[#allocation3 + $0x48] sm:$0xff] }
 0x1ac   : > { %v1233_v21 = vpop.permute.xlu0 %1232  ;;  %1125 = vst.msk [vmem:[#allocation3 + $0x68] sm:$0xff] %vm1111_vm5, %v1042_v44  ;;  %v2146_v60 = vpack.c.bf16 %v2119_v36, %v2118_v14  ;;  %v1944_v44 = vld [vmem:[#allocation2 + $0x172] sm:$0xff]  ;;  %v981_v36 = vld [vmem:[#allocation2 + $0x180] sm:$0xff] }
 0x1ad   : > { %1317 = vst.msk [vmem:[#allocation3 + $0x60] sm:$0xff] %vm1304_vm6, %v1233_v21  ;;  %1447 = vrot.lane.b32.xlu1 %v1360_v58, %s2866_s12 }
 0x1ae   : > { %1639 = vrot.lane.b32.xlu0 %v1553_v17, %s2867_s13  ;;  %2793 = vmatprep.mubr.msk.bf16.mxu0 %vm2194_vm11, %v2146_v60 }
 0x1af   : > { %v1046_v49 = vpop.permute.xlu1 %1045  ;;  %v2121_v13 = vld [vmem:[#allocation3 + $0x58] sm:$0xff] }
 0x1b0   : > { %v1237_v37 = vpop.permute.xlu0 %1236  ;;  %1127 = vst.msk [vmem:[#allocation3 + $0x78] sm:$0xff] %vm1111_vm5, %v1046_v49  ;;  %v2147_v61 = vpack.c.bf16 %v2121_v13, %v2120_v19  ;;  %v982_v49 = vld [vmem:[#allocation2 + $0x188] sm:$0xff] }
 0x1b1   : > { %1319 = vst.msk [vmem:[#allocation3 + $0x70] sm:$0xff] %vm1304_vm6, %v1237_v37  ;;  %1637 = vrot.lane.b32.xlu1 %v1552_v27, %s2867_s13  ;;  %v1174_v13 = vld [vmem:[#allocation2 + $0x181] sm:$0xff] }
 0x1b2   : > { %1828 = vrot.lane.b32.xlu0 %v1166_v41, %s2868_s18  ;;  %2794 = vmatmul.mubr.msk.bf16.gmra.mrb[8].mxu0 %vm2194_vm11, %v2147_v61 }
 0x1b3   : > { %v1235_v28 = vpop.permute.xlu1 %1234 }
 0x1b4   : > { %v1426_v62 = vpop.permute.xlu0 %1425  ;;  %1318 = vst.msk [vmem:[#allocation3 + $0x68] sm:$0xff] %vm1304_vm6, %v1235_v28  ;;  %v1175_v28 = vld [vmem:[#allocation2 + $0x189] sm:$0xff] }
 0x1b5   : > { %1510 = vst.msk [vmem:[#allocation3 + $0x60] sm:$0xff] %vm1497_vm7, %v1426_v62  ;;  %1641 = vrot.lane.b32.xlu1 %v1554_v16, %s2867_s13  ;;  %v1367_v62 = vld [vmem:[#allocation2 + $0x182] sm:$0xff] }
 0x1b6   : > { %1832 = vrot.lane.b32.xlu0 %v1746_v52, %s2868_s18 }
 0x1b7   : > { %v1239_v53 = vpop.permute.xlu1 %1238 }
 0x1b8   : > { %v1430_v11 = vpop.permute.xlu0 %1429  ;;  %1320 = vst.msk [vmem:[#allocation3 + $0x78] sm:$0xff] %vm1304_vm6, %v1239_v53 }
 0x1b9   : > { %1512 = vst.msk [vmem:[#allocation3 + $0x70] sm:$0xff] %vm1497_vm7, %v1430_v11  ;;  %1830 = vrot.lane.b32.xlu1 %v1167_v42, %s2868_s18 }
 0x1ba   : > { %2021 = vrot.lane.b32.xlu0 %v1359_v12, %s2869_s25 }
 0x1bb   : > { %v1428_v0 = vpop.permute.xlu1 %1427 }
 0x1bc   : > { %v1620_v3 = vpop.permute.xlu0 %1619  ;;  %1511 = vst.msk [vmem:[#allocation3 + $0x68] sm:$0xff] %vm1497_vm7, %v1428_v0 }
 0x1bd   : > { %1704 = vst.msk [vmem:[#allocation3 + $0x60] sm:$0xff] %vm1691_vm8, %v1620_v3  ;;  %1834 = vrot.lane.b32.xlu1 %v1747_v63, %s2868_s18  ;;  %v1368_v3 = vld [vmem:[#allocation2 + $0x18a] sm:$0xff] }
 0x1be   : > { %2025 = vrot.lane.b32.xlu0 %v1939_v48, %s2869_s25 }
 0x1bf   : > { %v1432_v4 = vpop.permute.xlu1 %1431 }
 0x1c0   : > { %v1624_v32 = vpop.permute.xlu0 %1623  ;;  %1513 = vst.msk [vmem:[#allocation3 + $0x78] sm:$0xff] %vm1497_vm7, %v1432_v4  ;;  %v1561_v4 = vld [vmem:[#allocation2 + $0x198] sm:$0xff] }
 0x1c1   : > { %1706 = vst.msk [vmem:[#allocation3 + $0x70] sm:$0xff] %vm1691_vm8, %v1624_v32  ;;  %2023 = vrot.lane.b32.xlu1 %v1360_v58, %s2869_s25 }
 0x1c2   : > { %1063 = vrot.lane.b32.xlu0 %v1553_v17, %s2864_s10 }
 0x1c3   : > { %v1622_v30 = vpop.permute.xlu1 %1621 }
 0x1c4   : > { %v1813_v31 = vpop.permute.xlu0 %1812  ;;  %1705 = vst.msk [vmem:[#allocation3 + $0x68] sm:$0xff] %vm1691_vm8, %v1622_v30 }
 0x1c5   : > { %1897 = vst.msk [vmem:[#allocation3 + $0x60] sm:$0xff] %vm1884_vm9, %v1813_v31  ;;  %2027 = vrot.lane.b32.xlu1 %v1940_v55, %s2869_s25 }
 0x1c6   : > { %1067 = vrot.lane.b32.xlu0 %v977_v18, %s2864_s10 }
 0x1c7   : > { %v1626_v33 = vpop.permute.xlu1 %1625 }
 0x1c8   : > { %v1817_v5 = vpop.permute.xlu0 %1816  ;;  %1707 = vst.msk [vmem:[#allocation3 + $0x78] sm:$0xff] %vm1691_vm8, %v1626_v33 }
 0x1c9   : > { %1899 = vst.msk [vmem:[#allocation3 + $0x70] sm:$0xff] %vm1884_vm9, %v1817_v5  ;;  %1065 = vrot.lane.b32.xlu1 %v1554_v16, %s2864_s10 }
 0x1ca   : > { %1256 = vrot.lane.b32.xlu0 %v1746_v52, %s2865_s11 }
 0x1cb   : > { %v1815_v39 = vpop.permute.xlu1 %1814 }
 0x1cc   : > { %v2006_v22 = vpop.permute.xlu0 %2005  ;;  %1898 = vst.msk [vmem:[#allocation3 + $0x68] sm:$0xff] %vm1884_vm9, %v1815_v39  ;;  %v1562_v39 = vld [vmem:[#allocation2 + $0x1a0] sm:$0xff] }
 0x1cd   : > { %2090 = vst.msk [vmem:[#allocation3 + $0x60] sm:$0xff] %vm2077_vm10, %v2006_v22  ;;  %1069 = vrot.lane.b32.xlu1 %v978_v1, %s2864_s10  ;;  %v1754_v22 = vld [vmem:[#allocation2 + $0x199] sm:$0xff] }
 0x1ce   : > { %1260 = vrot.lane.b32.xlu0 %v1170_v6, %s2865_s11 }
 0x1cf   : > { %v1819_v50 = vpop.permute.xlu1 %1818 }
 0x1d0   : > { %v2010_v8 = vpop.permute.xlu0 %2009  ;;  %1900 = vst.msk [vmem:[#allocation3 + $0x78] sm:$0xff] %vm1884_vm9, %v1819_v50 }
 0x1d1   : > { %2092 = vst.msk [vmem:[#allocation3 + $0x70] sm:$0xff] %vm2077_vm10, %v2010_v8  ;;  %1258 = vrot.lane.b32.xlu1 %v1747_v63, %s2865_s11 }
 0x1d2   : > { %1449 = vrot.lane.b32.xlu0 %v1939_v48, %s2866_s12 }
 0x1d3   : > { %v2008_v40 = vpop.permute.xlu1 %2007 }
 0x1d4   : > { %v1048_v34 = vpop.permute.xlu0 %1047  ;;  %2091 = vst.msk [vmem:[#allocation3 + $0x68] sm:$0xff] %vm2077_vm10, %v2008_v40  ;;  %v2122_v59 = vld [vmem:[#allocation3 + $0x60] sm:$0xff]  ;;  %v1755_v40 = vld [vmem:[#allocation2 + $0x1a1] sm:$0xff] }
 0x1d5   : > { %1128 = vst.msk [vmem:[#allocation3 + $0x80] sm:$0xff] %vm1111_vm5, %v1048_v34  ;;  %1262 = vrot.lane.b32.xlu1 %v1171_v56, %s2865_s11  ;;  %v1947_v34 = vld [vmem:[#allocation2 + $0x19a] sm:$0xff] }
 0x1d6   : > { %1453 = vrot.lane.b32.xlu0 %v1363_v29, %s2866_s12 }
 0x1d7   : > { %v2012_v57 = vpop.permute.xlu1 %2011 }
 0x1d8   : > { %v1052_v23 = vpop.permute.xlu0 %1051  ;;  %2093 = vst.msk [vmem:[#allocation3 + $0x78] sm:$0xff] %vm2077_vm10, %v2012_v57  ;;  %v2124_v26 = vld [vmem:[#allocation3 + $0x70] sm:$0xff] }
 0x1d9   : > { %1130 = vst.msk [vmem:[#allocation3 + $0x90] sm:$0xff] %vm1111_vm5, %v1052_v23  ;;  %1451 = vrot.lane.b32.xlu1 %v1940_v55, %s2866_s12 }
 0x1da   : > { %1643 = vrot.lane.b32.xlu0 %v977_v18, %s2867_s13 }
 0x1db   : > { %v1050_v9 = vpop.permute.xlu1 %1049  ;;  %v2123_v35 = vld [vmem:[#allocation3 + $0x68] sm:$0xff] }
 0x1dc   : > { %v1241_v54 = vpop.permute.xlu0 %1240  ;;  %1129 = vst.msk [vmem:[#allocation3 + $0x88] sm:$0xff] %vm1111_vm5, %v1050_v9  ;;  %v2148_v24 = vpack.c.bf16 %v2123_v35, %v2122_v59 }
 0x1dd   : > { %1321 = vst.msk [vmem:[#allocation3 + $0x80] sm:$0xff] %vm1304_vm6, %v1241_v54  ;;  %1455 = vrot.lane.b32.xlu1 %v1364_v43, %s2866_s12 }
 0x1de   : > { %1647 = vrot.lane.b32.xlu0 %v1557_v25, %s2867_s13  ;;  %2797 = vmatprep.mubr.msk.bf16.mxu0 %vm2194_vm11, %v2148_v24 }
 0x1df   : > { %v1054_v10 = vpop.permute.xlu1 %1053  ;;  %v2125_v41 = vld [vmem:[#allocation3 + $0x78] sm:$0xff] }
 0x1e0   : > { %v1245_v2 = vpop.permute.xlu0 %1244  ;;  %1131 = vst.msk [vmem:[#allocation3 + $0x98] sm:$0xff] %vm1111_vm5, %v1054_v10  ;;  %v2149_v38 = vpack.c.bf16 %v2125_v41, %v2124_v26 }
 0x1e1   : > { %1323 = vst.msk [vmem:[#allocation3 + $0x90] sm:$0xff] %vm1304_vm6, %v1245_v2  ;;  %1645 = vrot.lane.b32.xlu1 %v978_v1, %s2867_s13 }
 0x1e2   : > { %1836 = vrot.lane.b32.xlu0 %v1170_v6, %s2868_s18  ;;  %2798 = vmatmul.mubr.msk.bf16.gmra.mrb[12].mxu0 %vm2194_vm11, %v2149_v38 }
 0x1e3   : > { %v1243_v42 = vpop.permute.xlu1 %1242 }
 0x1e4   : > { %v1434_v12 = vpop.permute.xlu0 %1433  ;;  %1322 = vst.msk [vmem:[#allocation3 + $0x88] sm:$0xff] %vm1304_vm6, %v1243_v42 }
 0x1e5   : > { %1514 = vst.msk [vmem:[#allocation3 + $0x80] sm:$0xff] %vm1497_vm7, %v1434_v12  ;;  %1649 = vrot.lane.b32.xlu1 %v1558_v45, %s2867_s13 }
 0x1e6   : > { %1840 = vrot.lane.b32.xlu0 %v1750_v20, %s2868_s18 }
 0x1e7   : > { %v1247_v47 = vpop.permute.xlu1 %1246 }
 0x1e8   : > { %v1438_v51 = vpop.permute.xlu0 %1437  ;;  %1324 = vst.msk [vmem:[#allocation3 + $0x98] sm:$0xff] %vm1304_vm6, %v1247_v47 }
 0x1e9   : > { %1516 = vst.msk [vmem:[#allocation3 + $0x90] sm:$0xff] %vm1497_vm7, %v1438_v51  ;;  %1838 = vrot.lane.b32.xlu1 %v1171_v56, %s2868_s18 }
 0x1ea   : > { %2029 = vrot.lane.b32.xlu0 %v1363_v29, %s2869_s25 }
 0x1eb   : > { %v1436_v15 = vpop.permute.xlu1 %1435 }
 0x1ec   : > { %v1628_v14 = vpop.permute.xlu0 %1627  ;;  %1515 = vst.msk [vmem:[#allocation3 + $0x88] sm:$0xff] %vm1497_vm7, %v1436_v15 }
 0x1ed   : > { %1708 = vst.msk [vmem:[#allocation3 + $0x80] sm:$0xff] %vm1691_vm8, %v1628_v14  ;;  %1842 = vrot.lane.b32.xlu1 %v1751_v46, %s2868_s18 }
 0x1ee   : > { %2033 = vrot.lane.b32.xlu0 %v1943_v7, %s2869_s25 }
 0x1ef   : > { %v1440_v58 = vpop.permute.xlu1 %1439 }
 0x1f0   : > { %v1632_v17 = vpop.permute.xlu0 %1631  ;;  %1517 = vst.msk [vmem:[#allocation3 + $0x98] sm:$0xff] %vm1497_vm7, %v1440_v58 }
 0x1f1   : > { %1710 = vst.msk [vmem:[#allocation3 + $0x90] sm:$0xff] %vm1691_vm8, %v1632_v17  ;;  %2031 = vrot.lane.b32.xlu1 %v1364_v43, %s2869_s25 }
 0x1f2   : > { %1071 = vrot.lane.b32.xlu0 %v1557_v25, %s2864_s10  ;;  %v1948_v25 = vld [vmem:[#allocation2 + $0x1a2] sm:$0xff] }
 0x1f3   : > { %v1630_v21 = vpop.permute.xlu1 %1629 }
 0x1f4   : > { %v1821_v60 = vpop.permute.xlu0 %1820  ;;  %1709 = vst.msk [vmem:[#allocation3 + $0x88] sm:$0xff] %vm1691_vm8, %v1630_v21 }
 0x1f5   : > { %1901 = vst.msk [vmem:[#allocation3 + $0x80] sm:$0xff] %vm1884_vm9, %v1821_v60  ;;  %2035 = vrot.lane.b32.xlu1 %v1944_v44, %s2869_s25 }
 0x1f6   : > { %1075 = vrot.lane.b32.xlu0 %v981_v36, %s2864_s10 }
 0x1f7   : > { %v1634_v19 = vpop.permute.xlu1 %1633 }
 0x1f8   : > { %v1825_v27 = vpop.permute.xlu0 %1824  ;;  %1711 = vst.msk [vmem:[#allocation3 + $0x98] sm:$0xff] %vm1691_vm8, %v1634_v19 }
 0x1f9   : > { %1903 = vst.msk [vmem:[#allocation3 + $0x90] sm:$0xff] %vm1884_vm9, %v1825_v27  ;;  %1073 = vrot.lane.b32.xlu1 %v1558_v45, %s2864_s10 }
 0x1fa   : > { %1264 = vrot.lane.b32.xlu0 %v1750_v20, %s2865_s11 }
 0x1fb   : > { %v1823_v37 = vpop.permute.xlu1 %1822 }
 0x1fc   : > { %v2014_v61 = vpop.permute.xlu0 %2013  ;;  %1902 = vst.msk [vmem:[#allocation3 + $0x88] sm:$0xff] %vm1884_vm9, %v1823_v37 }
 0x1fd   : > { %2094 = vst.msk [vmem:[#allocation3 + $0x80] sm:$0xff] %vm2077_vm10, %v2014_v61  ;;  %1077 = vrot.lane.b32.xlu1 %v982_v49, %s2864_s10 }
 0x1fe   : > { %1268 = vrot.lane.b32.xlu0 %v1174_v13, %s2865_s11 }
 0x1ff   : > { %v1827_v16 = vpop.permute.xlu1 %1826 }
 0x200   : > { %v2018_v52 = vpop.permute.xlu0 %2017  ;;  %1904 = vst.msk [vmem:[#allocation3 + $0x98] sm:$0xff] %vm1884_vm9, %v1827_v16 }
 0x201   : > { %2096 = vst.msk [vmem:[#allocation3 + $0x90] sm:$0xff] %vm2077_vm10, %v2018_v52  ;;  %1266 = vrot.lane.b32.xlu1 %v1751_v46, %s2865_s11 }
 0x202   : > { %1457 = vrot.lane.b32.xlu0 %v1943_v7, %s2866_s12 }
 0x203   : > { %v2016_v53 = vpop.permute.xlu1 %2015 }
 0x204   : > { %v1056_v11 = vpop.permute.xlu0 %1055  ;;  %2095 = vst.msk [vmem:[#allocation3 + $0x88] sm:$0xff] %vm2077_vm10, %v2016_v53  ;;  %v2126_v0 = vld [vmem:[#allocation3 + $0x80] sm:$0xff] }
 0x205   : > { %1132 = vst.msk [vmem:[#allocation3 + $0xa0] sm:$0xff] %vm1111_vm5, %v1056_v11  ;;  %1270 = vrot.lane.b32.xlu1 %v1175_v28, %s2865_s11  ;;  %s3897_s11 = scalar_lea.vmem %s4100_s4, %s2752_s26 }
 0x206   : > { %1461 = vrot.lane.b32.xlu0 %v1367_v62, %s2866_s12 }
 0x207   : > { %v2020_v63 = vpop.permute.xlu1 %2019 }
 0x208   : > { %v1060_v48 = vpop.permute.xlu0 %1059  ;;  %2097 = vst.msk [vmem:[#allocation3 + $0x98] sm:$0xff] %vm2077_vm10, %v2020_v63  ;;  %v2128_v31 = vld [vmem:[#allocation3 + $0x90] sm:$0xff] }
 0x209   : > { %1134 = vst.msk [vmem:[#allocation3 + $0xb0] sm:$0xff] %vm1111_vm5, %v1060_v48  ;;  %1459 = vrot.lane.b32.xlu1 %v1944_v44, %s2866_s12 }
 0x20a   : > { %1651 = vrot.lane.b32.xlu0 %v981_v36, %s2867_s13 }
 0x20b   : > { %v1058_v32 = vpop.permute.xlu1 %1057  ;;  %v2127_v55 = vld [vmem:[#allocation3 + $0x88] sm:$0xff] }
 0x20c   : > { %v1249_v18 = vpop.permute.xlu0 %1248  ;;  %1133 = vst.msk [vmem:[#allocation3 + $0xa8] sm:$0xff] %vm1111_vm5, %v1058_v32  ;;  %v2150_v30 = vpack.c.bf16 %v2127_v55, %v2126_v0 }
 0x20d   : > { %1325 = vst.msk [vmem:[#allocation3 + $0xa0] sm:$0xff] %vm1304_vm6, %v1249_v18  ;;  %1463 = vrot.lane.b32.xlu1 %v1368_v3, %s2866_s12 }
 0x20e   : > { %1655 = vrot.lane.b32.xlu0 %v1561_v4, %s2867_s13  ;;  %2801 = vmatprep.mubr.msk.bf16.mxu1 %vm2194_vm11, %v2150_v30 }
 0x20f   : > { %v1062_v33 = vpop.permute.xlu1 %1061  ;;  %v2129_v5 = vld [vmem:[#allocation3 + $0x98] sm:$0xff] }
 0x210   : > { %v1253_v1 = vpop.permute.xlu0 %1252  ;;  %1135 = vst.msk [vmem:[#allocation3 + $0xb8] sm:$0xff] %vm1111_vm5, %v1062_v33  ;;  %v2151_v6 = vpack.c.bf16 %v2129_v5, %v2128_v31 }
 0x211   : > { %1327 = vst.msk [vmem:[#allocation3 + $0xb0] sm:$0xff] %vm1304_vm6, %v1253_v1  ;;  %1653 = vrot.lane.b32.xlu1 %v982_v49, %s2867_s13 }
 0x212   : > { %1844 = vrot.lane.b32.xlu0 %v1174_v13, %s2868_s18  ;;  %2802 = vmatmul.mubr.msk.bf16.vlgmr.msra.gmra.mrb[0].mxu1 %vm2194_vm11, %v2151_v6 }
 0x213   : > { %v1251_v50 = vpop.permute.xlu1 %1250 }
 0x214   : > { %v1442_v8 = vpop.permute.xlu0 %1441  ;;  %1326 = vst.msk [vmem:[#allocation3 + $0xa8] sm:$0xff] %vm1304_vm6, %v1251_v50 }
 0x215   : > { %1518 = vst.msk [vmem:[#allocation3 + $0xa0] sm:$0xff] %vm1497_vm7, %v1442_v8  ;;  %1657 = vrot.lane.b32.xlu1 %v1562_v39, %s2867_s13  ;;  %s265_s13 = scalar_lea.vmem %s4101_s5, %s4105_s22 }
 0x216   : > { %1848 = vrot.lane.b32.xlu0 %v1754_v22, %s2868_s18 }
 0x217   : > { %v1255_v56 = vpop.permute.xlu1 %1254 }
 0x218   : > { %v1446_v29 = vpop.permute.xlu0 %1445  ;;  %1328 = vst.msk [vmem:[#allocation3 + $0xb8] sm:$0xff] %vm1304_vm6, %v1255_v56 }
 0x219   : > { %1520 = vst.msk [vmem:[#allocation3 + $0xb0] sm:$0xff] %vm1497_vm7, %v1446_v29  ;;  %1846 = vrot.lane.b32.xlu1 %v1175_v28, %s2868_s18 }
 0x21a   : > { %2037 = vrot.lane.b32.xlu0 %v1367_v62, %s2869_s25 }
 0x21b   : > { %v1444_v57 = vpop.permute.xlu1 %1443 }
 0x21c   : > { %v1636_v23 = vpop.permute.xlu0 %1635  ;;  %1519 = vst.msk [vmem:[#allocation3 + $0xa8] sm:$0xff] %vm1497_vm7, %v1444_v57 }
 0x21d   : > { %1712 = vst.msk [vmem:[#allocation3 + $0xa0] sm:$0xff] %vm1691_vm8, %v1636_v23  ;;  %1850 = vrot.lane.b32.xlu1 %v1755_v40, %s2868_s18 }
 0x21e   : > { %2041 = vrot.lane.b32.xlu0 %v1947_v34, %s2869_s25 }
 0x21f   : > { %v1448_v59 = vpop.permute.xlu1 %1447 }
 0x220   : > { %v1640_v43 = vpop.permute.xlu0 %1639  ;;  %1521 = vst.msk [vmem:[#allocation3 + $0xb8] sm:$0xff] %vm1497_vm7, %v1448_v59 }
 0x221   : > { %1714 = vst.msk [vmem:[#allocation3 + $0xb0] sm:$0xff] %vm1691_vm8, %v1640_v43  ;;  %2039 = vrot.lane.b32.xlu1 %v1368_v3, %s2869_s25 }
 0x223   : > { %v1638_v9 = vpop.permute.xlu1 %1637 }
 0x224   : > { %v1829_v35 = vpop.permute.xlu0 %1828  ;;  %1713 = vst.msk [vmem:[#allocation3 + $0xa8] sm:$0xff] %vm1691_vm8, %v1638_v9 }
 0x225   : > { %1905 = vst.msk [vmem:[#allocation3 + $0xa0] sm:$0xff] %vm1884_vm9, %v1829_v35  ;;  %2043 = vrot.lane.b32.xlu1 %v1948_v25, %s2869_s25 }
 0x227   : > { %v1642_v54 = vpop.permute.xlu1 %1641 }
 0x228   : > { %v1833_v24 = vpop.permute.xlu0 %1832  ;;  %1715 = vst.msk [vmem:[#allocation3 + $0xb8] sm:$0xff] %vm1691_vm8, %v1642_v54 }
 0x229   : > { %1907 = vst.msk [vmem:[#allocation3 + $0xb0] sm:$0xff] %vm1884_vm9, %v1833_v24 }
 0x22b   : > { %v1831_v26 = vpop.permute.xlu1 %1830 }
 0x22c   : > { %v2022_v10 = vpop.permute.xlu0 %2021  ;;  %1906 = vst.msk [vmem:[#allocation3 + $0xa8] sm:$0xff] %vm1884_vm9, %v1831_v26 }
 0x22d   : > { %2098 = vst.msk [vmem:[#allocation3 + $0xa0] sm:$0xff] %vm2077_vm10, %v2022_v10 }
 0x22f   : > { %v1835_v41 = vpop.permute.xlu1 %1834 }
 0x230   : > { %v2026_v2 = vpop.permute.xlu0 %2025  ;;  %1908 = vst.msk [vmem:[#allocation3 + $0xb8] sm:$0xff] %vm1884_vm9, %v1835_v41 }
 0x231   : > { %2100 = vst.msk [vmem:[#allocation3 + $0xb0] sm:$0xff] %vm2077_vm10, %v2026_v2  ;;  %v2787_v38 = vpop.f32.mrb[0].mxu0 }
 0x232   : > { %2410 = vst.msk [vmem:[%s3897_s11 + $0x10] sm:$0xff] %vm412_vm0, %v2787_v38  ;;  %v2281_v45 = vpop.f32.mrb[1].mxu0  ;;  %v2513_v46 = vmul.f32 %v2787_v38, %v2787_v38  ;;  %v2443_v17 = vsel %vm412_vm0, %v2787_v38, 0.0 }
 0x233   : > { %2408 = vst.msk [vmem:[%s3897_s11] sm:$0xff] %vm412_vm0, %v2281_v45  ;;  %v2511_v20 = vmul.f32 %v2281_v45, %v2281_v45  ;;  %v2024_v42 = vpop.permute.xlu1 %2023  ;;  %v2788_v12 = vpop.f32.mrb[2].mxu0  ;;  %v2440_v7 = vsel %vm412_vm0, %v2281_v45, 0.0 }
 0x234   : > { %2099 = vst.msk [vmem:[#allocation3 + $0xa8] sm:$0xff] %vm2077_vm10, %v2024_v42  ;;  %v2284_v47 = vpop.f32.mrb[3].mxu0  ;;  %v1064_v51 = vpop.permute.xlu0 %1063  ;;  %v2514_v36 = vmul.f32 %v2788_v12, %v2788_v12  ;;  %v2546_v13 = vsel %vm412_vm0, %v2513_v46, 0.0  ;;  %v2445_v37 = vsel %vm412_vm0, %v2788_v12, 0.0  ;;  %v2130_v61 = vld [vmem:[#allocation3 + $0xa0] sm:$0xff] }
 0x235   : > { %2411 = vst.msk [vmem:[%s3897_s11 + $0x18] sm:$0xff] %vm412_vm0, %v2788_v12  ;;  %2409 = vst.msk [vmem:[%s3897_s11 + $0x8] sm:$0xff] %vm412_vm0, %v2284_v47  ;;  %v2441_v15 = vsel %vm412_vm0, %v2284_v47, 0.0  ;;  %v2512_v14 = vmul.f32 %v2284_v47, %v2284_v47  ;;  %v2543_v44 = vsel %vm412_vm0, %v2511_v20, 0.0 }
 0x236   : > { %1136 = vst.msk [vmem:[#allocation3 + $0xc0] sm:$0xff] %vm1111_vm5, %v1064_v51  ;;  %v2442_v58 = vadd.f32 %v2441_v15, %v2440_v7  ;;  %v2548_v28 = vsel %vm412_vm0, %v2514_v36, 0.0 }
 0x237   : > { %v2544_v21 = vsel %vm412_vm0, %v2512_v14, 0.0  ;;  %v2028_v60 = vpop.permute.xlu1 %2027 }
 0x238   : > { %v2444_v19 = vadd.f32 %v2443_v17, %v2442_v58  ;;  %v2545_v27 = vadd.f32 %v2544_v21, %v2543_v44  ;;  %2101 = vst.msk [vmem:[#allocation3 + $0xb8] sm:$0xff] %vm2077_vm10, %v2028_v60  ;;  %v1068_v49 = vpop.permute.xlu0 %1067  ;;  %v2132_v0 = vld [vmem:[#allocation3 + $0xb0] sm:$0xff] }
 0x239   : > { %1138 = vst.msk [vmem:[#allocation3 + $0xd0] sm:$0xff] %vm1111_vm5, %v1068_v49 }
 0x23a   : > { %v2547_v16 = vadd.f32 %v2546_v13, %v2545_v27  ;;  %v2446_v52 = vadd.f32 %v2445_v37, %v2444_v19 }
 0x23b   : > { %v1066_v62 = vpop.permute.xlu1 %1065  ;;  %v2131_v53 = vld [vmem:[#allocation3 + $0xa8] sm:$0xff] }
 0x23c   : > { %1137 = vst.msk [vmem:[#allocation3 + $0xc8] sm:$0xff] %vm1111_vm5, %v1066_v62  ;;  %v2152_v11 = vpack.c.bf16 %v2131_v53, %v2130_v61  ;;  %v1257_v63 = vpop.permute.xlu0 %1256  ;;  %v2549_v48 = vadd.f32 %v2548_v28, %v2547_v16 }
 0x23d   : > { %1329 = vst.msk [vmem:[#allocation3 + $0xc0] sm:$0xff] %vm1304_vm6, %v1257_v63 }
 0x23e   : > { %2805 = vmatprep.mubr.msk.bf16.mxu1 %vm2194_vm11, %v2152_v11 }
 0x23f   : > { %v1070_v3 = vpop.permute.xlu1 %1069  ;;  %v2133_v4 = vld [vmem:[#allocation3 + $0xb8] sm:$0xff] }
 0x240   : > { %1139 = vst.msk [vmem:[#allocation3 + $0xd8] sm:$0xff] %vm1111_vm5, %v1070_v3  ;;  %v2153_v32 = vpack.c.bf16 %v2133_v4, %v2132_v0  ;;  %v1261_v55 = vpop.permute.xlu0 %1260 }
 0x241   : > { %1331 = vst.msk [vmem:[#allocation3 + $0xd0] sm:$0xff] %vm1304_vm6, %v1261_v55 }
 0x242   : > { %2806 = vmatmul.mubr.msk.bf16.gmra.mrb[4].mxu1 %vm2194_vm11, %v2153_v32 }
 0x243   : > { %v1259_v18 = vpop.permute.xlu1 %1258 }
 0x244   : > { %1330 = vst.msk [vmem:[#allocation3 + $0xc8] sm:$0xff] %vm1304_vm6, %v1259_v18  ;;  %v1450_v30 = vpop.permute.xlu0 %1449 }
 0x245   : > { %1522 = vst.msk [vmem:[#allocation3 + $0xc0] sm:$0xff] %vm1497_vm7, %v1450_v30 }
 0x247   : > { %v1263_v31 = vpop.permute.xlu1 %1262 }
 0x248   : > { %1332 = vst.msk [vmem:[#allocation3 + $0xd8] sm:$0xff] %vm1304_vm6, %v1263_v31  ;;  %v1454_v33 = vpop.permute.xlu0 %1453 }
 0x249   : > { %1524 = vst.msk [vmem:[#allocation3 + $0xd0] sm:$0xff] %vm1497_vm7, %v1454_v33 }
 0x24b   : > { %v1452_v5 = vpop.permute.xlu1 %1451 }
 0x24c   : > { %1523 = vst.msk [vmem:[#allocation3 + $0xc8] sm:$0xff] %vm1497_vm7, %v1452_v5  ;;  %v1644_v1 = vpop.permute.xlu0 %1643 }
 0x24d   : > { %1716 = vst.msk [vmem:[#allocation3 + $0xc0] sm:$0xff] %vm1691_vm8, %v1644_v1 }
 0x24f   : > { %v1456_v6 = vpop.permute.xlu1 %1455 }
 0x250   : > { %1525 = vst.msk [vmem:[#allocation3 + $0xd8] sm:$0xff] %vm1497_vm7, %v1456_v6  ;;  %v1648_v39 = vpop.permute.xlu0 %1647 }
 0x251   : > { %1718 = vst.msk [vmem:[#allocation3 + $0xd0] sm:$0xff] %vm1691_vm8, %v1648_v39 }
 0x253   : > { %v1646_v22 = vpop.permute.xlu1 %1645 }
 0x254   : > { %1717 = vst.msk [vmem:[#allocation3 + $0xc8] sm:$0xff] %vm1691_vm8, %v1646_v22  ;;  %v1837_v50 = vpop.permute.xlu0 %1836 }
 0x255   : > { %1909 = vst.msk [vmem:[#allocation3 + $0xc0] sm:$0xff] %vm1884_vm9, %v1837_v50 }
 0x257   : > { %v1650_v8 = vpop.permute.xlu1 %1649 }
 0x258   : > { %1719 = vst.msk [vmem:[#allocation3 + $0xd8] sm:$0xff] %vm1691_vm8, %v1650_v8  ;;  %v1841_v56 = vpop.permute.xlu0 %1840 }
 0x259   : > { %v2791_v29 = vpop.f32.mrb[4].mxu0  ;;  %1911 = vst.msk [vmem:[#allocation3 + $0xd0] sm:$0xff] %vm1884_vm9, %v1841_v56 }
 0x25a   : > { %2414 = vst.msk [vmem:[%s3897_s11 + $0x30] sm:$0xff] %vm412_vm0, %v2791_v29  ;;  %v2297_v40 = vpop.f32.mrb[5].mxu0  ;;  %v2517_v35 = vmul.f32 %v2791_v29, %v2791_v29  ;;  %v2451_v2 = vsel %vm412_vm0, %v2791_v29, 0.0 }
 0x25b   : > { %2412 = vst.msk [vmem:[%s3897_s11 + $0x20] sm:$0xff] %vm412_vm0, %v2297_v40  ;;  %v2447_v34 = vsel %vm412_vm0, %v2297_v40, 0.0  ;;  %v2515_v57 = vmul.f32 %v2297_v40, %v2297_v40  ;;  %v1839_v23 = vpop.permute.xlu1 %1838  ;;  %v2792_v59 = vpop.f32.mrb[6].mxu0 }
 0x25c   : > { %v2448_v43 = vadd.f32 %v2447_v34, %v2446_v52  ;;  %1910 = vst.msk [vmem:[#allocation3 + $0xc8] sm:$0xff] %vm1884_vm9, %v1839_v23  ;;  %v2300_v25 = vpop.f32.mrb[7].mxu0  ;;  %v2030_v9 = vpop.permute.xlu0 %2029  ;;  %v2518_v38 = vmul.f32 %v2792_v59, %v2792_v59  ;;  %v2554_v51 = vsel %vm412_vm0, %v2517_v35, 0.0  ;;  %v2453_v46 = vsel %vm412_vm0, %v2792_v59, 0.0 }
 0x25d   : > { %2415 = vst.msk [vmem:[%s3897_s11 + $0x38] sm:$0xff] %vm412_vm0, %v2792_v59  ;;  %v2550_v54 = vsel %vm412_vm0, %v2515_v57, 0.0  ;;  %2413 = vst.msk [vmem:[%s3897_s11 + $0x28] sm:$0xff] %vm412_vm0, %v2300_v25  ;;  %v2449_v24 = vsel %vm412_vm0, %v2300_v25, 0.0  ;;  %v2516_v26 = vmul.f32 %v2300_v25, %v2300_v25 }
 0x25e   : > { %2102 = vst.msk [vmem:[#allocation3 + $0xc0] sm:$0xff] %vm2077_vm10, %v2030_v9  ;;  %v2551_v10 = vadd.f32 %v2550_v54, %v2549_v48  ;;  %v2450_v41 = vadd.f32 %v2449_v24, %v2448_v43  ;;  %v2556_v14 = vsel %vm412_vm0, %v2518_v38, 0.0 }
 0x25f   : > { %v2552_v45 = vsel %vm412_vm0, %v2516_v26, 0.0  ;;  %v1843_v20 = vpop.permute.xlu1 %1842 }
 0x260   : > { %v2452_v42 = vadd.f32 %v2451_v2, %v2450_v41  ;;  %v2553_v12 = vadd.f32 %v2552_v45, %v2551_v10  ;;  %1912 = vst.msk [vmem:[#allocation3 + $0xd8] sm:$0xff] %vm1884_vm9, %v1843_v20  ;;  %v2034_v47 = vpop.permute.xlu0 %2033 }
 0x261   : > { %2104 = vst.msk [vmem:[#allocation3 + $0xd0] sm:$0xff] %vm2077_vm10, %v2034_v47 }
 0x262   : > { %v2555_v7 = vadd.f32 %v2554_v51, %v2553_v12  ;;  %v2454_v15 = vadd.f32 %v2453_v46, %v2452_v42 }
 0x263   : > { %v2032_v58 = vpop.permute.xlu1 %2031 }
 0x264   : > { %2103 = vst.msk [vmem:[#allocation3 + $0xc8] sm:$0xff] %vm2077_vm10, %v2032_v58  ;;  %v1072_v17 = vpop.permute.xlu0 %1071  ;;  %v2557_v44 = vadd.f32 %v2556_v14, %v2555_v7 }
 0x265   : > { %1140 = vst.msk [vmem:[#allocation3 + $0xe0] sm:$0xff] %vm1111_vm5, %v1072_v17  ;;  %v2134_v60 = vld [vmem:[#allocation3 + $0xc0] sm:$0xff] }
 0x267   : > { %v2036_v36 = vpop.permute.xlu1 %2035 }
 0x268   : > { %2105 = vst.msk [vmem:[#allocation3 + $0xd8] sm:$0xff] %vm2077_vm10, %v2036_v36  ;;  %v1076_v21 = vpop.permute.xlu0 %1075  ;;  %v2136_v37 = vld [vmem:[#allocation3 + $0xd0] sm:$0xff] }
 0x269   : > { %1142 = vst.msk [vmem:[#allocation3 + $0xf0] sm:$0xff] %vm1111_vm5, %v1076_v21 }
 0x26b   : > { %v1074_v19 = vpop.permute.xlu1 %1073  ;;  %v2135_v27 = vld [vmem:[#allocation3 + $0xc8] sm:$0xff] }
 0x26c   : > { %1141 = vst.msk [vmem:[#allocation3 + $0xe8] sm:$0xff] %vm1111_vm5, %v1074_v19  ;;  %v2154_v49 = vpack.c.bf16 %v2135_v27, %v2134_v60  ;;  %v1265_v13 = vpop.permute.xlu0 %1264 }
 0x26d   : > { %1333 = vst.msk [vmem:[#allocation3 + $0xe0] sm:$0xff] %vm1304_vm6, %v1265_v13 }
 0x26e   : > { %2809 = vmatprep.mubr.msk.bf16.mxu1 %vm2194_vm11, %v2154_v49 }
 0x26f   : > { %v1078_v61 = vpop.permute.xlu1 %1077  ;;  %v2137_v16 = vld [vmem:[#allocation3 + $0xd8] sm:$0xff] }
 0x270   : > { %1143 = vst.msk [vmem:[#allocation3 + $0xf8] sm:$0xff] %vm1111_vm5, %v1078_v61  ;;  %v2155_v52 = vpack.c.bf16 %v2137_v16, %v2136_v37  ;;  %v1269_v28 = vpop.permute.xlu0 %1268 }
 0x271   : > { %1335 = vst.msk [vmem:[#allocation3 + $0xf0] sm:$0xff] %vm1304_vm6, %v1269_v28 }
 0x272   : > { %2810 = vmatmul.mubr.msk.bf16.gmra.mrb[8].mxu1 %vm2194_vm11, %v2155_v52 }
 0x273   : > { %v1267_v62 = vpop.permute.xlu1 %1266 }
 0x274   : > { %1334 = vst.msk [vmem:[#allocation3 + $0xe8] sm:$0xff] %vm1304_vm6, %v1267_v62  ;;  %v1458_v53 = vpop.permute.xlu0 %1457 }
 0x275   : > { %1526 = vst.msk [vmem:[#allocation3 + $0xe0] sm:$0xff] %vm1497_vm7, %v1458_v53 }
 0x277   : > { %v1271_v11 = vpop.permute.xlu1 %1270 }
 0x278   : > { %1336 = vst.msk [vmem:[#allocation3 + $0xf8] sm:$0xff] %vm1304_vm6, %v1271_v11  ;;  %v1462_v63 = vpop.permute.xlu0 %1461 }
 0x279   : > { %1528 = vst.msk [vmem:[#allocation3 + $0xf0] sm:$0xff] %vm1497_vm7, %v1462_v63 }
 0x27b   : > { %v1460_v48 = vpop.permute.xlu1 %1459 }
 0x27c   : > { %1527 = vst.msk [vmem:[#allocation3 + $0xe8] sm:$0xff] %vm1497_vm7, %v1460_v48  ;;  %v1652_v0 = vpop.permute.xlu0 %1651 }
 0x27d   : > { %1720 = vst.msk [vmem:[#allocation3 + $0xe0] sm:$0xff] %vm1691_vm8, %v1652_v0 }
 0x27f   : > { %v1464_v3 = vpop.permute.xlu1 %1463 }
 0x280   : > { %1529 = vst.msk [vmem:[#allocation3 + $0xf8] sm:$0xff] %vm1497_vm7, %v1464_v3  ;;  %v1656_v4 = vpop.permute.xlu0 %1655 }
 0x281   : > { %1722 = vst.msk [vmem:[#allocation3 + $0xf0] sm:$0xff] %vm1691_vm8, %v1656_v4 }
 0x283   : > { %v1654_v32 = vpop.permute.xlu1 %1653 }
 0x284   : > { %1721 = vst.msk [vmem:[#allocation3 + $0xe8] sm:$0xff] %vm1691_vm8, %v1654_v32  ;;  %v1845_v55 = vpop.permute.xlu0 %1844 }
 0x285   : > { %v2795_v18 = vpop.f32.mrb[8].mxu0  ;;  %1913 = vst.msk [vmem:[#allocation3 + $0xe0] sm:$0xff] %vm1884_vm9, %v1845_v55 }
 0x286   : > { %2418 = vst.msk [vmem:[%s3897_s11 + $0x50] sm:$0xff] %vm412_vm0, %v2795_v18  ;;  %v2313_v30 = vpop.f32.mrb[9].mxu0  ;;  %v2521_v50 = vmul.f32 %v2795_v18, %v2795_v18  ;;  %v2459_v57 = vsel %vm412_vm0, %v2795_v18, 0.0 }
 0x287   : > { %2416 = vst.msk [vmem:[%s3897_s11 + $0x40] sm:$0xff] %vm412_vm0, %v2313_v30  ;;  %v2455_v31 = vsel %vm412_vm0, %v2313_v30, 0.0  ;;  %v2519_v33 = vmul.f32 %v2313_v30, %v2313_v30  ;;  %v1658_v5 = vpop.permute.xlu1 %1657  ;;  %v2796_v1 = vpop.f32.mrb[10].mxu0 }
 0x288   : > { %v2456_v6 = vadd.f32 %v2455_v31, %v2454_v15  ;;  %1723 = vst.msk [vmem:[#allocation3 + $0xf8] sm:$0xff] %vm1691_vm8, %v1658_v5  ;;  %v2316_v39 = vpop.f32.mrb[11].mxu0  ;;  %v1849_v22 = vpop.permute.xlu0 %1848  ;;  %v2522_v23 = vmul.f32 %v2796_v1, %v2796_v1  ;;  %v2562_v54 = vsel %vm412_vm0, %v2521_v50, 0.0  ;;  %v2461_v24 = vsel %vm412_vm0, %v2796_v1, 0.0 }
 0x289   : > { %2419 = vst.msk [vmem:[%s3897_s11 + $0x58] sm:$0xff] %vm412_vm0, %v2796_v1  ;;  %v2558_v8 = vsel %vm412_vm0, %v2519_v33, 0.0  ;;  %2417 = vst.msk [vmem:[%s3897_s11 + $0x48] sm:$0xff] %vm412_vm0, %v2316_v39  ;;  %v2457_v56 = vsel %vm412_vm0, %v2316_v39, 0.0  ;;  %v2520_v29 = vmul.f32 %v2316_v39, %v2316_v39 }
 0x28a   : > { %1915 = vst.msk [vmem:[#allocation3 + $0xf0] sm:$0xff] %vm1884_vm9, %v1849_v22  ;;  %v2559_v40 = vadd.f32 %v2558_v8, %v2557_v44  ;;  %v2458_v34 = vadd.f32 %v2457_v56, %v2456_v6  ;;  %v2564_v41 = vsel %vm412_vm0, %v2522_v23, 0.0 }
 0x28b   : > { %v2560_v59 = vsel %vm412_vm0, %v2520_v29, 0.0  ;;  %v1847_v43 = vpop.permute.xlu1 %1846 }
 0x28c   : > { %v2460_v25 = vadd.f32 %v2459_v57, %v2458_v34  ;;  %v2561_v9 = vadd.f32 %v2560_v59, %v2559_v40  ;;  %1914 = vst.msk [vmem:[#allocation3 + $0xe8] sm:$0xff] %vm1884_vm9, %v1847_v43  ;;  %v2038_v35 = vpop.permute.xlu0 %2037 }
 0x28d   : > { %2106 = vst.msk [vmem:[#allocation3 + $0xe0] sm:$0xff] %vm2077_vm10, %v2038_v35 }
 0x28e   : > { %v2563_v26 = vadd.f32 %v2562_v54, %v2561_v9  ;;  %v2462_v10 = vadd.f32 %v2461_v24, %v2460_v25 }
 0x28f   : > { %v1851_v2 = vpop.permute.xlu1 %1850 }
 0x290   : > { %1916 = vst.msk [vmem:[#allocation3 + $0xf8] sm:$0xff] %vm1884_vm9, %v1851_v2  ;;  %v2042_v38 = vpop.permute.xlu0 %2041  ;;  %v2565_v45 = vadd.f32 %v2564_v41, %v2563_v26 }
 0x291   : > { %2108 = vst.msk [vmem:[#allocation3 + $0xf0] sm:$0xff] %vm2077_vm10, %v2042_v38 }
 0x293   : > { %v2040_v20 = vpop.permute.xlu1 %2039 }
 0x294   : > { %2107 = vst.msk [vmem:[#allocation3 + $0xe8] sm:$0xff] %vm2077_vm10, %v2040_v20  ;;  %v2138_v12 = vld [vmem:[#allocation3 + $0xe0] sm:$0xff] }
 0x297   : > { %v2044_v42 = vpop.permute.xlu1 %2043 }
 0x298   : > { %2109 = vst.msk [vmem:[#allocation3 + $0xf8] sm:$0xff] %vm2077_vm10, %v2044_v42  ;;  %v2140_v46 = vld [vmem:[#allocation3 + $0xf0] sm:$0xff] }
 0x29b   : > { %v2139_v47 = vld [vmem:[#allocation3 + $0xe8] sm:$0xff] }
 0x29c   : > { %v2156_v51 = vpack.c.bf16 %v2139_v47, %v2138_v12 }
 0x29e   : > { %2813 = vmatprep.mubr.msk.bf16.mxu1 %vm2194_vm11, %v2156_v51 }
 0x29f   : > { %v2141_v7 = vld [vmem:[#allocation3 + $0xf8] sm:$0xff] }
 0x2a0   : > { %v2157_v15 = vpack.c.bf16 %v2141_v7, %v2140_v46 }
 0x2a2   : > { %2814 = vmatmul.mubr.msk.bf16.gmra.mrb[12].mxu1 %vm2194_vm11, %v2157_v15 }
 0x2b5   : > { %v2799_v14 = vpop.f32.mrb[12].mxu0 }
 0x2b6   : > { %2422 = vst.msk [vmem:[%s3897_s11 + $0x70] sm:$0xff] %vm412_vm0, %v2799_v14  ;;  %v2329_v58 = vpop.f32.mrb[13].mxu0  ;;  %v2525_v19 = vmul.f32 %v2799_v14, %v2799_v14  ;;  %v2467_v16 = vsel %vm412_vm0, %v2799_v14, 0.0 }
 0x2b7   : > { %2420 = vst.msk [vmem:[%s3897_s11 + $0x60] sm:$0xff] %vm412_vm0, %v2329_v58  ;;  %v2463_v17 = vsel %vm412_vm0, %v2329_v58, 0.0  ;;  %v2523_v44 = vmul.f32 %v2329_v58, %v2329_v58  ;;  %v2800_v36 = vpop.f32.mrb[14].mxu0 }
 0x2b8   : > { %v2464_v21 = vadd.f32 %v2463_v17, %v2462_v10  ;;  %2423 = vst.msk [vmem:[%s3897_s11 + $0x78] sm:$0xff] %vm412_vm0, %v2800_v36  ;;  %v2332_v60 = vpop.f32.mrb[15].mxu0  ;;  %v2526_v52 = vmul.f32 %v2800_v36, %v2800_v36  ;;  %v2570_v11 = vsel %vm412_vm0, %v2525_v19, 0.0  ;;  %v2469_v63 = vsel %vm412_vm0, %v2800_v36, 0.0 }
 0x2b9   : > { %v2566_v27 = vsel %vm412_vm0, %v2523_v44, 0.0  ;;  %2421 = vst.msk [vmem:[%s3897_s11 + $0x68] sm:$0xff] %vm412_vm0, %v2332_v60  ;;  %v2465_v49 = vsel %vm412_vm0, %v2332_v60, 0.0  ;;  %v2524_v13 = vmul.f32 %v2332_v60, %v2332_v60 }
 0x2ba   : > { %v2567_v37 = vadd.f32 %v2566_v27, %v2565_v45  ;;  %v2466_v61 = vadd.f32 %v2465_v49, %v2464_v21  ;;  %v2572_v3 = vsel %vm412_vm0, %v2526_v52, 0.0 }
 0x2bb   : > { %v2568_v28 = vsel %vm412_vm0, %v2524_v13, 0.0 }
 0x2bc   : > { %v2468_v62 = vadd.f32 %v2467_v16, %v2466_v61  ;;  %v2569_v53 = vadd.f32 %v2568_v28, %v2567_v37 }
 0x2be   : > { %v2571_v48 = vadd.f32 %v2570_v11, %v2569_v53  ;;  %v2470_v0 = vadd.f32 %v2469_v63, %v2468_v62 }
 0x2c0   : > { %v2573_v4 = vadd.f32 %v2572_v3, %v2571_v48 }
 0x2e5   : > { %v2803_v32 = vpop.f32.mrb[0].mxu1 }
 0x2e6   : > { %2426 = vst.msk [vmem:[%s3897_s11 + $0x90] sm:$0xff] %vm412_vm0, %v2803_v32  ;;  %v2345_v55 = vpop.f32.mrb[1].mxu1  ;;  %v2529_v1 = vmul.f32 %v2803_v32, %v2803_v32  ;;  %v2475_v56 = vsel %vm412_vm0, %v2803_v32, 0.0 }
 0x2e7   : > { %2424 = vst.msk [vmem:[%s3897_s11 + $0x80] sm:$0xff] %vm412_vm0, %v2345_v55  ;;  %v2471_v18 = vsel %vm412_vm0, %v2345_v55, 0.0  ;;  %v2527_v30 = vmul.f32 %v2345_v55, %v2345_v55  ;;  %v2804_v31 = vpop.f32.mrb[2].mxu1 }
 0x2e8   : > { %v2472_v33 = vadd.f32 %v2471_v18, %v2470_v0  ;;  %2427 = vst.msk [vmem:[%s3897_s11 + $0x98] sm:$0xff] %vm412_vm0, %v2804_v31  ;;  %v2348_v5 = vpop.f32.mrb[3].mxu1  ;;  %v2530_v29 = vmul.f32 %v2804_v31, %v2804_v31  ;;  %v2578_v23 = vsel %vm412_vm0, %v2529_v1, 0.0  ;;  %v2477_v59 = vsel %vm412_vm0, %v2804_v31, 0.0 }
 0x2e9   : > { %v2574_v6 = vsel %vm412_vm0, %v2527_v30, 0.0  ;;  %2425 = vst.msk [vmem:[%s3897_s11 + $0x88] sm:$0xff] %vm412_vm0, %v2348_v5  ;;  %v2473_v39 = vsel %vm412_vm0, %v2348_v5, 0.0  ;;  %v2528_v22 = vmul.f32 %v2348_v5, %v2348_v5 }
 0x2ea   : > { %v2575_v50 = vadd.f32 %v2574_v6, %v2573_v4  ;;  %v2474_v8 = vadd.f32 %v2473_v39, %v2472_v33  ;;  %v2580_v9 = vsel %vm412_vm0, %v2530_v29, 0.0 }
 0x2eb   : > { %v2576_v40 = vsel %vm412_vm0, %v2528_v22, 0.0 }
 0x2ec   : > { %v2476_v34 = vadd.f32 %v2475_v56, %v2474_v8  ;;  %v2577_v57 = vadd.f32 %v2576_v40, %v2575_v50 }
 0x2ee   : > { %v2579_v43 = vadd.f32 %v2578_v23, %v2577_v57  ;;  %v2478_v25 = vadd.f32 %v2477_v59, %v2476_v34 }
 0x2f0   : > { %v2581_v35 = vadd.f32 %v2580_v9, %v2579_v43 }
 0x315   : > { %v2807_v54 = vpop.f32.mrb[4].mxu1 }
 0x316   : > { %2430 = vst.msk [vmem:[%s3897_s11 + $0xb0] sm:$0xff] %vm412_vm0, %v2807_v54  ;;  %v2361_v24 = vpop.f32.mrb[5].mxu1  ;;  %v2533_v45 = vmul.f32 %v2807_v54, %v2807_v54  ;;  %v2483_v46 = vsel %vm412_vm0, %v2807_v54, 0.0 }
 0x317   : > { %2428 = vst.msk [vmem:[%s3897_s11 + $0xa0] sm:$0xff] %vm412_vm0, %v2361_v24  ;;  %v2479_v26 = vsel %vm412_vm0, %v2361_v24, 0.0  ;;  %v2531_v10 = vmul.f32 %v2361_v24, %v2361_v24  ;;  %v2808_v41 = vpop.f32.mrb[6].mxu1 }
 0x318   : > { %v2480_v2 = vadd.f32 %v2479_v26, %v2478_v25  ;;  %2431 = vst.msk [vmem:[%s3897_s11 + $0xb8] sm:$0xff] %vm412_vm0, %v2808_v41  ;;  %v2364_v38 = vpop.f32.mrb[7].mxu1  ;;  %v2534_v7 = vmul.f32 %v2808_v41, %v2808_v41  ;;  %v2586_v17 = vsel %vm412_vm0, %v2533_v45, 0.0  ;;  %v2485_v44 = vsel %vm412_vm0, %v2808_v41, 0.0 }
 0x319   : > { %v2582_v20 = vsel %vm412_vm0, %v2531_v10, 0.0  ;;  %2429 = vst.msk [vmem:[%s3897_s11 + $0xa8] sm:$0xff] %vm412_vm0, %v2364_v38  ;;  %v2481_v42 = vsel %vm412_vm0, %v2364_v38, 0.0  ;;  %v2532_v12 = vmul.f32 %v2364_v38, %v2364_v38 }
 0x31a   : > { %v2583_v47 = vadd.f32 %v2582_v20, %v2581_v35  ;;  %v2482_v51 = vadd.f32 %v2481_v42, %v2480_v2  ;;  %v2588_v60 = vsel %vm412_vm0, %v2534_v7, 0.0 }
 0x31b   : > { %v2584_v15 = vsel %vm412_vm0, %v2532_v12, 0.0 }
 0x31c   : > { %v2484_v14 = vadd.f32 %v2483_v46, %v2482_v51  ;;  %v2585_v58 = vadd.f32 %v2584_v15, %v2583_v47 }
 0x31e   : > { %v2587_v36 = vadd.f32 %v2586_v17, %v2585_v58  ;;  %v2486_v21 = vadd.f32 %v2485_v44, %v2484_v14 }
 0x320   : > { %v2589_v19 = vadd.f32 %v2588_v60, %v2587_v36 }
 0x345   : > { %v2811_v27 = vpop.f32.mrb[8].mxu1 }
 0x346   : > { %2434 = vst.msk [vmem:[%s3897_s11 + $0xd0] sm:$0xff] %vm412_vm0, %v2811_v27  ;;  %v2377_v49 = vpop.f32.mrb[9].mxu1  ;;  %v2537_v28 = vmul.f32 %v2811_v27, %v2811_v27  ;;  %v2491_v0 = vsel %vm412_vm0, %v2811_v27, 0.0 }
 0x347   : > { %2432 = vst.msk [vmem:[%s3897_s11 + $0xc0] sm:$0xff] %vm412_vm0, %v2377_v49  ;;  %v2487_v13 = vsel %vm412_vm0, %v2377_v49, 0.0  ;;  %v2535_v37 = vmul.f32 %v2377_v49, %v2377_v49  ;;  %v2812_v61 = vpop.f32.mrb[10].mxu1 }
 0x348   : > { %v2488_v16 = vadd.f32 %v2487_v13, %v2486_v21  ;;  %2435 = vst.msk [vmem:[%s3897_s11 + $0xd8] sm:$0xff] %vm412_vm0, %v2812_v61  ;;  %v2380_v52 = vpop.f32.mrb[11].mxu1  ;;  %v2538_v3 = vmul.f32 %v2812_v61, %v2812_v61  ;;  %v2594_v18 = vsel %vm412_vm0, %v2537_v28, 0.0  ;;  %v2493_v30 = vsel %vm412_vm0, %v2812_v61, 0.0 }
 0x349   : > { %v2590_v62 = vsel %vm412_vm0, %v2535_v37, 0.0  ;;  %2433 = vst.msk [vmem:[%s3897_s11 + $0xc8] sm:$0xff] %vm412_vm0, %v2380_v52  ;;  %v2489_v53 = vsel %vm412_vm0, %v2380_v52, 0.0  ;;  %v2536_v11 = vmul.f32 %v2380_v52, %v2380_v52 }
 0x34a   : > { %v2591_v63 = vadd.f32 %v2590_v62, %v2589_v19  ;;  %v2490_v48 = vadd.f32 %v2489_v53, %v2488_v16  ;;  %v2596_v5 = vsel %vm412_vm0, %v2538_v3, 0.0 }
 0x34b   : > { %v2592_v4 = vsel %vm412_vm0, %v2536_v11, 0.0 }
 0x34c   : > { %v2492_v32 = vadd.f32 %v2491_v0, %v2490_v48  ;;  %v2593_v55 = vadd.f32 %v2592_v4, %v2591_v63 }
 0x34e   : > { %v2595_v31 = vadd.f32 %v2594_v18, %v2593_v55  ;;  %v2494_v33 = vadd.f32 %v2493_v30, %v2492_v32 }
 0x350   : > { %v2597_v1 = vadd.f32 %v2596_v5, %v2595_v31 }
 0x375   : > { %v2815_v6 = vpop.f32.mrb[12].mxu1 }
 0x376   : > { %2438 = vst.msk [vmem:[%s3897_s11 + $0xf0] sm:$0xff] %vm412_vm0, %v2815_v6  ;;  %v2393_v39 = vpop.f32.mrb[13].mxu1  ;;  %v2541_v40 = vmul.f32 %v2815_v6, %v2815_v6  ;;  %v2499_v25 = vsel %vm412_vm0, %v2815_v6, 0.0 }
 0x377   : > { %2436 = vst.msk [vmem:[%s3897_s11 + $0xe0] sm:$0xff] %vm412_vm0, %v2393_v39  ;;  %v2495_v22 = vsel %vm412_vm0, %v2393_v39, 0.0  ;;  %v2539_v50 = vmul.f32 %v2393_v39, %v2393_v39  ;;  %v2816_v8 = vpop.f32.mrb[14].mxu1 }
 0x378   : > { %v2496_v56 = vadd.f32 %v2495_v22, %v2494_v33  ;;  %2439 = vst.msk [vmem:[%s3897_s11 + $0xf8] sm:$0xff] %vm412_vm0, %v2816_v8  ;;  %v2396_v29 = vpop.f32.mrb[15].mxu1  ;;  %v2542_v9 = vmul.f32 %v2816_v8, %v2816_v8  ;;  %v2602_v26 = vsel %vm412_vm0, %v2541_v40, 0.0  ;;  %v2501_v10 = vsel %vm412_vm0, %v2816_v8, 0.0 }
 0x379   : > { %v2598_v34 = vsel %vm412_vm0, %v2539_v50, 0.0  ;;  %2437 = vst.msk [vmem:[%s3897_s11 + $0xe8] sm:$0xff] %vm412_vm0, %v2396_v29  ;;  %v2497_v57 = vsel %vm412_vm0, %v2396_v29, 0.0  ;;  %v2540_v23 = vmul.f32 %v2396_v29, %v2396_v29 }
 0x37a   : > { %v2599_v59 = vadd.f32 %v2598_v34, %v2597_v1  ;;  %v2498_v43 = vadd.f32 %v2497_v57, %v2496_v56  ;;  %v2604_v38 = vsel %vm412_vm0, %v2542_v9, 0.0 }
 0x37b   : > { %v2600_v35 = vsel %vm412_vm0, %v2540_v23, 0.0 }
 0x37c   : > { %v2500_v54 = vadd.f32 %v2499_v25, %v2498_v43  ;;  %v2601_v24 = vadd.f32 %v2600_v35, %v2599_v59 }
 0x37e   : > { %v2502_v41 = vadd.f32 %v2501_v10, %v2500_v54  ;;  %v2603_v2 = vadd.f32 %v2602_v26, %v2601_v24 }
 0x380   : > { %v2503_v45 = vrot.slane %v2502_v41, 4  ;;  %v2605_v20 = vadd.f32 %v2604_v38, %v2603_v2 }
 0x382   : > { %v2504_v42 = vadd.f32 %v2503_v45, %v2502_v41  ;;  %v2606_v12 = vrot.slane %v2605_v20, 4 }
 0x384   : > { %v2505_v47 = vrot.slane %v2504_v42, 2  ;;  %v2607_v51 = vadd.f32 %v2606_v12, %v2605_v20 }
 0x386   : > { %v2506_v46 = vadd.f32 %v2505_v47, %v2504_v42  ;;  %v2608_v7 = vrot.slane %v2607_v51, 2 }
 0x388   : > { %v2507_v15 = vrot.slane %v2506_v46, 1  ;;  %v2609_v14 = vadd.f32 %v2608_v7, %v2607_v51 }
 0x38a   : > { %v2508_v58 = vadd.f32 %v2507_v15, %v2506_v46  ;;  %v2610_v17 = vrot.slane %v2609_v14, 1 }
 0x38c   : > { %2510 = vst.msk [vmem:[%s265_s13] sm:$0x1] %vm2509_vm12, %v2508_v58  ;;  %v2611_v44 = vadd.f32 %v2610_v17, %v2609_v14 }
 0x38e   : > { %2612 = vst.msk [vmem:[%s268_s16] sm:$0x1] %vm2509_vm12, %v2611_v44 }
 0x38f PF: > { %s17_s21 = sadd.s32 1, %s2859_s21  }
 0x390   : > { %p14_p4 = scmp.ge.s32.totalorder %s17_s21, 4  }
 0x392   :  { %16 = sbr.rel (!%p14_p4) target bundleno = 1 (0x1), region = 92 }

</bundles_post_ra>
